<compile_context>
chip_gen: v5e
topology: v5e:2x2
jax: 0.10.0
libtpu: 0.0.40
codegen_flags: <defaults>
</compile_context>

<pallas_src>
import jax
import jax.numpy as jnp
from jax import lax
from jax.experimental import pallas as pl
from jax.experimental.pallas import tpu as pltpu

# --------------------------------------------------------------------------
# Hyperparams (defaults of the PyTorch Hyperparams dataclass)
# --------------------------------------------------------------------------
MAP_CONV0_CH, MAP_CONV0_K = 32, 5
MAP_CONV1_CH, MAP_CONV1_K = 64, 3
MAP_CONV2_CH, MAP_CONV2_K = 64, 3
MAP_POOL_K = 3
MAP_LIN_CH = 32
P_LIN0_CH = 28
P_LIN1_CH = 16
ACT_LIN0_CH = 32
ACT_LIN1_CH = 16
LEAKY_SLOPE = 0.01  # nn.LeakyReLU default

MXU_DTYPE = jnp.bfloat16  # matmul operand dtype (f32 accumulation everywhere)


def _leaky(x):
    return jnp.where(x >= 0, x, LEAKY_SLOPE * x)


# --------------------------------------------------------------------------
# Kernel
# --------------------------------------------------------------------------
def dqn_kernel(map_ref, p1_ref, p2_ref,
               c0w, c0b, c1w, c1b, c2w, c2b,
               mlw, mlb, pw0, pb0, pw1, pb1,
               aw0, ab0, aw1, ab1, aw2, ab2,
               out_ref):
    B = map_ref.shape[0]

    def mm(x_f32, w_bf16):
        # bf16 operands on the MXU, f32 accumulation.
        return jnp.dot(x_f32.astype(MXU_DTYPE), w_bf16,
                       preferred_element_type=jnp.float32)

    # ------------------------- map_net convolutions ------------------------
    # im2col conv: one (B*OH*OW, K*K*IC) @ (K*K*IC, OC) MXU matmul per layer.
    # Tap slices are static (fully unrolled); the lane-axis concat + reshape
    # is done once per layer on bf16 values.
    def conv_lrelu(x, w_ref, b_ref, K):
        Bx, IH, IW, IC = x.shape
        OH, OW = IH - K + 1, IW - K + 1
        OC = w_ref.shape[-1]
        xb = x.astype(MXU_DTYPE)                       # cast once per layer
        taps = [xb[:, kh:kh + OH, kw:kw + OW, :]       # (B, OH, OW, IC) each
                for kh in range(K) for kw in range(K)]
        patches = jnp.concatenate(taps, axis=-1)       # (B, OH, OW, K*K*IC)
        patches = patches.reshape(Bx * OH * OW, K * K * IC)
        y = jnp.dot(patches, w_ref[...],               # single MXU matmul
                    preferred_element_type=jnp.float32)
        y = _leaky(y + b_ref[...])                     # lane-dense (rows, OC)
        return y.reshape(Bx, OH, OW, OC)

    x = map_ref[...]                                  # (B, 11, 11, T) f32
    x = conv_lrelu(x, c0w, c0b, MAP_CONV0_K)          # (B, 7, 7, 32)
    x = conv_lrelu(x, c1w, c1b, MAP_CONV1_K)          # (B, 5, 5, 64)
    x = conv_lrelu(x, c2w, c2b, MAP_CONV2_K)          # (B, 3, 3, 64)

    # AvgPool2d(3) on the 3x3 feature map == spatial mean; Flatten -> (B, 64)
    PH, PW, C2 = x.shape[1], x.shape[2], x.shape[3]
    pooled = jnp.mean(x.reshape(B, PH * PW, C2), axis=1)          # (B, 64) f32

    map_feat = _leaky(mm(pooled, mlw[...]) + mlb[...])            # (B, MF)

    MF = mlw.shape[1]       # map_linear_chanels
    P = p1_ref.shape[1]     # player_info
    PF = pw1.shape[1]       # p_linear1_chanels

    # --------------------- p_net on both players at once -------------------
    # concat([map_feat, p], 1) @ W  ==  map_feat @ W[:MF] + p @ W[MF:]
    pp = jnp.concatenate([p1_ref[...], p2_ref[...]], axis=0)      # (2B, P)
    mf2 = jnp.concatenate([map_feat, map_feat], axis=0)           # (2B, MF)
    h = mm(mf2, pw0[0:MF, :]) + mm(pp, pw0[MF:MF + P, :]) + pb0[...]
    h = _leaky(h)
    pf = _leaky(mm(h, pw1[...]) + pb1[...])                       # (2B, PF)
    p1_feat = pf[0:B, :]
    p2_feat = pf[B:2 * B, :]

    # ----------------------------- action_taker ----------------------------
    h = (mm(map_feat, aw0[0:MF, :])
         + mm(p1_feat, aw0[MF:MF + PF, :])
         + mm(p2_feat, aw0[MF + PF:MF + 2 * PF, :])
         + ab0[...])
    h = _leaky(h)
    h = _leaky(mm(h, aw1[...]) + ab1[...])
    logits = mm(h, aw2[...]) + ab2[...]                           # (B, A) f32

    # nn.Softmax() on a 2-D input -> softmax over dim=1 (last dim)
    z = logits - jnp.max(logits, axis=-1, keepdims=True)
    e = jnp.exp(z)
    inv = pl.reciprocal(jnp.sum(e, axis=-1, keepdims=True), approx=True)
    out_ref[...] = (e * inv).astype(out_ref.dtype)


# --------------------------------------------------------------------------
# Wrapper
# --------------------------------------------------------------------------
def neural_network_forward(params, map_nchw, p1, p2):
    (c0w, c0b), (c1w, c1b), (c2w, c2b), (mlw, mlb), (pw0, pb0), (pw1, pb1), \
        (aw0, ab0), (aw1, ab1), (aw2, ab2) = params

    B = map_nchw.shape[0]
    map_nhwc = jnp.transpose(map_nchw, (0, 2, 3, 1))   # NCHW -> NHWC
    nb_action = aw2.shape[1]

    # Weights to bf16 once, at trace time (MXU operands); biases stay f32.
    # Conv weights (K, K, IC, OC) are flattened to (K*K*IC, OC) for im2col.
    bf = lambda w: w.astype(jnp.bfloat16)
    cw = lambda w: w.reshape(-1, w.shape[-1]).astype(jnp.bfloat16)
    flat = [cw(c0w), c0b, cw(c1w), c1b, cw(c2w), c2b,
            bf(mlw), mlb, bf(pw0), pb0, bf(pw1), pb1,
            bf(aw0), ab0, bf(aw1), ab1, bf(aw2), ab2]

    # Grid-less call: total VMEM footprint is far below the limit on
    # v5e/v6e/v7x.  (A batch grid with dimension_semantics=("parallel",)
    # only pays off on v7x for much larger batches.)
    return pl.pallas_call(
        dqn_kernel,
        out_shape=jax.ShapeDtypeStruct((B, nb_action), jnp.float32),
        in_specs=[pl.BlockSpec(memory_space=pltpu.MemorySpace.VMEM)] * (3 + len(flat)),
        out_specs=pl.BlockSpec(memory_space=pltpu.MemorySpace.VMEM),
    )(map_nhwc, p1, p2, *flat)


# --------------------------------------------------------------------------
# Deterministic parameter init (synthetic; shapes follow the nn.Module)
# --------------------------------------------------------------------------
def init_params(key, tile_types, player_info, nb_action):
    keys = jax.random.split(key, 9)

    def conv_p(k, ic, oc, ksz):
        kw_, kb_ = jax.random.split(k)
        s = (ic * ksz * ksz) ** -0.5
        w = jax.random.normal(kw_, (ksz, ksz, ic, oc), jnp.float32) * s
        b = jax.random.normal(kb_, (1, oc), jnp.float32) * s
        return w, b

    def lin_p(k, fin, fout):
        kw_, kb_ = jax.random.split(k)
        s = fin ** -0.5
        w = jax.random.normal(kw_, (fin, fout), jnp.float32) * s   # (in, out)
        b = jax.random.normal(kb_, (1, fout), jnp.float32) * s
        return w, b

    return (
        conv_p(keys[0], tile_types, MAP_CONV0_CH, MAP_CONV0_K),
        conv_p(keys[1], MAP_CONV0_CH, MAP_CONV1_CH, MAP_CONV1_K),
        conv_p(keys[2], MAP_CONV1_CH, MAP_CONV2_CH, MAP_CONV2_K),
        lin_p(keys[3], MAP_CONV2_CH, MAP_LIN_CH),
        lin_p(keys[4], MAP_LIN_CH + player_info, P_LIN0_CH),
        lin_p(keys[5], P_LIN0_CH, P_LIN1_CH),
        lin_p(keys[6], MAP_LIN_CH + 2 * P_LIN1_CH, ACT_LIN0_CH),
        lin_p(keys[7], ACT_LIN0_CH, ACT_LIN1_CH),
        lin_p(keys[8], ACT_LIN1_CH, nb_action),
    )


# --------------------------------------------------------------------------
# Pure-JAX reference (for verification only).  matmul_dtype=bf16 mirrors the
# kernel's MXU operand precision; matmul_dtype=f32 is the exact PyTorch math.
# --------------------------------------------------------------------------
def reference_forward(params, map_nchw, p1, p2, matmul_dtype=jnp.float32):
    (c0w, c0b), (c1w, c1b), (c2w, c2b), (mlw, mlb), (pw0, pb0), (pw1, pb1), \
        (aw0, ab0), (aw1, ab1), (aw2, ab2) = params

    def leaky(x):
        return jnp.where(x >= 0, x, LEAKY_SLOPE * x)

    def mm(a, b):
        return jnp.dot(a.astype(matmul_dtype), b.astype(matmul_dtype),
                       preferred_element_type=jnp.float32)

    def conv(x, w, b):
        y = lax.conv_general_dilated(
            x.astype(matmul_dtype), w.astype(matmul_dtype),
            window_strides=(1, 1), padding='VALID',
            dimension_numbers=('NHWC', 'HWIO', 'NHWC'),
            preferred_element_type=jnp.float32)
        return leaky(y + b.reshape(1, 1, 1, -1))

    x = jnp.transpose(map_nchw, (0, 2, 3, 1))
    x = conv(x, c0w, c0b)
    x = conv(x, c1w, c1b)
    x = conv(x, c2w, c2b)
    pooled = jnp.mean(x, axis=(1, 2))                   # AvgPool2d(3) on 3x3 + Flatten
    mf = leaky(mm(pooled, mlw) + mlb)

    def p_net(p):
        h = leaky(mm(jnp.concatenate([mf, p], axis=1), pw0) + pb0)
        return leaky(mm(h, pw1) + pb1)

    f1, f2 = p_net(p1), p_net(p2)
    h = leaky(mm(jnp.concatenate([mf, f1, f2], axis=1), aw0) + ab0)
    h = leaky(mm(h, aw1) + ab1)
    logits = mm(h, aw2) + ab2
    return jax.nn.softmax(logits, axis=-1)


# --------------------------------------------------------------------------
if __name__ == "__main__":
    TILE_TYPES = 4     # one-hot tile channels
    PLAYER_INFO = 4
    NB_ACTION = 8
    B = 2
    H = W = 11         # 11 -conv5-> 7 -conv3-> 5 -conv3-> 3 -avgpool3-> 1x1 (matches Linear(64, 32))

    key = jax.random.PRNGKey(0)
    k_params, k_map, k_p1, k_p2 = jax.random.split(key, 4)

    params = init_params(k_params, TILE_TYPES, PLAYER_INFO, NB_ACTION)
    map_x = jax.random.normal(k_map, (B, TILE_TYPES, H, W), jnp.float32)   # NCHW, like PyTorch
    p1 = jax.random.normal(k_p1, (B, PLAYER_INFO), jnp.float32)
    p2 = jax.random.normal(k_p2, (B, PLAYER_INFO), jnp.float32)

    out = jax.jit(neural_network_forward)(params, map_x, p1, p2)
    out = jax.block_until_ready(out)
    assert out.shape == (B, NB_ACTION)

    # Tight check vs. a reference using the same bf16 MXU-operand precision.
    ref_bf16 = reference_forward(params, map_x, p1, p2, matmul_dtype=jnp.bfloat16)
    assert jnp.allclose(out, ref_bf16, atol=5e-3, rtol=5e-3), (out, ref_bf16)

    # Coarse sanity check vs. the full-f32 PyTorch-equivalent math.
    ref_f32 = reference_forward(params, map_x, p1, p2, matmul_dtype=jnp.float32)
    assert jnp.allclose(out, ref_f32, atol=5e-2, rtol=5e-2), (out, ref_f32)

    print("KERNEL_OK")
</pallas_src>

<mosaic_0001>
module attributes {stable_mosaic.version = 11 : i64} {
  func.func @dqn_kernel(%arg0: memref<2x11x11x4xf32, #tpu.memory_space<vmem>>, %arg1: memref<2x4xf32, #tpu.memory_space<vmem>>, %arg2: memref<2x4xf32, #tpu.memory_space<vmem>>, %arg3: memref<100x32xbf16, #tpu.memory_space<vmem>>, %arg4: memref<1x32xf32, #tpu.memory_space<vmem>>, %arg5: memref<288x64xbf16, #tpu.memory_space<vmem>>, %arg6: memref<1x64xf32, #tpu.memory_space<vmem>>, %arg7: memref<576x64xbf16, #tpu.memory_space<vmem>>, %arg8: memref<1x64xf32, #tpu.memory_space<vmem>>, %arg9: memref<64x32xbf16, #tpu.memory_space<vmem>>, %arg10: memref<1x32xf32, #tpu.memory_space<vmem>>, %arg11: memref<36x28xbf16, #tpu.memory_space<vmem>>, %arg12: memref<1x28xf32, #tpu.memory_space<vmem>>, %arg13: memref<28x16xbf16, #tpu.memory_space<vmem>>, %arg14: memref<1x16xf32, #tpu.memory_space<vmem>>, %arg15: memref<64x32xbf16, #tpu.memory_space<vmem>>, %arg16: memref<1x32xf32, #tpu.memory_space<vmem>>, %arg17: memref<32x16xbf16, #tpu.memory_space<vmem>>, %arg18: memref<1x16xf32, #tpu.memory_space<vmem>>, %arg19: memref<16x8xbf16, #tpu.memory_space<vmem>>, %arg20: memref<1x8xf32, #tpu.memory_space<vmem>>, %arg21: memref<2x8xf32, #tpu.memory_space<vmem>>) attributes {dimension_semantics = [], scalar_prefetch = 0 : i64, scratch_operands = 0 : i64, tpu.core_type = #tpu.core_type<tc>} {
    %c0 = arith.constant 0 : index
    %c0_0 = arith.constant 0 : index
    %c0_1 = arith.constant 0 : index
    %c0_2 = arith.constant 0 : index
    %0 = vector.load %arg0[%c0, %c0_0, %c0_1, %c0_2] : memref<2x11x11x4xf32, #tpu.memory_space<vmem>>, vector<2x11x11x4xf32>
    %1 = arith.truncf %0 : vector<2x11x11x4xf32> to vector<2x11x11x4xbf16>
    %2 = vector.extract_strided_slice %1 {offsets = [0, 0, 0, 0], sizes = [2, 7, 7, 4], strides = [1, 1, 1, 1]} : vector<2x11x11x4xbf16> to vector<2x7x7x4xbf16>
    %3 = vector.extract_strided_slice %1 {offsets = [0, 0, 1, 0], sizes = [2, 7, 7, 4], strides = [1, 1, 1, 1]} : vector<2x11x11x4xbf16> to vector<2x7x7x4xbf16>
    %4 = vector.extract_strided_slice %1 {offsets = [0, 0, 2, 0], sizes = [2, 7, 7, 4], strides = [1, 1, 1, 1]} : vector<2x11x11x4xbf16> to vector<2x7x7x4xbf16>
    %5 = vector.extract_strided_slice %1 {offsets = [0, 0, 3, 0], sizes = [2, 7, 7, 4], strides = [1, 1, 1, 1]} : vector<2x11x11x4xbf16> to vector<2x7x7x4xbf16>
    %6 = vector.extract_strided_slice %1 {offsets = [0, 0, 4, 0], sizes = [2, 7, 7, 4], strides = [1, 1, 1, 1]} : vector<2x11x11x4xbf16> to vector<2x7x7x4xbf16>
    %7 = vector.extract_strided_slice %1 {offsets = [0, 1, 0, 0], sizes = [2, 7, 7, 4], strides = [1, 1, 1, 1]} : vector<2x11x11x4xbf16> to vector<2x7x7x4xbf16>
    %8 = vector.extract_strided_slice %1 {offsets = [0, 1, 1, 0], sizes = [2, 7, 7, 4], strides = [1, 1, 1, 1]} : vector<2x11x11x4xbf16> to vector<2x7x7x4xbf16>
    %9 = vector.extract_strided_slice %1 {offsets = [0, 1, 2, 0], sizes = [2, 7, 7, 4], strides = [1, 1, 1, 1]} : vector<2x11x11x4xbf16> to vector<2x7x7x4xbf16>
    %10 = vector.extract_strided_slice %1 {offsets = [0, 1, 3, 0], sizes = [2, 7, 7, 4], strides = [1, 1, 1, 1]} : vector<2x11x11x4xbf16> to vector<2x7x7x4xbf16>
    %11 = vector.extract_strided_slice %1 {offsets = [0, 1, 4, 0], sizes = [2, 7, 7, 4], strides = [1, 1, 1, 1]} : vector<2x11x11x4xbf16> to vector<2x7x7x4xbf16>
    %12 = vector.extract_strided_slice %1 {offsets = [0, 2, 0, 0], sizes = [2, 7, 7, 4], strides = [1, 1, 1, 1]} : vector<2x11x11x4xbf16> to vector<2x7x7x4xbf16>
    %13 = vector.extract_strided_slice %1 {offsets = [0, 2, 1, 0], sizes = [2, 7, 7, 4], strides = [1, 1, 1, 1]} : vector<2x11x11x4xbf16> to vector<2x7x7x4xbf16>
    %14 = vector.extract_strided_slice %1 {offsets = [0, 2, 2, 0], sizes = [2, 7, 7, 4], strides = [1, 1, 1, 1]} : vector<2x11x11x4xbf16> to vector<2x7x7x4xbf16>
    %15 = vector.extract_strided_slice %1 {offsets = [0, 2, 3, 0], sizes = [2, 7, 7, 4], strides = [1, 1, 1, 1]} : vector<2x11x11x4xbf16> to vector<2x7x7x4xbf16>
    %16 = vector.extract_strided_slice %1 {offsets = [0, 2, 4, 0], sizes = [2, 7, 7, 4], strides = [1, 1, 1, 1]} : vector<2x11x11x4xbf16> to vector<2x7x7x4xbf16>
    %17 = vector.extract_strided_slice %1 {offsets = [0, 3, 0, 0], sizes = [2, 7, 7, 4], strides = [1, 1, 1, 1]} : vector<2x11x11x4xbf16> to vector<2x7x7x4xbf16>
    %18 = vector.extract_strided_slice %1 {offsets = [0, 3, 1, 0], sizes = [2, 7, 7, 4], strides = [1, 1, 1, 1]} : vector<2x11x11x4xbf16> to vector<2x7x7x4xbf16>
    %19 = vector.extract_strided_slice %1 {offsets = [0, 3, 2, 0], sizes = [2, 7, 7, 4], strides = [1, 1, 1, 1]} : vector<2x11x11x4xbf16> to vector<2x7x7x4xbf16>
    %20 = vector.extract_strided_slice %1 {offsets = [0, 3, 3, 0], sizes = [2, 7, 7, 4], strides = [1, 1, 1, 1]} : vector<2x11x11x4xbf16> to vector<2x7x7x4xbf16>
    %21 = vector.extract_strided_slice %1 {offsets = [0, 3, 4, 0], sizes = [2, 7, 7, 4], strides = [1, 1, 1, 1]} : vector<2x11x11x4xbf16> to vector<2x7x7x4xbf16>
    %22 = vector.extract_strided_slice %1 {offsets = [0, 4, 0, 0], sizes = [2, 7, 7, 4], strides = [1, 1, 1, 1]} : vector<2x11x11x4xbf16> to vector<2x7x7x4xbf16>
    %23 = vector.extract_strided_slice %1 {offsets = [0, 4, 1, 0], sizes = [2, 7, 7, 4], strides = [1, 1, 1, 1]} : vector<2x11x11x4xbf16> to vector<2x7x7x4xbf16>
    %24 = vector.extract_strided_slice %1 {offsets = [0, 4, 2, 0], sizes = [2, 7, 7, 4], strides = [1, 1, 1, 1]} : vector<2x11x11x4xbf16> to vector<2x7x7x4xbf16>
    %25 = vector.extract_strided_slice %1 {offsets = [0, 4, 3, 0], sizes = [2, 7, 7, 4], strides = [1, 1, 1, 1]} : vector<2x11x11x4xbf16> to vector<2x7x7x4xbf16>
    %26 = vector.extract_strided_slice %1 {offsets = [0, 4, 4, 0], sizes = [2, 7, 7, 4], strides = [1, 1, 1, 1]} : vector<2x11x11x4xbf16> to vector<2x7x7x4xbf16>
    %27 = tpu.concatenate %2, %3, %4, %5, %6, %7, %8, %9, %10, %11, %12, %13, %14, %15, %16, %17 in 3 : vector<2x7x7x4xbf16>, vector<2x7x7x4xbf16>, vector<2x7x7x4xbf16>, vector<2x7x7x4xbf16>, vector<2x7x7x4xbf16>, vector<2x7x7x4xbf16>, vector<2x7x7x4xbf16>, vector<2x7x7x4xbf16>, vector<2x7x7x4xbf16>, vector<2x7x7x4xbf16>, vector<2x7x7x4xbf16>, vector<2x7x7x4xbf16>, vector<2x7x7x4xbf16>, vector<2x7x7x4xbf16>, vector<2x7x7x4xbf16>, vector<2x7x7x4xbf16> -> vector<2x7x7x64xbf16>
    %28 = tpu.concatenate %18, %19, %20, %21, %22, %23, %24, %25, %26 in 3 : vector<2x7x7x4xbf16>, vector<2x7x7x4xbf16>, vector<2x7x7x4xbf16>, vector<2x7x7x4xbf16>, vector<2x7x7x4xbf16>, vector<2x7x7x4xbf16>, vector<2x7x7x4xbf16>, vector<2x7x7x4xbf16>, vector<2x7x7x4xbf16> -> vector<2x7x7x36xbf16>
    %29 = tpu.concatenate %27, %28 in 3 : vector<2x7x7x64xbf16>, vector<2x7x7x36xbf16> -> vector<2x7x7x100xbf16>
    %30 = vector.shape_cast %29 : vector<2x7x7x100xbf16> to vector<98x100xbf16>
    %c0_3 = arith.constant 0 : index
    %c0_4 = arith.constant 0 : index
    %31 = vector.load %arg3[%c0_3, %c0_4] : memref<100x32xbf16, #tpu.memory_space<vmem>>, vector<100x32xbf16>
    %cst = arith.constant dense<0.000000e+00> : vector<98x32xf32>
    %32 = tpu.matmul %30, %31, %cst {dimension_numbers = #tpu.dot_dimension_numbers<[1], [0], [0], [1], [0, 0, 1, 1], [], []>} : vector<98x100xbf16>, vector<100x32xbf16>, vector<98x32xf32> -> vector<98x32xf32>
    %c0_5 = arith.constant 0 : index
    %c0_6 = arith.constant 0 : index
    %33 = vector.load %arg4[%c0_5, %c0_6] : memref<1x32xf32, #tpu.memory_space<vmem>>, vector<1x32xf32>
    %34 = vector.broadcast %33 : vector<1x32xf32> to vector<98x32xf32>
    %35 = arith.addf %32, %34 : vector<98x32xf32>
    %cst_7 = arith.constant 0.000000e+00 : f32
    %36 = vector.broadcast %cst_7 : f32 to vector<98x32xf32>
    %37 = arith.cmpf oge, %35, %36 : vector<98x32xf32>
    %cst_8 = arith.constant 0.00999999977 : f32
    %38 = vector.broadcast %cst_8 : f32 to vector<98x32xf32>
    %39 = arith.mulf %38, %35 : vector<98x32xf32>
    %40 = arith.select %37, %35, %39 : vector<98x32xi1>, vector<98x32xf32>
    %41 = vector.shape_cast %40 : vector<98x32xf32> to vector<2x7x7x32xf32>
    %42 = arith.truncf %41 : vector<2x7x7x32xf32> to vector<2x7x7x32xbf16>
    %43 = vector.extract_strided_slice %42 {offsets = [0, 0, 0, 0], sizes = [2, 5, 5, 32], strides = [1, 1, 1, 1]} : vector<2x7x7x32xbf16> to vector<2x5x5x32xbf16>
    %44 = vector.extract_strided_slice %42 {offsets = [0, 0, 1, 0], sizes = [2, 5, 5, 32], strides = [1, 1, 1, 1]} : vector<2x7x7x32xbf16> to vector<2x5x5x32xbf16>
    %45 = vector.extract_strided_slice %42 {offsets = [0, 0, 2, 0], sizes = [2, 5, 5, 32], strides = [1, 1, 1, 1]} : vector<2x7x7x32xbf16> to vector<2x5x5x32xbf16>
    %46 = vector.extract_strided_slice %42 {offsets = [0, 1, 0, 0], sizes = [2, 5, 5, 32], strides = [1, 1, 1, 1]} : vector<2x7x7x32xbf16> to vector<2x5x5x32xbf16>
    %47 = vector.extract_strided_slice %42 {offsets = [0, 1, 1, 0], sizes = [2, 5, 5, 32], strides = [1, 1, 1, 1]} : vector<2x7x7x32xbf16> to vector<2x5x5x32xbf16>
    %48 = vector.extract_strided_slice %42 {offsets = [0, 1, 2, 0], sizes = [2, 5, 5, 32], strides = [1, 1, 1, 1]} : vector<2x7x7x32xbf16> to vector<2x5x5x32xbf16>
    %49 = vector.extract_strided_slice %42 {offsets = [0, 2, 0, 0], sizes = [2, 5, 5, 32], strides = [1, 1, 1, 1]} : vector<2x7x7x32xbf16> to vector<2x5x5x32xbf16>
    %50 = vector.extract_strided_slice %42 {offsets = [0, 2, 1, 0], sizes = [2, 5, 5, 32], strides = [1, 1, 1, 1]} : vector<2x7x7x32xbf16> to vector<2x5x5x32xbf16>
    %51 = vector.extract_strided_slice %42 {offsets = [0, 2, 2, 0], sizes = [2, 5, 5, 32], strides = [1, 1, 1, 1]} : vector<2x7x7x32xbf16> to vector<2x5x5x32xbf16>
    %52 = tpu.concatenate %43, %44, %45, %46, %47, %48, %49, %50, %51 in 3 : vector<2x5x5x32xbf16>, vector<2x5x5x32xbf16>, vector<2x5x5x32xbf16>, vector<2x5x5x32xbf16>, vector<2x5x5x32xbf16>, vector<2x5x5x32xbf16>, vector<2x5x5x32xbf16>, vector<2x5x5x32xbf16>, vector<2x5x5x32xbf16> -> vector<2x5x5x288xbf16>
    %53 = vector.shape_cast %52 : vector<2x5x5x288xbf16> to vector<50x288xbf16>
    %c0_9 = arith.constant 0 : index
    %c0_10 = arith.constant 0 : index
    %54 = vector.load %arg5[%c0_9, %c0_10] : memref<288x64xbf16, #tpu.memory_space<vmem>>, vector<288x64xbf16>
    %cst_11 = arith.constant dense<0.000000e+00> : vector<50x64xf32>
    %55 = tpu.matmul %53, %54, %cst_11 {dimension_numbers = #tpu.dot_dimension_numbers<[1], [0], [0], [1], [0, 0, 1, 1], [], []>} : vector<50x288xbf16>, vector<288x64xbf16>, vector<50x64xf32> -> vector<50x64xf32>
    %c0_12 = arith.constant 0 : index
    %c0_13 = arith.constant 0 : index
    %56 = vector.load %arg6[%c0_12, %c0_13] : memref<1x64xf32, #tpu.memory_space<vmem>>, vector<1x64xf32>
    %57 = vector.broadcast %56 : vector<1x64xf32> to vector<50x64xf32>
    %58 = arith.addf %55, %57 : vector<50x64xf32>
    %cst_14 = arith.constant 0.000000e+00 : f32
    %59 = vector.broadcast %cst_14 : f32 to vector<50x64xf32>
    %60 = arith.cmpf oge, %58, %59 : vector<50x64xf32>
    %cst_15 = arith.constant 0.00999999977 : f32
    %61 = vector.broadcast %cst_15 : f32 to vector<50x64xf32>
    %62 = arith.mulf %61, %58 : vector<50x64xf32>
    %63 = arith.select %60, %58, %62 : vector<50x64xi1>, vector<50x64xf32>
    %64 = vector.shape_cast %63 : vector<50x64xf32> to vector<2x5x5x64xf32>
    %65 = arith.truncf %64 : vector<2x5x5x64xf32> to vector<2x5x5x64xbf16>
    %66 = vector.extract_strided_slice %65 {offsets = [0, 0, 0, 0], sizes = [2, 3, 3, 64], strides = [1, 1, 1, 1]} : vector<2x5x5x64xbf16> to vector<2x3x3x64xbf16>
    %67 = vector.extract_strided_slice %65 {offsets = [0, 0, 1, 0], sizes = [2, 3, 3, 64], strides = [1, 1, 1, 1]} : vector<2x5x5x64xbf16> to vector<2x3x3x64xbf16>
    %68 = vector.extract_strided_slice %65 {offsets = [0, 0, 2, 0], sizes = [2, 3, 3, 64], strides = [1, 1, 1, 1]} : vector<2x5x5x64xbf16> to vector<2x3x3x64xbf16>
    %69 = vector.extract_strided_slice %65 {offsets = [0, 1, 0, 0], sizes = [2, 3, 3, 64], strides = [1, 1, 1, 1]} : vector<2x5x5x64xbf16> to vector<2x3x3x64xbf16>
    %70 = vector.extract_strided_slice %65 {offsets = [0, 1, 1, 0], sizes = [2, 3, 3, 64], strides = [1, 1, 1, 1]} : vector<2x5x5x64xbf16> to vector<2x3x3x64xbf16>
    %71 = vector.extract_strided_slice %65 {offsets = [0, 1, 2, 0], sizes = [2, 3, 3, 64], strides = [1, 1, 1, 1]} : vector<2x5x5x64xbf16> to vector<2x3x3x64xbf16>
    %72 = vector.extract_strided_slice %65 {offsets = [0, 2, 0, 0], sizes = [2, 3, 3, 64], strides = [1, 1, 1, 1]} : vector<2x5x5x64xbf16> to vector<2x3x3x64xbf16>
    %73 = vector.extract_strided_slice %65 {offsets = [0, 2, 1, 0], sizes = [2, 3, 3, 64], strides = [1, 1, 1, 1]} : vector<2x5x5x64xbf16> to vector<2x3x3x64xbf16>
    %74 = vector.extract_strided_slice %65 {offsets = [0, 2, 2, 0], sizes = [2, 3, 3, 64], strides = [1, 1, 1, 1]} : vector<2x5x5x64xbf16> to vector<2x3x3x64xbf16>
    %75 = tpu.concatenate %66, %67, %68, %69, %70, %71, %72, %73, %74 in 3 : vector<2x3x3x64xbf16>, vector<2x3x3x64xbf16>, vector<2x3x3x64xbf16>, vector<2x3x3x64xbf16>, vector<2x3x3x64xbf16>, vector<2x3x3x64xbf16>, vector<2x3x3x64xbf16>, vector<2x3x3x64xbf16>, vector<2x3x3x64xbf16> -> vector<2x3x3x576xbf16>
    %76 = vector.shape_cast %75 : vector<2x3x3x576xbf16> to vector<18x576xbf16>
    %c0_16 = arith.constant 0 : index
    %c0_17 = arith.constant 0 : index
    %77 = vector.load %arg7[%c0_16, %c0_17] : memref<576x64xbf16, #tpu.memory_space<vmem>>, vector<576x64xbf16>
    %cst_18 = arith.constant dense<0.000000e+00> : vector<18x64xf32>
    %78 = tpu.matmul %76, %77, %cst_18 {dimension_numbers = #tpu.dot_dimension_numbers<[1], [0], [0], [1], [0, 0, 1, 1], [], []>} : vector<18x576xbf16>, vector<576x64xbf16>, vector<18x64xf32> -> vector<18x64xf32>
    %c0_19 = arith.constant 0 : index
    %c0_20 = arith.constant 0 : index
    %79 = vector.load %arg8[%c0_19, %c0_20] : memref<1x64xf32, #tpu.memory_space<vmem>>, vector<1x64xf32>
    %80 = vector.broadcast %79 : vector<1x64xf32> to vector<18x64xf32>
    %81 = arith.addf %78, %80 : vector<18x64xf32>
    %cst_21 = arith.constant 0.000000e+00 : f32
    %82 = vector.broadcast %cst_21 : f32 to vector<18x64xf32>
    %83 = arith.cmpf oge, %81, %82 : vector<18x64xf32>
    %cst_22 = arith.constant 0.00999999977 : f32
    %84 = vector.broadcast %cst_22 : f32 to vector<18x64xf32>
    %85 = arith.mulf %84, %81 : vector<18x64xf32>
    %86 = arith.select %83, %81, %85 : vector<18x64xi1>, vector<18x64xf32>
    %87 = vector.shape_cast %86 : vector<18x64xf32> to vector<2x3x3x64xf32>
    %88 = vector.shape_cast %87 : vector<2x3x3x64xf32> to vector<2x9x64xf32>
    %cst_23 = arith.constant dense<0.000000e+00> : vector<2x64xf32>
    %89 = vector.multi_reduction <add>, %88, %cst_23 [1] : vector<2x9x64xf32> to vector<2x64xf32>
    %cst_24 = arith.constant 9.000000e+00 : f32
    %90 = vector.broadcast %cst_24 : f32 to vector<2x64xf32>
    %91 = arith.divf %89, %90 : vector<2x64xf32>
    %c0_25 = arith.constant 0 : index
    %c0_26 = arith.constant 0 : index
    %92 = vector.load %arg9[%c0_25, %c0_26] : memref<64x32xbf16, #tpu.memory_space<vmem>>, vector<64x32xbf16>
    %93 = arith.truncf %91 : vector<2x64xf32> to vector<2x64xbf16>
    %cst_27 = arith.constant dense<0.000000e+00> : vector<2x32xf32>
    %94 = tpu.matmul %93, %92, %cst_27 {dimension_numbers = #tpu.dot_dimension_numbers<[1], [0], [0], [1], [0, 0, 1, 1], [], []>} : vector<2x64xbf16>, vector<64x32xbf16>, vector<2x32xf32> -> vector<2x32xf32>
    %c0_28 = arith.constant 0 : index
    %c0_29 = arith.constant 0 : index
    %95 = vector.load %arg10[%c0_28, %c0_29] : memref<1x32xf32, #tpu.memory_space<vmem>>, vector<1x32xf32>
    %96 = vector.broadcast %95 : vector<1x32xf32> to vector<2x32xf32>
    %97 = arith.addf %94, %96 : vector<2x32xf32>
    %cst_30 = arith.constant 0.000000e+00 : f32
    %98 = vector.broadcast %cst_30 : f32 to vector<2x32xf32>
    %99 = arith.cmpf oge, %97, %98 : vector<2x32xf32>
    %cst_31 = arith.constant 0.00999999977 : f32
    %100 = vector.broadcast %cst_31 : f32 to vector<2x32xf32>
    %101 = arith.mulf %100, %97 : vector<2x32xf32>
    %102 = arith.select %99, %97, %101 : vector<2x32xi1>, vector<2x32xf32>
    %c0_32 = arith.constant 0 : index
    %c0_33 = arith.constant 0 : index
    %103 = vector.load %arg1[%c0_32, %c0_33] : memref<2x4xf32, #tpu.memory_space<vmem>>, vector<2x4xf32>
    %c0_34 = arith.constant 0 : index
    %c0_35 = arith.constant 0 : index
    %104 = vector.load %arg2[%c0_34, %c0_35] : memref<2x4xf32, #tpu.memory_space<vmem>>, vector<2x4xf32>
    %105 = tpu.concatenate %103, %104 in 0 : vector<2x4xf32>, vector<2x4xf32> -> vector<4x4xf32>
    %106 = tpu.concatenate %102, %102 in 0 : vector<2x32xf32>, vector<2x32xf32> -> vector<4x32xf32>
    %c0_36 = arith.constant 0 : index
    %c0_37 = arith.constant 0 : index
    %107 = vector.load %arg11[%c0_36, %c0_37] : memref<36x28xbf16, #tpu.memory_space<vmem>>, vector<32x28xbf16>
    %108 = arith.truncf %106 : vector<4x32xf32> to vector<4x32xbf16>
    %cst_38 = arith.constant dense<0.000000e+00> : vector<4x28xf32>
    %109 = tpu.matmul %108, %107, %cst_38 {dimension_numbers = #tpu.dot_dimension_numbers<[1], [0], [0], [1], [0, 0, 1, 1], [], []>} : vector<4x32xbf16>, vector<32x28xbf16>, vector<4x28xf32> -> vector<4x28xf32>
    %c32 = arith.constant 32 : index
    %c0_39 = arith.constant 0 : index
    %110 = vector.load %arg11[%c32, %c0_39] : memref<36x28xbf16, #tpu.memory_space<vmem>>, vector<4x28xbf16>
    %111 = arith.truncf %105 : vector<4x4xf32> to vector<4x4xbf16>
    %cst_40 = arith.constant dense<0.000000e+00> : vector<4x28xf32>
    %112 = tpu.matmul %111, %110, %cst_40 {dimension_numbers = #tpu.dot_dimension_numbers<[1], [0], [0], [1], [0, 0, 1, 1], [], []>} : vector<4x4xbf16>, vector<4x28xbf16>, vector<4x28xf32> -> vector<4x28xf32>
    %113 = arith.addf %109, %112 : vector<4x28xf32>
    %c0_41 = arith.constant 0 : index
    %c0_42 = arith.constant 0 : index
    %114 = vector.load %arg12[%c0_41, %c0_42] : memref<1x28xf32, #tpu.memory_space<vmem>>, vector<1x28xf32>
    %115 = vector.broadcast %114 : vector<1x28xf32> to vector<4x28xf32>
    %116 = arith.addf %113, %115 : vector<4x28xf32>
    %cst_43 = arith.constant 0.000000e+00 : f32
    %117 = vector.broadcast %cst_43 : f32 to vector<4x28xf32>
    %118 = arith.cmpf oge, %116, %117 : vector<4x28xf32>
    %cst_44 = arith.constant 0.00999999977 : f32
    %119 = vector.broadcast %cst_44 : f32 to vector<4x28xf32>
    %120 = arith.mulf %119, %116 : vector<4x28xf32>
    %121 = arith.select %118, %116, %120 : vector<4x28xi1>, vector<4x28xf32>
    %c0_45 = arith.constant 0 : index
    %c0_46 = arith.constant 0 : index
    %122 = vector.load %arg13[%c0_45, %c0_46] : memref<28x16xbf16, #tpu.memory_space<vmem>>, vector<28x16xbf16>
    %123 = arith.truncf %121 : vector<4x28xf32> to vector<4x28xbf16>
    %cst_47 = arith.constant dense<0.000000e+00> : vector<4x16xf32>
    %124 = tpu.matmul %123, %122, %cst_47 {dimension_numbers = #tpu.dot_dimension_numbers<[1], [0], [0], [1], [0, 0, 1, 1], [], []>} : vector<4x28xbf16>, vector<28x16xbf16>, vector<4x16xf32> -> vector<4x16xf32>
    %c0_48 = arith.constant 0 : index
    %c0_49 = arith.constant 0 : index
    %125 = vector.load %arg14[%c0_48, %c0_49] : memref<1x16xf32, #tpu.memory_space<vmem>>, vector<1x16xf32>
    %126 = vector.broadcast %125 : vector<1x16xf32> to vector<4x16xf32>
    %127 = arith.addf %124, %126 : vector<4x16xf32>
    %cst_50 = arith.constant 0.000000e+00 : f32
    %128 = vector.broadcast %cst_50 : f32 to vector<4x16xf32>
    %129 = arith.cmpf oge, %127, %128 : vector<4x16xf32>
    %cst_51 = arith.constant 0.00999999977 : f32
    %130 = vector.broadcast %cst_51 : f32 to vector<4x16xf32>
    %131 = arith.mulf %130, %127 : vector<4x16xf32>
    %132 = arith.select %129, %127, %131 : vector<4x16xi1>, vector<4x16xf32>
    %133 = vector.extract_strided_slice %132 {offsets = [0, 0], sizes = [2, 16], strides = [1, 1]} : vector<4x16xf32> to vector<2x16xf32>
    %134 = vector.extract_strided_slice %132 {offsets = [2, 0], sizes = [2, 16], strides = [1, 1]} : vector<4x16xf32> to vector<2x16xf32>
    %c0_52 = arith.constant 0 : index
    %c0_53 = arith.constant 0 : index
    %135 = vector.load %arg15[%c0_52, %c0_53] : memref<64x32xbf16, #tpu.memory_space<vmem>>, vector<32x32xbf16>
    %136 = arith.truncf %102 : vector<2x32xf32> to vector<2x32xbf16>
    %cst_54 = arith.constant dense<0.000000e+00> : vector<2x32xf32>
    %137 = tpu.matmul %136, %135, %cst_54 {dimension_numbers = #tpu.dot_dimension_numbers<[1], [0], [0], [1], [0, 0, 1, 1], [], []>} : vector<2x32xbf16>, vector<32x32xbf16>, vector<2x32xf32> -> vector<2x32xf32>
    %c32_55 = arith.constant 32 : index
    %c0_56 = arith.constant 0 : index
    %138 = vector.load %arg15[%c32_55, %c0_56] : memref<64x32xbf16, #tpu.memory_space<vmem>>, vector<16x32xbf16>
    %139 = arith.truncf %133 : vector<2x16xf32> to vector<2x16xbf16>
    %cst_57 = arith.constant dense<0.000000e+00> : vector<2x32xf32>
    %140 = tpu.matmul %139, %138, %cst_57 {dimension_numbers = #tpu.dot_dimension_numbers<[1], [0], [0], [1], [0, 0, 1, 1], [], []>} : vector<2x16xbf16>, vector<16x32xbf16>, vector<2x32xf32> -> vector<2x32xf32>
    %141 = arith.addf %137, %140 : vector<2x32xf32>
    %c48 = arith.constant 48 : index
    %c0_58 = arith.constant 0 : index
    %142 = vector.load %arg15[%c48, %c0_58] : memref<64x32xbf16, #tpu.memory_space<vmem>>, vector<16x32xbf16>
    %143 = arith.truncf %134 : vector<2x16xf32> to vector<2x16xbf16>
    %cst_59 = arith.constant dense<0.000000e+00> : vector<2x32xf32>
    %144 = tpu.matmul %143, %142, %cst_59 {dimension_numbers = #tpu.dot_dimension_numbers<[1], [0], [0], [1], [0, 0, 1, 1], [], []>} : vector<2x16xbf16>, vector<16x32xbf16>, vector<2x32xf32> -> vector<2x32xf32>
    %145 = arith.addf %141, %144 : vector<2x32xf32>
    %c0_60 = arith.constant 0 : index
    %c0_61 = arith.constant 0 : index
    %146 = vector.load %arg16[%c0_60, %c0_61] : memref<1x32xf32, #tpu.memory_space<vmem>>, vector<1x32xf32>
    %147 = vector.broadcast %146 : vector<1x32xf32> to vector<2x32xf32>
    %148 = arith.addf %145, %147 : vector<2x32xf32>
    %cst_62 = arith.constant 0.000000e+00 : f32
    %149 = vector.broadcast %cst_62 : f32 to vector<2x32xf32>
    %150 = arith.cmpf oge, %148, %149 : vector<2x32xf32>
    %cst_63 = arith.constant 0.00999999977 : f32
    %151 = vector.broadcast %cst_63 : f32 to vector<2x32xf32>
    %152 = arith.mulf %151, %148 : vector<2x32xf32>
    %153 = arith.select %150, %148, %152 : vector<2x32xi1>, vector<2x32xf32>
    %c0_64 = arith.constant 0 : index
    %c0_65 = arith.constant 0 : index
    %154 = vector.load %arg17[%c0_64, %c0_65] : memref<32x16xbf16, #tpu.memory_space<vmem>>, vector<32x16xbf16>
    %155 = arith.truncf %153 : vector<2x32xf32> to vector<2x32xbf16>
    %cst_66 = arith.constant dense<0.000000e+00> : vector<2x16xf32>
    %156 = tpu.matmul %155, %154, %cst_66 {dimension_numbers = #tpu.dot_dimension_numbers<[1], [0], [0], [1], [0, 0, 1, 1], [], []>} : vector<2x32xbf16>, vector<32x16xbf16>, vector<2x16xf32> -> vector<2x16xf32>
    %c0_67 = arith.constant 0 : index
    %c0_68 = arith.constant 0 : index
    %157 = vector.load %arg18[%c0_67, %c0_68] : memref<1x16xf32, #tpu.memory_space<vmem>>, vector<1x16xf32>
    %158 = vector.broadcast %157 : vector<1x16xf32> to vector<2x16xf32>
    %159 = arith.addf %156, %158 : vector<2x16xf32>
    %cst_69 = arith.constant 0.000000e+00 : f32
    %160 = vector.broadcast %cst_69 : f32 to vector<2x16xf32>
    %161 = arith.cmpf oge, %159, %160 : vector<2x16xf32>
    %cst_70 = arith.constant 0.00999999977 : f32
    %162 = vector.broadcast %cst_70 : f32 to vector<2x16xf32>
    %163 = arith.mulf %162, %159 : vector<2x16xf32>
    %164 = arith.select %161, %159, %163 : vector<2x16xi1>, vector<2x16xf32>
    %c0_71 = arith.constant 0 : index
    %c0_72 = arith.constant 0 : index
    %165 = vector.load %arg19[%c0_71, %c0_72] : memref<16x8xbf16, #tpu.memory_space<vmem>>, vector<16x8xbf16>
    %166 = arith.truncf %164 : vector<2x16xf32> to vector<2x16xbf16>
    %cst_73 = arith.constant dense<0.000000e+00> : vector<2x8xf32>
    %167 = tpu.matmul %166, %165, %cst_73 {dimension_numbers = #tpu.dot_dimension_numbers<[1], [0], [0], [1], [0, 0, 1, 1], [], []>} : vector<2x16xbf16>, vector<16x8xbf16>, vector<2x8xf32> -> vector<2x8xf32>
    %c0_74 = arith.constant 0 : index
    %c0_75 = arith.constant 0 : index
    %168 = vector.load %arg20[%c0_74, %c0_75] : memref<1x8xf32, #tpu.memory_space<vmem>>, vector<1x8xf32>
    %169 = vector.broadcast %168 : vector<1x8xf32> to vector<2x8xf32>
    %170 = arith.addf %167, %169 : vector<2x8xf32>
    %cst_76 = arith.constant dense<0xFF800000> : vector<2xf32>
    %171 = vector.multi_reduction <maximumf>, %170, %cst_76 [1] : vector<2x8xf32> to vector<2xf32>
    %172 = vector.shape_cast %171 : vector<2xf32> to vector<2x1xf32>
    %173 = vector.broadcast %172 : vector<2x1xf32> to vector<2x8xf32>
    %174 = arith.subf %170, %173 : vector<2x8xf32>
    %175 = math.exp %174 : vector<2x8xf32>
    %cst_77 = arith.constant dense<0.000000e+00> : vector<2xf32>
    %176 = vector.multi_reduction <add>, %175, %cst_77 [1] : vector<2x8xf32> to vector<2xf32>
    %177 = vector.shape_cast %176 : vector<2xf32> to vector<2x1xf32>
    %178 = tpu.reciprocal %177 {approx = true} : vector<2x1xf32> -> vector<2x1xf32>
    %179 = vector.broadcast %178 : vector<2x1xf32> to vector<2x8xf32>
    %180 = arith.mulf %175, %179 : vector<2x8xf32>
    %c0_78 = arith.constant 0 : index
    %c0_79 = arith.constant 0 : index
    %181 = vector.load %arg21[%c0_78, %c0_79] : memref<2x8xf32, #tpu.memory_space<vmem>>, vector<2x8xf32>
    tpu.vector_store %arg21[%c0_78, %c0_79], %180 {strides = array<i32>} : memref<2x8xf32, #tpu.memory_space<vmem>>, vector<2x8xf32>,
    return
  }
}

</mosaic_0001>

<bundles_post_ra>
// kernel: neural_network_forward.1
= control target key start
LH: loop header
LB: loop body
LE: loop exit
PB: predicated region body
PF: predicated region fallthrough
CT: control target
= control target key end

     0   :  { %s9055_s0 = inlined_call_operand.vmem [shape: f32[2,11,11,4], index: 0, kind: input, shape index: {}]   ;;  %s9056_s1 = inlined_call_operand.vmem [shape: f32[2,4], index: 1, kind: input, shape index: {}]   ;;  %s9057_s2 = inlined_call_operand.vmem [shape: f32[2,4], index: 2, kind: input, shape index: {}]   ;;  %s9058_s3 = inlined_call_operand.vmem [shape: bf16[100,32], index: 3, kind: input, shape index: {}]   ;;  %s9059_s4 = inlined_call_operand.vmem [shape: f32[1,32], index: 4, kind: input, shape index: {}]   ;;  %s9060_s5 = inlined_call_operand.vmem [shape: bf16[288,64], index: 5, kind: input, shape index: {}]   ;;  %s9061_s6 = inlined_call_operand.vmem [shape: f32[1,64], index: 6, kind: input, shape index: {}]   ;;  %s9062_s7 = inlined_call_operand.vmem [shape: bf16[576,64], index: 7, kind: input, shape index: {}]   ;;  %s9063_s8 = inlined_call_operand.vmem [shape: f32[1,64], index: 8, kind: input, shape index: {}]   ;;  %s9064_s9 = inlined_call_operand.vmem [shape: bf16[64,32], index: 9, kind: input, shape index: {}]   ;;  %s9065_s10 = inlined_call_operand.vmem [shape: f32[1,32], index: 10, kind: input, shape index: {}]   ;;  %s9066_s11 = inlined_call_operand.vmem [shape: bf16[36,28], index: 11, kind: input, shape index: {}]   ;;  %s9067_s12 = inlined_call_operand.vmem [shape: f32[1,28], index: 12, kind: input, shape index: {}]   ;;  %s9068_s13 = inlined_call_operand.vmem [shape: bf16[28,16], index: 13, kind: input, shape index: {}]   ;;  %s9069_s14 = inlined_call_operand.vmem [shape: f32[1,16], index: 14, kind: input, shape index: {}]   ;;  %s9070_s15 = inlined_call_operand.vmem [shape: bf16[64,32], index: 15, kind: input, shape index: {}]   ;;  %s9071_s16 = inlined_call_operand.vmem [shape: f32[1,32], index: 16, kind: input, shape index: {}]   ;;  %s9072_s17 = inlined_call_operand.vmem [shape: bf16[32,16], index: 17, kind: input, shape index: {}]   ;;  %s9073_s18 = inlined_call_operand.vmem [shape: f32[1,16], index: 18, kind: input, shape index: {}]   ;;  %s9074_s19 = inlined_call_operand.vmem [shape: bf16[16,8], index: 19, kind: input, shape index: {}]   ;;  %s9075_s20 = inlined_call_operand.vmem [shape: f32[1,8], index: 20, kind: input, shape index: {}]   ;;  %s9076_s21 = inlined_call_operand.hbm [shape: f32[2,8], index: 21, kind: output, shape index: {}]  }
   0x1   :  { %9243 = sst [smem:[#allocation89_spill]] %s9055_s0 }
   0x2   :  { %9244 = sst [smem:[#allocation90_spill]] %s9056_s1 }
   0x3   :  { %9245 = sst [smem:[#allocation91_spill]] %s9057_s2 }
   0x4   :  { %9246 = sst [smem:[#allocation92_spill]] %s9058_s3 }
   0x5   :  { %9247 = sst [smem:[#allocation93_spill]] %s9059_s4 }
   0x6   :  { %9248 = sst [smem:[#allocation94_spill]] %s9060_s5 }
   0x7   :  { %9249 = sst [smem:[#allocation95_spill]] %s9071_s16 }
   0x8   :  { %9250 = sst [smem:[#allocation96_spill]] %s9072_s17 }
   0x9   :  { %9251 = sst [smem:[#allocation97_spill]] %s9073_s18 }
   0xa   :  { %9252 = sst [smem:[#allocation98_spill]] %s9074_s19 }
   0xb   :  { %9253 = sst [smem:[#allocation99_spill]] %s9075_s20 }
   0xc   :  { %9254 = sst [smem:[#allocation100_spill]] %s9076_s21 }
   0xd   :  { %s9255_s26 = sld [smem:[#allocation89_spill]] }
  0x13   :  { %v78_v0 = vld [vmem:[%s9255_s26 + $0x40] sm:$0xff]  ;;  %v79_v1 = vld [vmem:[%s9255_s26 + $0x48] sm:$0x7]  ;;  %v76_v2 = vld [vmem:[%s9255_s26 + $0x30] sm:$0xff] }
  0x14   :  { %v5812_v3 = vpack.c.bf16 %v78_v0, %v78_v0  ;;  %v123_v4 = vpack.c.bf16 %v79_v1, %v79_v1  ;;  %v77_v5 = vld [vmem:[%s9255_s26 + $0x38] sm:$0x7]  ;;  %v5817_v6 = vpack.c.bf16 %v76_v2, %v76_v2  ;;  %v80_v7 = vld [vmem:[%s9255_s26 + $0x50] sm:$0xff] }
  0x15   :  { %v121_v8 = vpack.c.bf16 %v77_v5, %v77_v5  ;;  %v5822_v9 = vpack.c.bf16 %v80_v7, %v80_v7  ;;  %v81_v13 = vld [vmem:[%s9255_s26 + $0x58] sm:$0x7] }
  0x16   :  { %9256 = vst [vmem:[#allocation5_spill] sm:$0xff] %v5812_v3  ;;  %v176_v10 = vunpack.c.l.b16 %v5812_v3  ;;  %v344_v11 = vunpack.c.l.b16 %v123_v4  ;;  %v5826_v12 = vunpack.c.l.b16 %v5817_v6 }
  0x17   :  { %v343_v14 = vunpack.c.l.b16 %v121_v8  ;;  %v177_v15 = vunpack.c.l.b16 %v5822_v9 }
  0x18   :  { %v5832_v16 = vpack.c.b16 %v344_v11, %v176_v10 }
  0x19   :  { %v5835_v17 = vpack.c.b16 %v343_v14, %v5826_v12  ;;  %v5837_v18 = vpack.c.b16 %v177_v15, %v177_v15 }
  0x1a   :  { %26 = vsyncpa [#allocation3], 0  ;;  %v5840_v19 = vrot.slane %v5832_v16, 1  ;;  %v443_v20 = vshrl.u32 %v5832_v16, 16  ;;  %v446_v21 = vshll.u32 %v5832_v16, 16  ;;  %v125_v24 = vpack.c.bf16 %v81_v13, %v81_v13  ;;  %s9153_s1 = smov 8  }
  0x1b   :  { %v5845_v22 = vrot.slane %v5835_v17, 1  ;;  %v9086_v23 = vshrl.u32 %v5837_v18, 16  ;;  %v438_v28 = vshll.u32 %v5835_v17, 16  ;;  %v5851_v29 = vpack.c.b16 %v176_v10, %v176_v10  ;;  %s9155_s24 = smov 12   ;;  %s9193_s2 = smov 4   ;;  %v82_v54 = vld [vmem:[%s9255_s26 + $0x60] sm:$0xff] }
  0x1c   :  { %390 = vrot.lane.b32.xlu0 %v5840_v19, %s9153_s1  ;;  %v445_v25 = vrot.slane %v443_v20, 1  ;;  %v448_v26 = vrot.slane %v446_v21, 2  ;;  %v1455_v27 = vrot.slane %v446_v21, 1  ;;  %v9087_v30 = vshll.u32 %v5837_v18, 16  ;;  %s9112_s25 = smov 16   ;;  %s9180_s27 = smov 20  }
  0x1d   :  { %388 = vrot.lane.b32.xlu2 %v5845_v22, %s9153_s1  ;;  %v1559_v31 = vrot.slane %v9086_v23, 7  ;;  %v435_v34 = vshrl.u32 %v5835_v17, 16  ;;  %v1453_v35 = vrot.slane %v438_v28, 1  ;;  %v345_v36 = vunpack.c.l.b16 %v125_v24  ;;  %s9121_s3 = smov 24   ;;  %s9119_s28 = smov 28   ;;  %v84_v5 = vld [vmem:[%s9255_s26 + $0x70] sm:$0xff] }
  0x1e   :  { %v5858_v32 = vor.u32 %v448_v26, %v445_v25  ;;  %v1456_v33 = vor.u32 %v1455_v27, %v443_v20  ;;  %v9088_v38 = vshrl.u32 %v5851_v29, 16  ;;  %v440_v41 = vrot.slane %v438_v28, 2  ;;  %v83_v57 = vld [vmem:[%s9255_s26 + $0x68] sm:$0x7]  ;;  %s9132_s5 = smov 32   ;;  %s9130_s4 = smov 36  }
  0x1f   :  { %v1560_v37 = vor.u32 %v1559_v31, %v9087_v30  ;;  %v1454_v39 = vor.u32 %v1453_v35, %v435_v34  ;;  %v437_v40 = vrot.slane %v435_v34, 1  ;;  %v5867_v42 = vpack.c.b16 %v345_v36, %v177_v15  ;;  %v85_v7 = vld [vmem:[%s9255_s26 + $0x78] sm:$0x7]  ;;  %v86_v34 = vld [vmem:[%s9255_s26 + $0x80] sm:$0xff]  ;;  %s9178_s30 = smov 40   ;;  %s9190_s22 = smov 48  }
  0x20   :  { %530 = vrot.lane.b32.xlu1 %v5858_v32, %s9155_s24  ;;  %v9089_v43 = vshll.u32 %v5851_v29, 16  ;;  %v1557_v44 = vrot.slane %v9088_v38, 7  ;;  %v5896_v55 = vpack.c.bf16 %v82_v54, %v82_v54  ;;  %v127_v59 = vpack.c.bf16 %v83_v57, %v83_v57  ;;  %s9163_s23 = smov 52   ;;  %s9335_s29 = smov 28  }
  0x21   :  { %v5874_v45 = vor.u32 %v440_v41, %v437_v40  ;;  %v454_v46 = vshll.u32 %v5867_v42, 16  ;;  %v451_v48 = vshrl.u32 %v5867_v42, 16  ;;  %v5886_v51 = vrot.slane %v5867_v42, 1  ;;  %s9348_s0 = smov 52   ;;  %s9432_s19 = smov 60  }
  0x22   :  { %v1558_v47 = vor.u32 %v1557_v44, %v9089_v43  ;;  %v178_v58 = vunpack.c.l.b16 %v5896_v55  ;;  %v346_v61 = vunpack.c.l.b16 %v127_v59  ;;  %v5934_v11 = vpack.c.bf16 %v84_v5, %v84_v5  ;;  %v89_v5 = vld [vmem:[%s9255_s26 + $0x98] sm:$0x7]  ;;  %s9447_s16 = smov 4  }
  0x23   :  { %v1457_v49 = vrot.slane %v454_v46, 1  ;;  %v453_v52 = vrot.slane %v451_v48, 1  ;;  %v456_v53 = vrot.slane %v454_v46, 2  ;;  %v129_v15 = vpack.c.bf16 %v85_v7, %v85_v7 }
  0x24   :  { %1493 = vrot.lane.b32.xlu0 %v1456_v33, %s9193_s2  ;;  %v5909_v60 = vpack.c.b16 %v178_v58, %v178_v58  ;;  %v5913_v63 = vpack.c.b16 %v346_v61, %v178_v58  ;;  %9259 = vst [vmem:[#allocation8_spill] sm:$0xff] %v5934_v11  ;;  %v594_v21 = vunpack.c.l.b16 %v5934_v11  ;;  %v5966_v40 = vpack.c.bf16 %v86_v34, %v86_v34  ;;  %v98_v11 = vld [vmem:[%s9255_s26 + $0xe0] sm:$0xff] }
  0x25   :  { %1607 = vrot.lane.b32.xlu2 %v1560_v37, %s9112_s25  ;;  %v1458_v50 = vor.u32 %v1457_v49, %v451_v48  ;;  %v5898_v56 = vor.u32 %v456_v53, %v453_v52  ;;  %v670_v25 = vunpack.c.l.b16 %v129_v15  ;;  %v87_v48 = vld [vmem:[%s9255_s26 + $0x88] sm:$0x7]  ;;  %vm998_vm0 = vcmask 31744  }
  0x26   :  { %v9084_v62 = vshrl.u32 %v5909_v60, 16  ;;  %9258 = vst [vmem:[#allocation7_spill] sm:$0xff] %v5913_v63  ;;  %v9085_v0 = vshll.u32 %v5909_v60, 16  ;;  %v462_v2 = vshll.u32 %v5913_v63, 16  ;;  %v459_v4 = vshrl.u32 %v5913_v63, 16 }
  0x27   :  { %9257 = vst [vmem:[#allocation6_spill] sm:$0xff] %v5898_v56  ;;  %v5944_v26 = vrot.slane %v5913_v63, 1  ;;  %v5946_v27 = vpack.c.b16 %v594_v21, %v594_v21  ;;  %v5950_v28 = vpack.c.b16 %v670_v25, %v594_v21  ;;  %v780_v46 = vunpack.c.l.b16 %v5966_v40 }
  0x28   :  { %1491 = vrot.lane.b32.xlu1 %v1454_v39, %s9193_s2  ;;  %v1561_v1 = vrot.slane %v9084_v62, 7  ;;  %v1459_v10 = vrot.slane %v462_v2, 1  ;;  %v461_v13 = vrot.slane %v459_v4, 1  ;;  %v464_v14 = vrot.slane %v462_v2, 2  ;;  %9264 = vst [vmem:[#allocation13_spill] sm:$0xff] %v5966_v40 }
  0x29   :  { %9261 = vst [vmem:[#allocation10_spill] sm:$0xff] %v5944_v26  ;;  %v9082_v31 = vshrl.u32 %v5946_v27, 16  ;;  %v9083_v35 = vshll.u32 %v5946_v27, 16  ;;  %v705_v37 = vshrl.u32 %v5950_v28, 16  ;;  %v5983_v49 = vrot.slane %v5950_v28, 1 }
  0x2a   :  { %v1562_v8 = vor.u32 %v1561_v1, %v9085_v0  ;;  %v1460_v20 = vor.u32 %v1459_v10, %v459_v4  ;;  %v5940_v24 = vor.u32 %v464_v14, %v461_v13  ;;  %9262 = vst [vmem:[#allocation11_spill] sm:$0xff] %v5946_v27  ;;  %v88_v4 = vld [vmem:[%s9255_s26 + $0x90] sm:$0xff]  ;;  %v133_v10 = vpack.c.bf16 %v89_v5, %v89_v5 }
  0x2b   :  { %9263 = vst [vmem:[#allocation12_spill] sm:$0xff] %v5950_v28  ;;  %v1563_v36 = vrot.slane %v9082_v31, 7  ;;  %v707_v53 = vrot.slane %v705_v37, 1  ;;  %vm1041_vm1 = vcmask 64512   ;;  %vm1070_vm2 = vcmask 97280  }
  0x2c   :  { %528 = vrot.lane.b32.xlu0 %v5874_v45, %s9155_s24  ;;  %9260 = vst [vmem:[#allocation9_spill] sm:$0xff] %v5940_v24  ;;  %v1449_v25 = vunpack.c.l.b16 %v133_v10  ;;  %vm1099_vm3 = vcmask 130048   ;;  %vm1128_vm4 = vcmask 162816   ;;  %vm9192_vm5 = vcmask 195584  }
  0x2d   :  { %1605 = vrot.lane.b32.xlu2 %v1558_v47, %s9112_s25  ;;  %v1564_v41 = vor.u32 %v1563_v36, %v9083_v35  ;;  %v5975_v47 = vpack.c.b16 %v780_v46, %v780_v46  ;;  %9266 = vst [vmem:[#allocation15_spill] sm:$0xff] %v5983_v49  ;;  %vm1186_vm6 = vcmask 228352   ;;  %vm1215_vm7 = vcmask 261120  }
  0x2e   :  { %vm1244_vm8 = vcmask 293888   ;;  %vm1273_vm9 = vcmask 326656   ;;  %vm1302_vm10 = vcmask 359424   ;;  %vm1331_vm11 = vcmask 392192  }
  0x2f   :  { %9265 = vst [vmem:[#allocation14_spill] sm:$0xff] %v5975_v47  ;;  %v9080_v52 = vshrl.u32 %v5975_v47, 16  ;;  %v9081_v58 = vshll.u32 %v5975_v47, 16  ;;  %vm1360_vm12 = vcmask 424960   ;;  %vm1389_vm13 = vcmask 457728  }
  0x30   :  { %606 = vrot.lane.b32.xlu1 %v5837_v18, %s9180_s27  ;;  %vm1418_vm14 = vcmask 490496   ;;  %vm9202_vm15 = vcmask 523264  }
  0x31   :  { %v1565_v59 = vrot.slane %v9080_v52, 7 }
  0x33   :  { %v1566_v2 = vor.u32 %v1565_v59, %v9081_v58 }
  0x34   :  { %1667 = vrot.lane.b32.xlu0 %v1458_v50, %s9121_s3 }
  0x35   :  { %684 = vrot.lane.b32.xlu2 %v5886_v51, %s9119_s28 }
  0x38   :  { %604 = vrot.lane.b32.xlu1 %v5851_v29, %s9180_s27 }
  0x3c   :  { %1495 = vrot.lane.b32.xlu0 %v1458_v50, %s9193_s2  ;;  %v131_v50 = vpack.c.bf16 %v87_v48, %v87_v48 }
  0x3d   :  { %728 = vrot.lane.b32.xlu2 %v5898_v56, %s9132_s5 }
  0x3e   :  { %v856_v57 = vunpack.c.l.b16 %v131_v50 }
  0x40   :  { %392 = vrot.lane.b32.xlu1 %v5886_v51, %s9153_s1  ;;  %v5996_v1 = vpack.c.b16 %v856_v57, %v780_v46  ;;  %v72_v46 = vld [vmem:[%s9255_s26 + $0x10] sm:$0xff] }
  0x41   :  { %v6035_v50 = vpack.c.bf16 %v72_v46, %v72_v46  ;;  %v70_v46 = vld [vmem:[%s9255_s26] sm:$0xff] }
  0x42   :  { %9268 = vst [vmem:[#allocation17_spill] sm:$0xff] %v5996_v1  ;;  %v894_v7 = vshll.u32 %v5996_v1, 16  ;;  %v891_v14 = vshrl.u32 %v5996_v1, 16 }
  0x44   :  { %1665 = vrot.lane.b32.xlu0 %v1456_v33, %s9121_s3  ;;  %v708_v33 = vshll.u32 %v5950_v28, 16  ;;  %v1463_v15 = vrot.slane %v894_v7, 1  ;;  %v893_v34 = vrot.slane %v891_v14, 1  ;;  %v896_v36 = vrot.slane %v894_v7, 2 }
  0x45   :  { %682 = vrot.lane.b32.xlu2 %v5840_v19, %s9119_s28 }
  0x46   :  { %v1461_v39 = vrot.slane %v708_v33, 1  ;;  %v710_v54 = vrot.slane %v708_v33, 2  ;;  %v1464_v33 = vor.u32 %v1463_v15, %v891_v14  ;;  %v90_v15 = vld [vmem:[%s9255_s26 + $0xa0] sm:$0xff] }
  0x48   :  { %532 = vrot.lane.b32.xlu1 %v5898_v56, %s9155_s24  ;;  %v1462_v44 = vor.u32 %v1461_v39, %v705_v37  ;;  %v5994_v61 = vor.u32 %v710_v54, %v707_v53 }
  0x4a   :  { %9267 = vst [vmem:[#allocation16_spill] sm:$0xff] %v5994_v61 }
  0x4c   :  { %726 = vrot.lane.b32.xlu0 %v5858_v32, %s9132_s5 }
  0x4d   :  { %608 = vrot.lane.b32.xlu2 %v5909_v60, %s9180_s27 }
  0x50   :  { %1609 = vrot.lane.b32.xlu1 %v1562_v8, %s9112_s25  ;;  %v6010_v8 = vpack.c.bf16 %v88_v4, %v88_v4 }
  0x52   :  { %9269 = vst [vmem:[#allocation18_spill] sm:$0xff] %v6010_v8  ;;  %v966_v21 = vunpack.c.l.b16 %v6010_v8 }
  0x54   :  { %1669 = vrot.lane.b32.xlu0 %v1460_v20, %s9121_s3  ;;  %v1451_v37 = vpack.c.b16 %v1449_v25, %v966_v21 }
  0x55   :  { %730 = vrot.lane.b32.xlu2 %v5940_v24, %s9132_s5 }
  0x56   :  { %v1468_v48 = vshll.u32 %v1451_v37, 16  ;;  %v1466_v54 = vshrl.u32 %v1451_v37, 16 }
  0x58   :  { %686 = vrot.lane.b32.xlu1 %v5944_v26, %s9119_s28  ;;  %v1470_v57 = vrot.slane %v1468_v48, 1 }
  0x5a   :  { %v1471_v7 = vor.u32 %v1470_v57, %v1466_v54 }
  0x5c   :  { %1497 = vrot.lane.b32.xlu0 %v1460_v20, %s9193_s2  ;;  %v6018_v20 = vrot.slane %v5996_v1, 1 }
  0x5d   :  { %534 = vrot.lane.b32.xlu2 %v5940_v24, %s9155_s24 }
  0x5e   :  { %9271 = vst [vmem:[#allocation20_spill] sm:$0xff] %v6018_v20 }
  0x60   :  { %394 = vrot.lane.b32.xlu1 %v5944_v26, %s9153_s1 }
  0x64   :  { %1611 = vrot.lane.b32.xlu0 %v1564_v41, %s9112_s25  ;;  %v6028_v41 = vor.u32 %v896_v36, %v893_v34  ;;  %v134_v34 = vpack.c.bf16 %v90_v15, %v90_v15  ;;  %v73_v36 = vld [vmem:[%s9255_s26 + $0x18] sm:$0x7]  ;;  %v1519_v15 = vrot.slane %v1451_v37, 1 }
  0x65   :  { %1499 = vrot.lane.b32.xlu2 %v1462_v44, %s9193_s2  ;;  %v117_v52 = vpack.c.bf16 %v73_v36, %v73_v36 }
  0x66   :  { %9272 = vst [vmem:[#allocation21_spill] sm:$0xff] %v6028_v41 }
  0x67   :  { %v341_v0 = vunpack.c.l.b16 %v117_v52 }
  0x68   :  { %610 = vrot.lane.b32.xlu1 %v5946_v27, %s9180_s27 }
  0x6c   :  { %1521 = vrot.lane.b32.xlu0 %v5983_v49, %s9153_s1 }
  0x6d   :  { %688 = vrot.lane.b32.xlu2 %v5983_v49, %s9119_s28 }
  0x70   :  { %1671 = vrot.lane.b32.xlu1 %v1462_v44, %s9121_s3  ;;  %v6030_v44 = vpack.c.b16 %v966_v21, %v966_v21 }
  0x72   :  { %9273 = vst [vmem:[#allocation22_spill] sm:$0xff] %v6030_v44  ;;  %v1568_v53 = vshrl.u32 %v6030_v44, 16  ;;  %v1571_v5 = vshll.u32 %v6030_v44, 16 }
  0x74   :  { %1539 = vrot.lane.b32.xlu0 %v5994_v61, %s9155_s24  ;;  %v1570_v4 = vrot.slane %v1568_v53, 7 }
  0x75   :  { %1613 = vrot.lane.b32.xlu2 %v1566_v2, %s9112_s25  ;;  %v173_v2 = vunpack.c.l.b16 %v6035_v50 }
  0x76   :  { %v1573_v14 = vor.u32 %v1571_v5, %v1570_v4  ;;  %v1553_v5 = vunpack.c.l.b16 %v134_v34  ;;  %v1534_v34 = vrot.slane %v1468_v48, 2 }
  0x77   :  { %v6012_v13 = vpop.permute.xlu2 %388  ;;  %v6047_v10 = vpack.c.b16 %v173_v2, %v173_v2 }
  0x78   :  { %9270 = vst [vmem:[#allocation19_spill] sm:$0xff] %v6012_v13  ;;  %732 = vrot.lane.b32.xlu1 %v5994_v61, %s9132_s5  ;;  %v1555_v62 = vpack.c.b16 %v1553_v5, %v1553_v5 }
  0x79   :  { %v208_v57 = vshrl.u32 %v6047_v10, 16 }
  0x7a   :  { %v1575_v36 = vshrl.u32 %v1555_v62, 16  ;;  %v1578_v38 = vshll.u32 %v1555_v62, 16 }
  0x7c   :  { %1633 = vrot.lane.b32.xlu0 %v5975_v47, %s9180_s27  ;;  %v1577_v30 = vrot.slane %v1575_v36, 7 }
  0x7d   :  { %1695 = vrot.lane.b32.xlu2 %v6018_v20, %s9119_s28 }
  0x7f   :  { %v6025_v39 = vpop.permute.xlu2 %1607 }
  0x80   :  { %1673 = vrot.lane.b32.xlu1 %v1464_v33, %s9121_s3 }
  0x84   :  { %1713 = vrot.lane.b32.xlu0 %v6028_v41, %s9132_s5 }
  0x85   :  { %1523 = vrot.lane.b32.xlu2 %v6018_v20, %s9153_s1 }
  0x87   :  { %v6042_v59 = vpop.permute.xlu2 %1605 }
  0x88   :  { %1501 = vrot.lane.b32.xlu1 %v1464_v33, %s9193_s2  ;;  %v210_v33 = vshll.u32 %v6047_v10, 16 }
  0x8a   :  { %v212_v4 = vrot.slane %v210_v33, 1  ;;  %v1533_v33 = vrot.slane %v1466_v54, 1 }
  0x8c   :  { %1541 = vrot.lane.b32.xlu0 %v6028_v41, %s9155_s24  ;;  %v6079_v35 = vor.u32 %v212_v4, %v208_v57  ;;  %v6090_v57 = vpack.c.b16 %v341_v0, %v173_v2  ;;  %v71_v0 = vld [vmem:[%s9255_s26 + $0x8] sm:$0x7] }
  0x8d   :  { %1503 = vrot.lane.b32.xlu2 %v1471_v7, %s9193_s2  ;;  %v115_v1 = vpack.c.bf16 %v71_v0, %v71_v0 }
  0x8e   :  { %v6055_v21 = vpop.permute.xlu0 %390  ;;  %v9096_v43 = vrot.slane %v6090_v57, 1  ;;  %v422_v36 = vshll.u32 %v6090_v57, 16 }
  0x8f   :  { %9274 = vst [vmem:[#allocation23_spill] sm:$0xff] %v6055_v21  ;;  %v6057_v25 = vpop.permute.xlu2 %684  ;;  %v340_v61 = vunpack.c.l.b16 %v115_v1  ;;  %v74_v1 = vld [vmem:[%s9255_s26 + $0x20] sm:$0xff] }
  0x90   :  { %9275 = vst [vmem:[#allocation24_spill] sm:$0xff] %v6057_v25  ;;  %1615 = vrot.lane.b32.xlu1 %v1573_v14, %s9112_s25  ;;  %v6072_v14 = vpack.c.bf16 %v70_v46, %v70_v46  ;;  %v1535_v46 = vor.u32 %v1534_v34, %v1533_v33 }
  0x92   :  { %v6067_v53 = vpop.permute.xlu1 %530  ;;  %9277 = vst [vmem:[#allocation26_spill] sm:$0xff] %v6072_v14  ;;  %v172_v23 = vunpack.c.l.b16 %v6072_v14 }
  0x93   :  { %9276 = vst [vmem:[#allocation25_spill] sm:$0xff] %v6067_v53 }
  0x94   :  { %1635 = vrot.lane.b32.xlu0 %v6030_v44, %s9180_s27  ;;  %v186_v4 = vpack.c.b16 %v172_v23, %v172_v23  ;;  %v354_v0 = vpack.c.b16 %v340_v61, %v172_v23  ;;  %v9104_v61 = vrot.slane %v6090_v57, 2 }
  0x95   :  { %1675 = vrot.lane.b32.xlu2 %v1471_v7, %s9121_s3  ;;  %v91_v7 = vld [vmem:[%s9255_s26 + $0xa8] sm:$0x7] }
  0x96   :  { %v6075_v58 = vpop.permute.xlu0 %1493  ;;  %v135_v48 = vpack.c.bf16 %v91_v7, %v91_v7  ;;  %v203_v44 = vshll.u32 %v186_v4, 16  ;;  %v201_v33 = vshrl.u32 %v186_v4, 16  ;;  %v419_v7 = vshrl.u32 %v6090_v57, 16 }
  0x97   :  { %v6077_v31 = vpop.permute.xlu2 %728  ;;  %v424_v4 = vrot.slane %v422_v36, 2 }
  0x98   :  { %9278 = vst [vmem:[#allocation27_spill] sm:$0xff] %v6077_v31  ;;  %1525 = vrot.lane.b32.xlu1 %v1519_v15, %s9153_s1  ;;  %v1647_v41 = vunpack.c.l.b16 %v135_v48  ;;  %v205_v34 = vrot.slane %v203_v44, 1 }
  0x9a   :  { %v6083_v37 = vpop.permute.xlu1 %1491  ;;  %v1649_v48 = vpack.c.b16 %v1647_v41, %v1553_v5 }
  0x9c   :  { %300 = vrot.lane.b32.xlu0 %v6079_v35, %s9193_s2  ;;  %v1652_v41 = vshrl.u32 %v1649_v48, 16 }
  0x9d   :  { %1697 = vrot.lane.b32.xlu2 %v1519_v15, %s9119_s28  ;;  %v1580_v15 = vor.u32 %v1578_v38, %v1577_v30  ;;  %v206_v30 = vor.u32 %v205_v34, %v201_v33  ;;  %v421_v38 = vrot.slane %v419_v7, 1  ;;  %v411_v33 = vshrl.u32 %v354_v0, 16 }
  0x9e   :  { %v6093_v52 = vpop.permute.xlu0 %528  ;;  %v414_v34 = vshll.u32 %v354_v0, 16 }
  0x9f   :  { %9279 = vst [vmem:[#allocation28_spill] sm:$0xff] %v6093_v52  ;;  %v6095_v54 = vpop.permute.xlu2 %682  ;;  %v6118_v47 = vor.u32 %v424_v4, %v421_v38  ;;  %v413_v36 = vrot.slane %v411_v33, 1 }
  0xa0   :  { %9280 = vst [vmem:[#allocation29_spill] sm:$0xff] %v6095_v54  ;;  %1543 = vrot.lane.b32.xlu1 %v1535_v46, %s9155_s24 }
  0xa2   :  { %v6102_v2 = vpop.permute.xlu1 %606 }
  0xa3   :  { %9281 = vst [vmem:[#allocation30_spill] sm:$0xff] %v6102_v2 }
  0xa4   :  { %384 = vrot.lane.b32.xlu0 %v9096_v43, %s9153_s1  ;;  %v1654_v43 = vshll.u32 %v1649_v48, 16 }
  0xa5   :  { %1715 = vrot.lane.b32.xlu2 %v1535_v46, %s9132_s5 }
  0xa6   :  { %v6110_v20 = vpop.permute.xlu0 %1667  ;;  %v1656_v5 = vrot.slane %v1654_v43, 1  ;;  %v1708_v14 = vrot.slane %v1654_v43, 2 }
  0xa7   :  { %v6112_v8 = vpop.permute.xlu2 %608 }
  0xa8   :  { %1617 = vrot.lane.b32.xlu1 %v1580_v15, %s9112_s25  ;;  %v368_v15 = vrot.slane %v354_v0, 1  ;;  %v1657_v7 = vor.u32 %v1656_v5, %v1652_v41 }
  0xaa   :  { %v6115_v44 = vpop.permute.xlu1 %604 }
  0xab   :  { %9282 = vst [vmem:[#allocation31_spill] sm:$0xff] %v6115_v44 }
  0xac   :  { %298 = vrot.lane.b32.xlu0 %v206_v30, %s9193_s2  ;;  %v416_v30 = vrot.slane %v414_v34, 2 }
  0xad   :  { %1637 = vrot.lane.b32.xlu2 %v1555_v62, %s9180_s27  ;;  %v6132_v62 = vpack.c.bf16 %v74_v1, %v74_v1  ;;  %v1693_v1 = vrot.slane %v1649_v48, 1 }
  0xae   :  { %v6121_v46 = vpop.permute.xlu0 %1495  ;;  %v417_v5 = vor.u32 %v416_v30, %v413_v36  ;;  %v550_v36 = vrot.slane %v354_v0, 2 }
  0xaf   :  { %v6123_v49 = vpop.permute.xlu2 %730  ;;  %9284 = vst [vmem:[#allocation33_spill] sm:$0xff] %v6132_v62  ;;  %v174_v4 = vunpack.c.l.b16 %v6132_v62  ;;  %v1707_v62 = vrot.slane %v1652_v41, 1 }
  0xb0   :  { %9283 = vst [vmem:[#allocation32_spill] sm:$0xff] %v6123_v49  ;;  %524 = vrot.lane.b32.xlu1 %v6118_v47, %s9155_s24 }
  0xb1   :  { %v6150_v33 = vpack.c.b16 %v174_v4, %v174_v4 }
  0xb2   :  { %v6130_v23 = vpop.permute.xlu1 %392 }
  0xb3   :  { %v217_v34 = vshll.u32 %v6150_v33, 16  ;;  %v215_v30 = vshrl.u32 %v6150_v33, 16 }
  0xb4   :  { %382 = vrot.lane.b32.xlu0 %v368_v15, %s9153_s1  ;;  %v75_v15 = vld [vmem:[%s9255_s26 + $0x28] sm:$0x7] }
  0xb5   :  { %1677 = vrot.lane.b32.xlu2 %v1657_v7, %s9121_s3  ;;  %v119_v7 = vpack.c.bf16 %v75_v15, %v75_v15  ;;  %v219_v27 = vrot.slane %v217_v34, 1 }
  0xb6   :  { %v6137_v38 = vpop.permute.xlu0 %1665 }
  0xb7   :  { %v6140_v28 = vpop.permute.xlu2 %534  ;;  %v342_v63 = vunpack.c.l.b16 %v119_v7 }
  0xb8   :  { %566 = vrot.lane.b32.xlu1 %v9104_v61, %s9112_s25 }
  0xb9   :  { %v356_v43 = vpack.c.b16 %v342_v63, %v174_v4 }
  0xba   :  { %v6145_v40 = vpop.permute.xlu1 %532 }
  0xbb   :  { %v6174_v0 = vrot.slane %v356_v43, 1  ;;  %v427_v34 = vshrl.u32 %v356_v43, 16 }
  0xbc   :  { %522 = vrot.lane.b32.xlu0 %v417_v5, %s9155_s24  ;;  %v1709_v5 = vor.u32 %v1708_v14, %v1707_v62  ;;  %v430_v14 = vshll.u32 %v356_v43, 16 }
  0xbd   :  { %1699 = vrot.lane.b32.xlu2 %v1693_v1, %s9119_s28  ;;  %v6165_v1 = vor.u32 %v219_v27, %v215_v30  ;;  %v429_v63 = vrot.slane %v427_v34, 1 }
  0xbe   :  { %v6155_v61 = vpop.permute.xlu0 %726  ;;  %v432_v27 = vrot.slane %v430_v14, 2  ;;  %v6202_v14 = vrot.slane %v356_v43, 2 }
  0xbf   :  { %9285 = vst [vmem:[#allocation34_spill] sm:$0xff] %v6155_v61  ;;  %v6157_v48 = vpop.permute.xlu2 %1499 }
  0xc0   :  { %9286 = vst [vmem:[#allocation35_spill] sm:$0xff] %v6157_v48  ;;  %600 = vrot.lane.b32.xlu1 %v6150_v33, %s9180_s27  ;;  %v99_v48 = vld [vmem:[%s9255_s26 + $0xe8] sm:$0x7] }
  0xc2   :  { %v6162_v24 = vpop.permute.xlu1 %1609 }
  0xc4   :  { %564 = vrot.lane.b32.xlu0 %v550_v36, %s9112_s25  ;;  %v6188_v36 = vor.u32 %v432_v27, %v429_v63 }
  0xc5   :  { %1717 = vrot.lane.b32.xlu2 %v1709_v5, %s9132_s5 }
  0xc6   :  { %v6168_v41 = vpop.permute.xlu0 %1669 }
  0xc7   :  { %v6170_v15 = vpop.permute.xlu2 %688 }
  0xc8   :  { %9287 = vst [vmem:[#allocation36_spill] sm:$0xff] %v6170_v15  ;;  %642 = vrot.lane.b32.xlu1 %v6165_v1, %s9121_s3 }
  0xca   :  { %v6176_v62 = vpop.permute.xlu1 %686 }
  0xcb   :  { %9288 = vst [vmem:[#allocation37_spill] sm:$0xff] %v6176_v62 }
  0xcc   :  { %302 = vrot.lane.b32.xlu0 %v6165_v1, %s9193_s2 }
  0xcd   :  { %678 = vrot.lane.b32.xlu2 %v6174_v0, %s9119_s28 }
  0xce   :  { %v6182_v4 = vpop.permute.xlu0 %1497 }
  0xcf   :  { %v6184_v7 = vpop.permute.xlu2 %1613 }
  0xd0   :  { %9289 = vst [vmem:[#allocation38_spill] sm:$0xff] %v6184_v7  ;;  %598 = vrot.lane.b32.xlu1 %v6047_v10, %s9180_s27 }
  0xd2   :  { %v6190_v30 = vpop.permute.xlu1 %394 }
  0xd4   :  { %386 = vrot.lane.b32.xlu0 %v6174_v0, %s9153_s1 }
  0xd5   :  { %722 = vrot.lane.b32.xlu2 %v6188_v36, %s9132_s5 }
  0xd6   :  { %v6196_v5 = vpop.permute.xlu0 %1611 }
  0xd7   :  { %v6198_v34 = vpop.permute.xlu2 %1695 }
  0xd8   :  { %9290 = vst [vmem:[#allocation39_spill] sm:$0xff] %v6198_v34  ;;  %640 = vrot.lane.b32.xlu1 %v6079_v35, %s9121_s3  ;;  %v6216_v34 = vpack.c.b16 %v5826_v12, %v5826_v12  ;;  %v9293_v35 = vrot.slane %v6090_v57, 1 }
  0xda   :  { %v6204_v10 = vpop.permute.xlu1 %610  ;;  %v224_v43 = vshll.u32 %v6216_v34, 16 }
  0xdc   :  { %526 = vrot.lane.b32.xlu0 %v6188_v36, %s9155_s24  ;;  %v226_v26 = vrot.slane %v224_v43, 1  ;;  %v6247_v43 = vpack.c.bf16 %v98_v11, %v98_v11 }
  0xdd   :  { %752 = vrot.lane.b32.xlu2 %v6202_v14, %s9130_s4 }
  0xde   :  { %v6210_v63 = vpop.permute.xlu0 %1521  ;;  %9297 = vst [vmem:[#allocation45_spill] sm:$0xff] %v6247_v43 }
  0xdf   :  { %9291 = vst [vmem:[#allocation40_spill] sm:$0xff] %v6210_v63  ;;  %v6212_v27 = vpop.permute.xlu2 %1523 }
  0xe0   :  { %9292 = vst [vmem:[#allocation41_spill] sm:$0xff] %v6212_v27  ;;  %676 = vrot.lane.b32.xlu1 %v9293_v35, %s9119_s28  ;;  %v222_v27 = vshrl.u32 %v6216_v34, 16 }
  0xe2   :  { %v6222_v7 = vpop.permute.xlu1 %1671  ;;  %v6235_v35 = vor.u32 %v226_v26, %v222_v27  ;;  %v9300_v27 = vrot.slane %v6090_v57, 2 }
  0xe4   :  { %568 = vrot.lane.b32.xlu0 %v6202_v14, %s9112_s25  ;;  %s9176_s25 = smov 44  }
  0xe5   :  { %786 = vrot.lane.b32.xlu2 %v6216_v34, %s9178_s30 }
  0xe6   :  { %v6229_v12 = vpop.permute.xlu0 %1539 }
  0xe7   :  { %9294 = vst [vmem:[#allocation42_spill] sm:$0xff] %v6229_v12  ;;  %v6231_v63 = vpop.permute.xlu2 %1503  ;;  %v6259_v12 = vunpack.c.l.b16 %v6247_v43 }
  0xe8   :  { %9295 = vst [vmem:[#allocation43_spill] sm:$0xff] %v6231_v63  ;;  %720 = vrot.lane.b32.xlu1 %v6118_v47, %s9132_s5  ;;  %v143_v63 = vpack.c.bf16 %v99_v48, %v99_v48 }
  0xe9   :  { %9301 = vst [vmem:[#allocation48_spill] sm:$0xff] %v6259_v12 }
  0xea   :  { %v6243_v15 = vpop.permute.xlu1 %732 }
  0xeb   :  { %9296 = vst [vmem:[#allocation44_spill] sm:$0xff] %v6243_v15  ;;  %v350_v15 = vunpack.c.l.b16 %v143_v63 }
  0xec   :  { %602 = vrot.lane.b32.xlu0 %v6216_v34, %s9180_s27 }
  0xed   :  { %828 = vrot.lane.b32.xlu2 %v6235_v35, %s9176_s25  ;;  %v6266_v11 = vpack.c.b16 %v350_v15, %v6259_v12 }
  0xee   :  { %v6251_v26 = vpop.permute.xlu0 %1633 }
  0xef   :  { %9298 = vst [vmem:[#allocation46_spill] sm:$0xff] %v6251_v26  ;;  %v6253_v47 = vpop.permute.xlu2 %1675  ;;  %v494_v63 = vshll.u32 %v6266_v11, 16  ;;  %v491_v15 = vshrl.u32 %v6266_v11, 16 }
  0xf0   :  { %9299 = vst [vmem:[#allocation47_spill] sm:$0xff] %v6253_v47  ;;  %750 = vrot.lane.b32.xlu1 %v9300_v27, %s9130_s4  ;;  %v100_v47 = vld [vmem:[%s9255_s26 + $0xf0] sm:$0xff] }
  0xf1   :  { %9303 = vst [vmem:[#allocation50_spill] sm:$0xff] %v6266_v11  ;;  %v1472_v43 = vrot.slane %v494_v63, 1 }
  0xf2   :  { %v6261_v56 = vpop.permute.xlu1 %1673 }
  0xf3   :  { %9302 = vst [vmem:[#allocation49_spill] sm:$0xff] %v6261_v56 }
  0xf4   :  { %644 = vrot.lane.b32.xlu0 %v6235_v35, %s9121_s3  ;;  %s9182_s3 = smov 56  }
  0xf5   :  { %864 = vrot.lane.b32.xlu2 %v5845_v22, %s9190_s22 }
  0xf6   :  { %v6270_v48 = vpop.permute.xlu0 %1713 }
  0xf7   :  { %9304 = vst [vmem:[#allocation51_spill] sm:$0xff] %v6270_v48  ;;  %v6272_v57 = vpop.permute.xlu2 %1697  ;;  %v496_v48 = vrot.slane %v494_v63, 2 }
  0xf8   :  { %9305 = vst [vmem:[#allocation52_spill] sm:$0xff] %v6272_v57  ;;  %784 = vrot.lane.b32.xlu1 %v6150_v33, %s9178_s30  ;;  %v1473_v33 = vor.u32 %v1472_v43, %v491_v15  ;;  %v493_v43 = vrot.slane %v491_v15, 1 }
  0xfa   :  { %v6277_v27 = vpop.permute.xlu1 %1501 }
  0xfb   :  { %9306 = vst [vmem:[#allocation53_spill] sm:$0xff] %v6277_v27 }
  0xfc   :  { %680 = vrot.lane.b32.xlu0 %v5845_v22, %s9119_s28  ;;  %v101_v22 = vld [vmem:[%s9255_s26 + $0xf8] sm:$0x7]  ;;  %s9188_s28 = smov 60  }
  0xfd   :  { %908 = vrot.lane.b32.xlu2 %v5874_v45, %s9163_s23 }
  0xfe   :  { %v6284_v12 = vpop.permute.xlu0 %1541 }
  0xff   :  { %9307 = vst [vmem:[#allocation54_spill] sm:$0xff] %v6284_v12  ;;  %v6286_v57 = vpop.permute.xlu2 %1715  ;;  %v6300_v12 = vrot.slane %v6266_v11, 1 }
 0x100   :  { %9308 = vst [vmem:[#allocation55_spill] sm:$0xff] %v6286_v57  ;;  %826 = vrot.lane.b32.xlu1 %v6165_v1, %s9176_s25  ;;  %v6302_v57 = vpack.c.bf16 %v100_v47, %v100_v47  ;;  %v145_v1 = vpack.c.bf16 %v101_v22, %v101_v22  ;;  %v6316_v22 = vor.u32 %v496_v48, %v493_v43 }
 0x101   :  { %9310 = vst [vmem:[#allocation57_spill] sm:$0xff] %v6300_v12 }
 0x102   :  { %v6296_v27 = vpop.permute.xlu1 %1615  ;;  %9311 = vst [vmem:[#allocation58_spill] sm:$0xff] %v6302_v57  ;;  %v183_v47 = vunpack.c.l.b16 %v6302_v57 }
 0x103   :  { %9309 = vst [vmem:[#allocation56_spill] sm:$0xff] %v6296_v27  ;;  %v1728_v27 = vsel %vm998_vm0, %v5812_v3, %v6075_v58  ;;  %v6325_v58 = vrot.slane %v5835_v17, 2 }
 0x104   :  { %1505 = vrot.lane.b32.xlu0 %v1473_v33, %s9193_s2  ;;  %v351_v33 = vunpack.c.l.b16 %v145_v1  ;;  %9313 = vst [vmem:[#allocation60_spill] sm:$0xff] %v6316_v22 }
 0x105   :  { %724 = vrot.lane.b32.xlu2 %v5874_v45, %s9132_s5  ;;  %v1760_v45 = vsel %vm1041_vm1, %v1728_v27, %v6055_v21  ;;  %s9195_s5 = smov 64  }
 0x106   :  { %v6306_v56 = vpop.permute.xlu0 %1635  ;;  %v6327_v15 = vpack.c.b16 %v351_v33, %v183_v47  ;;  %v1780_v57 = vsel %vm1070_vm2, %v1760_v45, %v6067_v53 }
 0x107   :  { %v6311_v26 = vpop.permute.xlu2 %1637 }
 0x108   :  { %9312 = vst [vmem:[#allocation59_spill] sm:$0xff] %v6311_v26  ;;  %402 = vrot.lane.b32.xlu1 %v6300_v12, %s9153_s1  ;;  %v502_v17 = vshll.u32 %v6327_v15, 16 }
 0x109   :  { %9315 = vst [vmem:[#allocation62_spill] sm:$0xff] %v6327_v15 }
 0x10a   :  { %v6320_v63 = vpop.permute.xlu1 %1525 }
 0x10b   :  { %9314 = vst [vmem:[#allocation61_spill] sm:$0xff] %v6320_v63 }
 0x10c   :  { %862 = vrot.lane.b32.xlu0 %v6174_v0, %s9190_s22  ;;  %v1802_v0 = vsel %vm1099_vm3, %v1780_v57, %v6025_v39  ;;  %v499_v39 = vshrl.u32 %v6327_v15, 16  ;;  %v1474_v57 = vrot.slane %v502_v17, 1 }
 0x10d   :  { %542 = vrot.lane.b32.xlu2 %v6316_v22, %s9155_s24  ;;  %v1828_v1 = vsel %vm1128_vm4, %v1802_v0, %v6102_v2 }
 0x10e   :  { %v6333_v48 = vpop.permute.xlu0 %300  ;;  %v1850_v43 = vsel %vm9192_vm5, %v1828_v1, %v6110_v20  ;;  %v6363_v1 = vpack.c.b16 %v183_v47, %v183_v47  ;;  %v6365_v22 = vor.u32 %v1474_v57, %v499_v39 }
 0x10f   :  { %v6335_v27 = vpop.permute.xlu2 %1677  ;;  %v1876_v45 = vsel %vm1186_vm6, %v1850_v43, %v6057_v25  ;;  %v102_v43 = vld [vmem:[%s9255_s26 + $0x100] sm:$0xff]  ;;  %v103_v25 = vld [vmem:[%s9255_s26 + $0x108] sm:$0x7] }
 0x110   :  { %9316 = vst [vmem:[#allocation63_spill] sm:$0xff] %v6335_v27  ;;  %938 = vrot.lane.b32.xlu1 %v6325_v58, %s9182_s3  ;;  %v1896_v20 = vsel %vm1215_vm7, %v1876_v45, %v6077_v31  ;;  %v9141_v47 = vshrl.u32 %v6363_v1, 16  ;;  %v6383_v57 = vpack.c.bf16 %v102_v43, %v102_v43  ;;  %v147_v45 = vpack.c.bf16 %v103_v25, %v103_v25 }
 0x111   :  { %9319 = vst [vmem:[#allocation66_spill] sm:$0xff] %v6363_v1  ;;  %v1923_v2 = vshll.u32 %v1896_v20, 16  ;;  %v9142_v3 = vshll.u32 %v6363_v1, 16 }
 0x112   :  { %v6346_v33 = vpop.permute.xlu1 %1543  ;;  %9322 = vst [vmem:[#allocation69_spill] sm:$0xff] %v6383_v57  ;;  %v184_v27 = vunpack.c.l.b16 %v6383_v57  ;;  %v352_v26 = vunpack.c.l.b16 %v147_v45  ;;  %v501_v45 = vrot.slane %v499_v39, 1 }
 0x113   :  { %9317 = vst [vmem:[#allocation64_spill] sm:$0xff] %v6346_v33  ;;  %v1925_v21 = vrot.slane %v1923_v2, 1  ;;  %v1730_v33 = vsel %vm998_vm0, %v5822_v9, %v6121_v46 }
 0x114   :  { %754 = vrot.lane.b32.xlu0 %v6325_v58, %s9130_s4  ;;  %s9325_s4 = smov 16  }
 0x115   :  { %972 = vrot.lane.b32.xlu2 %v5851_v29, %s9188_s28 }
 0x116   :  { %v6355_v0 = vpop.permute.xlu0 %384 }
 0x117   :  { %v6357_v11 = vpop.permute.xlu2 %1699 }
 0x118   :  { %9318 = vst [vmem:[#allocation65_spill] sm:$0xff] %v6357_v11  ;;  %906 = vrot.lane.b32.xlu1 %v6188_v36, %s9163_s23  ;;  %v6378_v36 = vrot.slane %v6327_v15, 1  ;;  %v1581_v15 = vrot.slane %v9141_v47, 7  ;;  %v1921_v11 = vshrl.u32 %v1896_v20, 16  ;;  %v504_v47 = vrot.slane %v502_v17, 2 }
 0x11a   :  { %v6367_v12 = vpop.permute.xlu1 %1617  ;;  %9321 = vst [vmem:[#allocation68_spill] sm:$0xff] %v6378_v36  ;;  %v1926_v25 = vor.u32 %v1925_v21, %v1921_v11  ;;  %v1582_v2 = vor.u32 %v1581_v15, %v9142_v3 }
 0x11b   :  { %9320 = vst [vmem:[#allocation67_spill] sm:$0xff] %v6367_v12 }
 0x11c   :  { %1507 = vrot.lane.b32.xlu0 %v6365_v22, %s9193_s2 }
 0x11d   :  { %788 = vrot.lane.b32.xlu2 %v5851_v29, %s9178_s30 }
 0x11e   :  { %v6385_v31 = vpop.permute.xlu0 %298 }
 0x11f   :  { %v6387_v53 = vpop.permute.xlu2 %1717 }
 0x120   :  { %9323 = vst [vmem:[#allocation70_spill] sm:$0xff] %v6387_v53  ;;  %404 = vrot.lane.b32.xlu1 %v6378_v36, %s9153_s1  ;;  %v6402_v53 = vpack.c.b16 %v352_v26, %v184_v27  ;;  %v9327_v26 = vshll.u32 %v5851_v29, 16 }
 0x122   :  { %v6395_v43 = vpop.permute.xlu1 %524  ;;  %9324 = vst [vmem:[#allocation71_spill] sm:$0xff] %v6402_v53  ;;  %v510_v21 = vshll.u32 %v6402_v53, 16  ;;  %v233_v15 = vrot.slane %v9327_v26, 1  ;;  %v507_v39 = vshrl.u32 %v6402_v53, 16 }
 0x124   :  { %936 = vrot.lane.b32.xlu0 %v6202_v14, %s9182_s3  ;;  %v6414_v14 = vor.u32 %v504_v47, %v501_v45  ;;  %v1476_v17 = vrot.slane %v510_v21, 1  ;;  %v9329_v47 = vshrl.u32 %v5851_v29, 16 }
 0x125   :  { %2001 = vrot.lane.b32.xlu2 %v1926_v25, %s9195_s5  ;;  %v6420_v25 = vpack.c.b16 %v184_v27, %v184_v27 }
 0x126   :  { %v6404_v12 = vpop.permute.xlu0 %382  ;;  %9326 = vst [vmem:[#allocation72_spill] sm:$0xff] %v6414_v14  ;;  %v6434_v45 = vor.u32 %v233_v15, %v9329_v47  ;;  %v6438_v26 = vor.u32 %v1476_v17, %v507_v39 }
 0x127   :  { %v6406_v20 = vpop.permute.xlu2 %678  ;;  %9328 = vst [vmem:[#allocation73_spill] sm:$0xff] %v6420_v25  ;;  %v9148_v57 = vshrl.u32 %v6420_v25, 16  ;;  %v9152_v15 = vshll.u32 %v6420_v25, 16 }
 0x128   :  { %1619 = vrot.lane.b32.xlu1 %v1582_v2, %s9325_s4  ;;  %v1726_v2 = vsel %vm998_vm0, %v5817_v6, %v6083_v37 }
 0x129   :  { %v1759_v27 = vsel %vm1041_vm1, %v1726_v2, %v6012_v13  ;;  %v1583_v17 = vrot.slane %v9148_v57, 7 }
 0x12a   :  { %v6410_v11 = vpop.permute.xlu1 %566  ;;  %v1779_v37 = vsel %vm1070_vm2, %v1759_v27, %v6093_v52 }
 0x12b   :  { %v1800_v29 = vsel %vm1099_vm3, %v1779_v37, %v6042_v59  ;;  %v6465_v59 = vrot.slane %v6402_v53, 1  ;;  %v1584_v37 = vor.u32 %v1583_v17, %v9152_v15 }
 0x12c   :  { %304 = vrot.lane.b32.xlu0 %v6235_v35, %s9193_s2  ;;  %v1827_v2 = vsel %vm1128_vm4, %v1800_v29, %v6115_v44 }
 0x12d   :  { %618 = vrot.lane.b32.xlu2 %v6363_v1, %s9180_s27  ;;  %v1848_v27 = vsel %vm9192_vm5, %v1827_v2, %v6137_v38  ;;  %9330 = vst [vmem:[#allocation74_spill] sm:$0xff] %v6465_v59  ;;  %v509_v38 = vrot.slane %v507_v39, 1 }
 0x12e   :  { %v6426_v3 = vpop.permute.xlu0 %522  ;;  %v1875_v57 = vsel %vm1186_vm6, %v1848_v27, %v6095_v54 }
 0x12f   :  { %v6428_v35 = vpop.permute.xlu2 %722  ;;  %v1895_v44 = vsel %vm1215_vm7, %v1875_v57, %v6155_v61  ;;  %v104_v57 = vld [vmem:[%s9255_s26 + $0x110] sm:$0xff] }
 0x130   :  { %544 = vrot.lane.b32.xlu1 %v6414_v14, %s9155_s24  ;;  %v1917_v2 = vshll.u32 %v1895_v44, 16 }
 0x132   :  { %v6443_v1 = vpop.permute.xlu1 %600  ;;  %v1919_v27 = vrot.slane %v1917_v2, 1 }
 0x134   :  { %830 = vrot.lane.b32.xlu0 %v6434_v45, %s9176_s25 }
 0x135   :  { %1509 = vrot.lane.b32.xlu2 %v6438_v26, %s9193_s2 }
 0x136   :  { %v6456_v47 = vpop.permute.xlu0 %564 }
 0x137   :  { %v6460_v52 = vpop.permute.xlu2 %752 }
 0x138   :  { %970 = vrot.lane.b32.xlu1 %v6216_v34, %s9188_s28  ;;  %v512_v34 = vrot.slane %v510_v21, 2  ;;  %v6493_v21 = vpack.c.bf16 %v104_v57, %v104_v57 }
 0x13a   :  { %v6471_v29 = vpop.permute.xlu1 %642  ;;  %v6484_v17 = vor.u32 %v512_v34, %v509_v38  ;;  %9333 = vst [vmem:[#allocation76_spill] sm:$0xff] %v6493_v21  ;;  %v185_v34 = vunpack.c.l.b16 %v6493_v21  ;;  %v105_v21 = vld [vmem:[%s9255_s26 + $0x118] sm:$0x7] }
 0x13c   :  { %406 = vrot.lane.b32.xlu0 %v6465_v59, %s9153_s1  ;;  %9331 = vst [vmem:[#allocation75_spill] sm:$0xff] %v6484_v17  ;;  %s9332_s1 = smov 24  }
 0x13d   :  { %1621 = vrot.lane.b32.xlu2 %v1584_v37, %s9325_s4  ;;  %v1915_v37 = vshrl.u32 %v1895_v44, 16  ;;  %v6507_v44 = vpack.c.b16 %v185_v34, %v185_v34 }
 0x13e   :  { %v6478_v53 = vpop.permute.xlu0 %302 }
 0x13f   :  { %v6480_v13 = vpop.permute.xlu2 %786  ;;  %9334 = vst [vmem:[#allocation77_spill] sm:$0xff] %v6507_v44 }
 0x140   :  { %866 = vrot.lane.b32.xlu1 %v5840_v19, %s9190_s22  ;;  %v1920_v19 = vor.u32 %v1919_v27, %v1915_v37  ;;  %v9166_v27 = vshrl.u32 %v6507_v44, 16  ;;  %v6519_v37 = vrot.slane %v5832_v16, 2 }
 0x142   :  { %v6489_v15 = vpop.permute.xlu1 %598 }
 0x144   :  { %1679 = vrot.lane.b32.xlu0 %v6365_v22, %s9332_s1 }
 0x145   :  { %546 = vrot.lane.b32.xlu2 %v6484_v17, %s9155_s24  ;;  %s9344_s24 = smov 36  }
 0x146   :  { %v6497_v39 = vpop.permute.xlu0 %386 }
 0x147   :  { %v6499_v38 = vpop.permute.xlu2 %828 }
 0x148   :  { %1999 = vrot.lane.b32.xlu1 %v1920_v19, %s9195_s5 }
 0x14a   :  { %v6503_v2 = vpop.permute.xlu1 %640 }
 0x14c   :  { %620 = vrot.lane.b32.xlu0 %v6420_v25, %s9180_s27  ;;  %v1585_v25 = vrot.slane %v9166_v27, 7 }
 0x14d   :  { %910 = vrot.lane.b32.xlu2 %v5858_v32, %s9163_s23  ;;  %v9167_v32 = vshll.u32 %v6507_v44, 16  ;;  %s9336_s23 = smov 32  }
 0x14e   :  { %v6511_v22 = vpop.permute.xlu0 %526 }
 0x14f   :  { %v6513_v57 = vpop.permute.xlu2 %864  ;;  %v1586_v54 = vor.u32 %v1585_v25, %v9167_v32 }
 0x150   :  { %696 = vrot.lane.b32.xlu1 %v6378_v36, %s9335_s29  ;;  %v149_v36 = vpack.c.bf16 %v105_v21, %v105_v21  ;;  %v1761_v21 = vsel %vm1041_vm1, %v1730_v33, %v6130_v23 }
 0x151   :  { %v1781_v25 = vsel %vm1070_vm2, %v1761_v21, %v6145_v40 }
 0x152   :  { %v6521_v19 = vpop.permute.xlu1 %676  ;;  %v1804_v46 = vsel %vm1099_vm3, %v1781_v25, %v6162_v24 }
 0x153   :  { %v1829_v33 = vsel %vm1128_vm4, %v1804_v46, %v6112_v8 }
 0x154   :  { %570 = vrot.lane.b32.xlu0 %v6325_v58, %s9325_s4  ;;  %v353_v58 = vunpack.c.l.b16 %v149_v36 }
 0x155   :  { %940 = vrot.lane.b32.xlu2 %v6519_v37, %s9182_s3 }
 0x156   :  { %v6533_v16 = vpop.permute.xlu0 %568  ;;  %v6551_v63 = vpack.c.b16 %v353_v58, %v185_v34  ;;  %v1852_v58 = vsel %vm9192_vm5, %v1829_v33, %v6168_v41 }
 0x157   :  { %v6535_v61 = vpop.permute.xlu2 %908  ;;  %v1877_v21 = vsel %vm1186_vm6, %v1852_v58, %v6176_v62 }
 0x158   :  { %740 = vrot.lane.b32.xlu1 %v6414_v14, %s9336_s23  ;;  %9337 = vst [vmem:[#allocation78_spill] sm:$0xff] %v6551_v63  ;;  %v515_v24 = vshrl.u32 %v6551_v63, 16  ;;  %v1897_v46 = vsel %vm1215_vm7, %v1877_v21, %v6123_v49  ;;  %v1004_v21 = vsel %vm998_vm0, %v6035_v50, %v6333_v48 }
 0x159   :  { %v1929_v58 = vshll.u32 %v1897_v46, 16 }
 0x15a   :  { %v6544_v27 = vpop.permute.xlu1 %720 }
 0x15c   :  { %1623 = vrot.lane.b32.xlu0 %v1586_v54, %s9325_s4  ;;  %v518_v54 = vshll.u32 %v6551_v63, 16 }
 0x15d   :  { %306 = vrot.lane.b32.xlu2 %v6434_v45, %s9193_s2 }
 0x15e   :  { %v6555_v36 = vpop.permute.xlu0 %602 }
 0x15f   :  { %v6559_v32 = vpop.permute.xlu2 %724 }
 0x160   :  { %1681 = vrot.lane.b32.xlu1 %v6438_v26, %s9332_s1  ;;  %v1478_v26 = vrot.slane %v518_v54, 1 }
 0x162   :  { %v6566_v34 = vpop.permute.xlu1 %750  ;;  %v6585_v41 = vor.u32 %v1478_v26, %v515_v24  ;;  %v1045_v26 = vsel %vm1041_vm1, %v1004_v21, %v6355_v0  ;;  %v517_v21 = vrot.slane %v515_v24, 1  ;;  %v9342_v24 = vshrl.u32 %v5837_v18, 16 }
 0x163   :  { %v1074_v49 = vsel %vm1070_vm2, %v1045_v26, %v6395_v43  ;;  %v6614_v43 = vrot.slane %v6551_v63, 1  ;;  %v520_v26 = vrot.slane %v518_v54, 2 }
 0x164   :  { %622 = vrot.lane.b32.xlu0 %v6507_v44, %s9180_s27  ;;  %v1103_v62 = vsel %vm1099_vm3, %v1074_v49, %v6410_v11  ;;  %v9340_v49 = vshll.u32 %v5837_v18, 16  ;;  %s9382_s27 = smov 12  }
 0x165   :  { %974 = vrot.lane.b32.xlu2 %v5837_v18, %s9188_s28  ;;  %v1132_v50 = vsel %vm1128_vm4, %v1103_v62, %v6443_v1  ;;  %9339 = vst [vmem:[#allocation80_spill] sm:$0xff] %v6614_v43 }
 0x166   :  { %v6577_v25 = vpop.permute.xlu0 %644  ;;  %v1161_v0 = vsel %vm9192_vm5, %v1132_v50, %v6471_v29  ;;  %v240_v11 = vrot.slane %v9340_v49, 1  ;;  %v6628_v29 = vor.u32 %v520_v26, %v517_v21 }
 0x167   :  { %v6581_v14 = vpop.permute.xlu2 %542  ;;  %v1190_v62 = vsel %vm1186_vm6, %v1161_v0, %v6406_v20 }
 0x168   :  { %9338 = vst [vmem:[#allocation79_spill] sm:$0xff] %v6581_v14  ;;  %698 = vrot.lane.b32.xlu1 %v6465_v59, %s9335_s29  ;;  %v1931_v14 = vrot.slane %v1929_v58, 1  ;;  %v1219_v54 = vsel %vm1215_vm7, %v1190_v62, %v6428_v35 }
 0x169   :  { %9341 = vst [vmem:[#allocation81_spill] sm:$0xff] %v6628_v29  ;;  %v1248_v20 = vsel %vm1244_vm8, %v1219_v54, %v6460_v52 }
 0x16a   :  { %v6587_v33 = vpop.permute.xlu1 %784  ;;  %v1277_v35 = vsel %vm1273_vm9, %v1248_v20, %v6480_v13 }
 0x16b   :  { %v1306_v0 = vsel %vm1302_vm10, %v1277_v35, %v6499_v38 }
 0x16c   :  { %646 = vrot.lane.b32.xlu0 %v6434_v45, %s9332_s1  ;;  %v1927_v45 = vshrl.u32 %v1897_v46, 16  ;;  %v6634_v46 = vor.u32 %v240_v11, %v9342_v24  ;;  %v1335_v52 = vsel %vm1331_vm11, %v1306_v0, %v6513_v57  ;;  %v1732_v57 = vsel %vm998_vm0, %v5896_v55, %v6182_v4 }
 0x16d   :  { %1683 = vrot.lane.b32.xlu2 %v6585_v41, %s9332_s1  ;;  %v1364_v21 = vsel %vm1360_vm12, %v1335_v52, %v6535_v61  ;;  %v1762_v4 = vsel %vm1041_vm1, %v1732_v57, %v6190_v30  ;;  %v9349_v57 = vld [vmem:[#allocation6_spill] sm:$0xff] }
 0x16e   :  { %v6596_v44 = vpop.permute.xlu0 %680  ;;  %v1932_v58 = vor.u32 %v1931_v14, %v1927_v45 }
 0x16f   :  { %v973_v59 = vpop.permute.xlu2 %972 }
 0x170   :  { %742 = vrot.lane.b32.xlu1 %v6484_v17, %s9336_s23 }
 0x172   :  { %v6608_v48 = vpop.permute.xlu1 %826 }
 0x174   :  { %2003 = vrot.lane.b32.xlu0 %v1932_v58, %s9195_s5 }
 0x175   :  { %572 = vrot.lane.b32.xlu2 %v6519_v37, %s9325_s4 }
 0x176   :  { %v6622_v1 = vpop.permute.xlu0 %1505 }
 0x177   :  { %v6624_v14 = vpop.permute.xlu2 %788 }
 0x178   :  { %700 = vrot.lane.b32.xlu1 %v6614_v43, %s9335_s29 }
 0x17a   :  { %v6636_v45 = vpop.permute.xlu1 %402 }
 0x17b   :  { %9343 = vst [vmem:[#allocation82_spill] sm:$0xff] %v6636_v45 }
 0x17c   :  { %744 = vrot.lane.b32.xlu0 %v6628_v29, %s9336_s23 }
 0x17d   :  { %648 = vrot.lane.b32.xlu2 %v6634_v46, %s9332_s1 }
 0x17e   :  { %v6644_v50 = vpop.permute.xlu0 %862 }
 0x17f   :  { %v2002_v58 = vpop.permute.xlu2 %2001 }
 0x180   :  { %756 = vrot.lane.b32.xlu1 %v6519_v37, %s9344_s24 }
 0x182   :  { %v939_v26 = vpop.permute.xlu1 %938 }
 0x183   :  { %v1393_v13 = vsel %vm1389_vm13, %v1364_v21, %v939_v26 }
 0x184   :  { %v1422_v49 = vsel %vm1418_vm14, %v1393_v13, %v973_v59  ;;  %790 = vrot.lane.b32.xlu0 %v5837_v18, %s9178_s30  ;;  %v6676_v18 = vrot.slane %v5867_v42, 2  ;;  %v1782_v42 = vsel %vm1070_vm2, %v1762_v4, %v6140_v28  ;;  %v9355_v4 = vld [vmem:[#allocation35_spill] sm:$0xff] }
 0x185   :  { %v6661_v38 = vsel %vm9202_vm15, %v1422_v49, %v2002_v58  ;;  %868 = vrot.lane.b32.xlu2 %v5886_v51, %s9190_s22  ;;  %v1806_v52 = vsel %vm1099_vm3, %v1782_v42, %v6196_v5 }
 0x186   :  { %v2073_v61 = vrot.slane %v6661_v38, 1  ;;  %v2074_v37 = vrot.slane %v6661_v38, 2  ;;  %v2120_v11 = vunpack.i.h.s16 %v6661_v38  ;;  %v6671_v59 = vpop.permute.xlu0 %754  ;;  %v2075_v54 = vrot.slane %v6661_v38, 3 }
 0x187   :  { %v6673_v62 = vpop.permute.xlu2 %618  ;;  %v1830_v21 = vsel %vm1128_vm4, %v1806_v52, %v6204_v10 }
 0x188   :  { %9345 = vst [vmem:[#allocation83_spill] sm:$0xff] %v6673_v62  ;;  %v2122_v51 = vunpack.i.h.s16 %v2073_v61  ;;  %v2124_v24 = vunpack.i.h.s16 %v2074_v37  ;;  %v5169_v20 = vpack.i.b16 %v2073_v61, %v2120_v11  ;;  %832 = vrot.lane.b32.xlu1 %v6634_v46, %s9176_s25  ;;  %v1854_v13 = vsel %vm9192_vm5, %v1830_v21, %v6222_v7 }
 0x189   :  { %v9350_v61 = vshll.u32 %v5909_v60, 16  ;;  %v9354_v7 = vshrl.u32 %v5909_v60, 16 }
 0x18a   :  { %v5170_v35 = vpack.i.b16 %v2074_v37, %v2122_v51  ;;  %v5171_v58 = vpack.i.b16 %v2075_v54, %v2124_v24  ;;  %2289 = vst [vmem:[#allocation1 + $0x4] ss:$9 sm:$0xff] %v5169_v20  ;;  %v6683_v0 = vpop.permute.xlu1 %906  ;;  %v9351_v37 = vld [vmem:[#allocation36_spill] sm:$0xff] }
 0x18b   :  { %v247_v5 = vrot.slane %v9350_v61, 1  ;;  %v1878_v11 = vsel %vm1186_vm6, %v1854_v13, %v9351_v37  ;;  %v9353_v51 = vld [vmem:[#allocation44_spill] sm:$0xff]  ;;  %v9359_v61 = vld [vmem:[#allocation42_spill] sm:$0xff] }
 0x18c   :  { %2292 = vst [vmem:[#allocation1 + $0x5] ss:$9 sm:$0xff] %v5170_v35  ;;  %758 = vrot.lane.b32.xlu0 %v6676_v18, %s9344_s24  ;;  %v1898_v24 = vsel %vm1215_vm7, %v1878_v11, %v9353_v51  ;;  %v9356_v35 = vld [vmem:[#allocation8_spill] sm:$0xff] }
 0x18d   :  { %2295 = vst [vmem:[#allocation1 + $0x6] ss:$9 sm:$0xff] %v5171_v58  ;;  %792 = vrot.lane.b32.xlu2 %v5909_v60, %s9178_s30  ;;  %v6715_v20 = vor.u32 %v247_v5, %v9354_v7  ;;  %v1735_v58 = vsel %vm998_vm0, %v9356_v35, %v9355_v4  ;;  %v1935_v42 = vshll.u32 %v1898_v24, 16  ;;  %v9358_v13 = vld [vmem:[#allocation40_spill] sm:$0xff]  ;;  %v1933_v7 = vshrl.u32 %v1898_v24, 16  ;;  %v9360_v4 = vld [vmem:[#allocation10_spill] sm:$0xff] }
 0x18e   :  { %v6695_v26 = vpop.permute.xlu0 %1507  ;;  %v9361_v35 = vld [vmem:[#allocation38_spill] sm:$0xff]  ;;  %s9406_s30 = smov 48  }
 0x18f   :  { %9346 = vst [vmem:[#allocation84_spill] sm:$0xff] %v6695_v26  ;;  %v6699_v49 = vpop.permute.xlu2 %1509  ;;  %v1937_v11 = vrot.slane %v1935_v42, 1  ;;  %v107_v42 = vld [vmem:[%s9255_s26 + $0x128] sm:$0x7] }
 0x190   :  { %9347 = vst [vmem:[#allocation85_spill] sm:$0xff] %v6699_v49  ;;  %912 = vrot.lane.b32.xlu1 %v9349_v57, %s9348_s0  ;;  %v1764_v57 = vsel %vm1041_vm1, %v1735_v58, %v9358_v13  ;;  %v106_v58 = vld [vmem:[%s9255_s26 + $0x120] sm:$0xff]  ;;  %v9362_v13 = vld [vmem:[#allocation46_spill] sm:$0xff]  ;;  %v151_v17 = vpack.c.bf16 %v107_v42, %v107_v42 }
 0x191   :  { %v1784_v5 = vsel %vm1070_vm2, %v1764_v57, %v9359_v61  ;;  %v1938_v61 = vor.u32 %v1937_v11, %v1933_v7  ;;  %v9368_v49 = vld [vmem:[#allocation51_spill] sm:$0xff]  ;;  %v9369_v11 = vld [vmem:[#allocation9_spill] sm:$0xff] }
 0x192   :  { %v6707_v54 = vpop.permute.xlu1 %404  ;;  %v1808_v63 = vsel %vm1099_vm3, %v1784_v5, %v9361_v35  ;;  %v9370_v7 = vld [vmem:[#allocation7_spill] sm:$0xff] }
 0x193   :  { %9352 = vst [vmem:[#allocation6_spill] sm:$0xff] %v6707_v54  ;;  %v1832_v24 = vsel %vm1128_vm4, %v1808_v63, %v9362_v13  ;;  %v6766_v13 = vrot.slane %v9370_v7, 2  ;;  %v9374_v7 = vld [vmem:[#allocation26_spill] sm:$0xff] }
 0x194   :  { %942 = vrot.lane.b32.xlu0 %v6676_v18, %s9182_s3  ;;  %s9376_s3 = sld [smem:[#allocation92_spill]] }
 0x195   :  { %976 = vrot.lane.b32.xlu2 %v5909_v60, %s9188_s28 }
 0x196   :  { %v6722_v52 = vpop.permute.xlu0 %936 }
 0x197   :  { %v6724_v21 = vpop.permute.xlu2 %1621 }
 0x198   :  { %9357 = vst [vmem:[#allocation36_spill] sm:$0xff] %v6724_v21  ;;  %834 = vrot.lane.b32.xlu1 %v6715_v20, %s9176_s25  ;;  %v9366_v21 = vld [vmem:[#allocation39_spill] sm:$0xff]  ;;  %s9372_s25 = smov 56  }
 0x19a   :  { %v6732_v60 = vpop.permute.xlu1 %1619 }
 0x19c   :  { %870 = vrot.lane.b32.xlu0 %v9360_v4, %s9190_s22  ;;  %v9363_v4 = vld [vmem:[#allocation49_spill] sm:$0xff]  ;;  %s9378_s22 = smov 8  }
 0x19d   :  { %308 = vrot.lane.b32.xlu2 %v6634_v46, %s9193_s2  ;;  %v1856_v5 = vsel %vm9192_vm5, %v1832_v24, %v9363_v4  ;;  %v6755_v46 = vpack.c.bf16 %v106_v58, %v106_v58  ;;  %v9371_v58 = vld [vmem:[#allocation11_spill] sm:$0xff] }
 0x19e   :  { %v6748_v57 = vpop.permute.xlu0 %304  ;;  %v1880_v54 = vsel %vm1186_vm6, %v1856_v5, %v9366_v21 }
 0x19f   :  { %v6752_v35 = vpop.permute.xlu2 %546  ;;  %9365 = vst [vmem:[#allocation35_spill] sm:$0xff] %v6755_v46  ;;  %v1900_v63 = vsel %vm1215_vm7, %v1880_v54, %v9368_v49  ;;  %v595_v24 = vunpack.c.l.b16 %v6755_v46 }
 0x1a0   :  { %9364 = vst [vmem:[#allocation44_spill] sm:$0xff] %v6752_v35  ;;  %2005 = vrot.lane.b32.xlu1 %v1938_v61, %s9195_s5  ;;  %v671_v61 = vunpack.c.l.b16 %v151_v17  ;;  %v1941_v42 = vshll.u32 %v1900_v63, 16  ;;  %v1001_v17 = vsel %vm998_vm0, %v9374_v7, %v6385_v31 }
 0x1a1   :  { %v1043_v35 = vsel %vm1041_vm1, %v1001_v17, %v6404_v12 }
 0x1a2   :  { %v6759_v26 = vpop.permute.xlu1 %544  ;;  %v6777_v49 = vpack.c.b16 %v671_v61, %v595_v24  ;;  %v1943_v54 = vrot.slane %v1941_v42, 1  ;;  %v1072_v42 = vsel %vm1070_vm2, %v1043_v35, %v6426_v3 }
 0x1a3   :  { %9367 = vst [vmem:[#allocation8_spill] sm:$0xff] %v6759_v26  ;;  %v1101_v31 = vsel %vm1099_vm3, %v1072_v42, %v6456_v47  ;;  %v108_v47 = vld [vmem:[%s9255_s26 + $0x130] sm:$0xff] }
 0x1a4   :  { %914 = vrot.lane.b32.xlu0 %v9369_v11, %s9348_s0  ;;  %9373 = vst [vmem:[#allocation40_spill] sm:$0xff] %v6777_v49  ;;  %v1939_v11 = vshrl.u32 %v1900_v63, 16  ;;  %v716_v46 = vshll.u32 %v6777_v49, 16  ;;  %v713_v12 = vshrl.u32 %v6777_v49, 16 }
 0x1a5   :  { %978 = vrot.lane.b32.xlu2 %v9371_v58, %s9188_s28  ;;  %s9439_s28 = smov 64  }
 0x1a6   :  { %v6771_v4 = vpop.permute.xlu0 %830  ;;  %v1944_v61 = vor.u32 %v1943_v54, %v1939_v11  ;;  %v1480_v17 = vrot.slane %v716_v46, 1  ;;  %v2222_v54 = vld [vmem:[%s9376_s3 + $0x30] sm:$0x3] }
 0x1a7   :  { %v6773_v21 = vpop.permute.xlu2 %910  ;;  %v2413_v35 = vunpack.c.l.b16 %v2222_v54  ;;  %v6827_v54 = vpack.c.b16 %v595_v24, %v595_v24 }
 0x1a8   :  { %944 = vrot.lane.b32.xlu1 %v6766_v13, %s9372_s25 }
 0x1a9   :  { %v2420_v42 = vpack.c.b16 %v2413_v35, %v2413_v35  ;;  %9379 = vst [vmem:[#allocation38_spill] sm:$0xff] %v6827_v54  ;;  %v9199_v35 = vshrl.u32 %v6827_v54, 16 }
 0x1aa   :  { %v971_v5 = vpop.permute.xlu1 %970 }
 0x1ac   :  { %574 = vrot.lane.b32.xlu0 %v6676_v18, %s9325_s4  ;;  %v1130_v18 = vsel %vm1128_vm4, %v1101_v31, %v6489_v15 }
 0x1ad   :  { %310 = vrot.lane.b32.xlu2 %v6715_v20, %s9193_s2  ;;  %v1159_v3 = vsel %vm9192_vm5, %v1130_v18, %v6503_v2  ;;  %v6819_v2 = vor.u32 %v1480_v17, %v713_v12  ;;  %v6821_v18 = vpack.c.bf16 %v108_v47, %v108_v47  ;;  %vm9201_vm5 = vcmask 1041408  }
 0x1ae   :  { %v6791_v63 = vpop.permute.xlu0 %406  ;;  %v1188_v15 = vsel %vm1186_vm6, %v1159_v3, %v6521_v19 }
 0x1af   :  { %9375 = vst [vmem:[#allocation42_spill] sm:$0xff] %v6791_v63  ;;  %v6795_v7 = vpop.permute.xlu2 %940  ;;  %v781_v24 = vunpack.c.l.b16 %v6821_v18 }
 0x1b0   :  { %2007 = vrot.lane.b32.xlu1 %v1944_v61, %s9195_s5  ;;  %v1217_v61 = vsel %vm1215_vm7, %v1188_v15, %v6544_v27  ;;  %9377 = vst [vmem:[#allocation10_spill] sm:$0xff] %v6821_v18  ;;  %v2444_v27 = vsel %vm9201_vm5, %v2420_v42, 0  ;;  %v715_v42 = vrot.slane %v713_v12, 1  ;;  %vm9393_vm5 = vcmask 195584   ;;  %s9398_s5 = smov 44  }
 0x1b1   :  { %v1246_v31 = vsel %vm1244_vm8, %v1217_v61, %v6566_v34  ;;  %2447 = vmatpush.bf16.msra.mxu0 %v2444_v27  ;;  %v6852_v61 = vrot.slane %v6777_v49, 1 }
 0x1b2   :  { %v6811_v11 = vpop.permute.xlu1 %866  ;;  %v1275_v19 = vsel %vm1273_vm9, %v1246_v31, %v6587_v33  ;;  %v718_v31 = vrot.slane %v716_v46, 2  ;;  %v1587_v46 = vrot.slane %v9199_v35, 7 }
 0x1b3   :  { %v1304_v34 = vsel %vm1302_vm10, %v1275_v19, %v6608_v48  ;;  %v5544_v48 = vld [vmem:[%s9376_s3 + $0x28] sm:$0xff]  ;;  %9380 = vst [vmem:[#allocation46_spill] sm:$0xff] %v6852_v61 }
 0x1b4   :  { %1511 = vrot.lane.b32.xlu0 %v6585_v41, %s9193_s2  ;;  %v1333_v41 = vsel %vm1331_vm11, %v1304_v34, %v6644_v50 }
 0x1b5   :  { %408 = vrot.lane.b32.xlu2 %v6614_v43, %s9378_s22  ;;  %v1362_v33 = vsel %vm1360_vm12, %v1333_v41, %v6683_v0  ;;  %2448 = vmatpush.bf16.msra.mxu0 %v5544_v48  ;;  %v9200_v41 = vshll.u32 %v6827_v54, 16  ;;  %v6873_v48 = vor.u32 %v718_v31, %v715_v42  ;;  %v5541_v31 = vld [vmem:[%s9376_s3 + $0x10] sm:$0xff] }
 0x1b6   :  { %v6832_v3 = vpop.permute.xlu0 %1679  ;;  %v1391_v47 = vsel %vm1389_vm13, %v1362_v33, %v6722_v52  ;;  %v6856_v52 = vpack.c.b16 %v781_v24, %v781_v24 }
 0x1b7   :  { %v6836_v17 = vpop.permute.xlu2 %306  ;;  %v1420_v50 = vsel %vm1418_vm14, %v1391_v47, %v971_v5  ;;  %v5543_v5 = vld [vmem:[%s9376_s3 + $0x20] sm:$0xff]  ;;  %9384 = vst [vmem:[#allocation51_spill] sm:$0xff] %v6873_v48 }
 0x1b8   :  { %1513 = vrot.lane.b32.xlu1 %v6819_v2, %s9193_s2  ;;  %9381 = vst [vmem:[#allocation49_spill] sm:$0xff] %v6856_v52  ;;  %v9197_v47 = vshrl.u32 %v6856_v52, 16  ;;  %s9390_s2 = smov 20  }
 0x1b9   :  { %2449 = vmatpush.bf16.msra.mxu0 %v5543_v5 }
 0x1ba   :  { %v2000_v15 = vpop.permute.xlu1 %1999  ;;  %v1589_v42 = vrot.slane %v9197_v47, 7 }
 0x1bb   :  { %v2029_v0 = vsel %vm9202_vm15, %v1420_v50, %v2000_v15  ;;  %v5542_v50 = vld [vmem:[%s9376_s3 + $0x18] sm:$0xff] }
 0x1bc   :  { %v2070_v19 = vrot.slane %v2029_v0, 1  ;;  %v2071_v27 = vrot.slane %v2029_v0, 2  ;;  %v2072_v34 = vrot.slane %v2029_v0, 3  ;;  %2277 = vst [vmem:[#allocation1] ss:$9 sm:$0xff] %v2029_v0  ;;  %650 = vrot.lane.b32.xlu0 %v6715_v20, %s9332_s1  ;;  %v9198_v0 = vshll.u32 %v6856_v52, 16 }
 0x1bd   :  { %548 = vrot.lane.b32.xlu2 %v6628_v29, %s9382_s27  ;;  %2450 = vmatpush.bf16.msra.mxu0 %v5542_v50 }
 0x1be   :  { %v5168_v12 = vpack.i.b16 %v6661_v38, %v2072_v34  ;;  %2280 = vst [vmem:[#allocation1 + $0x1] ss:$9 sm:$0xff] %v2070_v19  ;;  %v6867_v33 = vpop.permute.xlu0 %620  ;;  %v1588_v38 = vor.u32 %v1587_v46, %v9200_v41  ;;  %v109_v19 = vld [vmem:[%s9255_s26 + $0x138] sm:$0x7]  ;;  %v1590_v5 = vor.u32 %v1589_v42, %v9198_v0 }
 0x1bf   :  { %9383 = vst [vmem:[#allocation39_spill] sm:$0xff] %v6867_v33  ;;  %v6869_v20 = vpop.permute.xlu2 %974  ;;  %v153_v46 = vpack.c.bf16 %v109_v19, %v109_v19  ;;  %v9388_v19 = vshll.u32 %v9371_v58, 16 }
 0x1c0   :  { %2283 = vst [vmem:[#allocation1 + $0x2] ss:$9 sm:$0xff] %v2071_v27  ;;  %1527 = vrot.lane.b32.xlu1 %v6852_v61, %s9378_s22 }
 0x1c1   :  { %2286 = vst [vmem:[#allocation1 + $0x3] ss:$9 sm:$0xff] %v5168_v12  ;;  %2451 = vmatpush.bf16.msra.mxu0 %v5541_v31  ;;  %v5540_v12 = vld [vmem:[%s9376_s3 + $0x8] sm:$0xff]  ;;  %v5539_v31 = vld [vmem:[%s9376_s3] sm:$0xff]  ;;  %v631_v0 = vrot.slane %v9388_v19, 1  ;;  %s9394_s3 = smov 40  }
 0x1c2   :  { %v6881_v15 = vpop.permute.xlu1 %696 }
 0x1c3   :  { %9385 = vst [vmem:[#allocation9_spill] sm:$0xff] %v6881_v15 }
 0x1c4   :  { %1545 = vrot.lane.b32.xlu0 %v6873_v48, %s9382_s27 }
 0x1c5   :  { %1625 = vrot.lane.b32.xlu2 %v1588_v38, %s9325_s4  ;;  %2452 = vmatpush.bf16.msra.mxu0 %v5540_v12  ;;  %v857_v38 = vunpack.c.l.b16 %v153_v46  ;;  %v9389_v12 = vld [vmem:[#allocation33_spill] sm:$0xff] }
 0x1c6   :  { %v6895_v27 = vpop.permute.xlu0 %570 }
 0x1c7   :  { %v6897_v34 = vpop.permute.xlu2 %1683  ;;  %v6925_v46 = vpack.c.b16 %v857_v38, %v781_v24 }
 0x1c8   :  { %9386 = vst [vmem:[#allocation7_spill] sm:$0xff] %v6897_v34  ;;  %576 = vrot.lane.b32.xlu1 %v6766_v13, %s9325_s4 }
 0x1c9   :  { %2453 = vmatpush.bf16.msra.mxu0 %v5539_v31  ;;  %9391 = vst [vmem:[#allocation26_spill] sm:$0xff] %v6925_v46  ;;  %v902_v38 = vshll.u32 %v6925_v46, 16 }
 0x1ca   :  { %v6906_v50 = vpop.permute.xlu1 %740 }
 0x1cb   :  { %9387 = vst [vmem:[#allocation11_spill] sm:$0xff] %v6906_v50 }
 0x1cc   :  { %1627 = vrot.lane.b32.xlu0 %v1590_v5, %s9325_s4  ;;  %v1007_v5 = vsel %vm998_vm0, %v9389_v12, %v6478_v53  ;;  %v9392_v53 = vshrl.u32 %v9371_v58, 16  ;;  %v899_v12 = vshrl.u32 %v6925_v46, 16 }
 0x1cd   :  { %760 = vrot.lane.b32.xlu2 %v6766_v13, %s9344_s24  ;;  %v1047_v13 = vsel %vm1041_vm1, %v1007_v5, %v6497_v39 }
 0x1ce   :  { %v6914_v47 = vpop.permute.xlu0 %1623  ;;  %v1076_v31 = vsel %vm1070_vm2, %v1047_v13, %v6511_v22  ;;  %v632_v24 = vor.u32 %v631_v0, %v9392_v53  ;;  %v1482_v0 = vrot.slane %v902_v38, 1 }
 0x1cf   :  { %v6916_v42 = vpop.permute.xlu2 %572  ;;  %v1105_v19 = vsel %vm1099_vm3, %v1076_v31, %v6533_v16 }
 0x1d0   :  { %624 = vrot.lane.b32.xlu1 %v6827_v54, %s9390_s2  ;;  %v1134_v41 = vsel %vm1128_vm4, %v1105_v19, %v6555_v36  ;;  %v6984_v19 = vrot.slane %v6925_v46, 1  ;;  %v9419_v46 = vld [vmem:[#allocation18_spill] sm:$0xff] }
 0x1d1   :  { %v1163_v39 = vsel %vm9393_vm5, %v1134_v41, %v6577_v25  ;;  %vm9217_vm5 = vcmask 818176  }
 0x1d2   :  { %v6931_v35 = vpop.permute.xlu1 %1681  ;;  %v1192_v22 = vsel %vm1186_vm6, %v1163_v39, %v6596_v44  ;;  %v6962_v44 = vor.u32 %v1482_v0, %v899_v12  ;;  %9399 = vst [vmem:[#allocation88_spill] sm:$0xff] %v6984_v19 }
 0x1d3   :  { %v1221_v5 = vsel %vm1215_vm7, %v1192_v22, %v6559_v32  ;;  %v9400_v22 = vld [vmem:[#allocation53_spill] sm:$0xff] }
 0x1d4   :  { %1639 = vrot.lane.b32.xlu0 %v6856_v52, %s9390_s2  ;;  %v1250_v25 = vsel %vm1244_vm8, %v1221_v5, %v6671_v59  ;;  %v904_v5 = vrot.slane %v902_v38, 2 }
 0x1d5   :  { %794 = vrot.lane.b32.xlu2 %v9371_v58, %s9394_s3  ;;  %v1279_v58 = vsel %vm1273_vm9, %v1250_v25, %v6624_v14  ;;  %v9402_v25 = vld [vmem:[#allocation12_spill] sm:$0xff] }
 0x1d6   :  { %v6948_v16 = vpop.permute.xlu0 %622  ;;  %v1308_v13 = vsel %vm1302_vm10, %v1279_v58, %v6771_v4  ;;  %v748_v58 = vrot.slane %v9402_v25, 2 }
 0x1d7   :  { %9395 = vst [vmem:[#allocation33_spill] sm:$0xff] %v6948_v16  ;;  %v6950_v36 = vpop.permute.xlu2 %648  ;;  %v1337_v59 = vsel %vm1331_vm11, %v1308_v13, %v6811_v11  ;;  %v9404_v13 = vld [vmem:[#allocation41_spill] sm:$0xff] }
 0x1d8   :  { %652 = vrot.lane.b32.xlu1 %v632_v24, %s9332_s1 }
 0x1da   :  { %v6958_v41 = vpop.permute.xlu1 %698 }
 0x1db   :  { %9396 = vst [vmem:[#allocation86_spill] sm:$0xff] %v6958_v41 }
 0x1dc   :  { %1685 = vrot.lane.b32.xlu0 %v6819_v2, %s9332_s1  ;;  %v1366_v2 = vsel %vm1360_vm12, %v1337_v59, %v6773_v21 }
 0x1dd   :  { %702 = vrot.lane.b32.xlu2 %v6852_v61, %s9335_s29  ;;  %v1395_v4 = vsel %vm1389_vm13, %v1366_v2, %v6795_v7  ;;  %v901_v7 = vrot.slane %v899_v12, 1  ;;  %v9405_v2 = vld [vmem:[#allocation54_spill] sm:$0xff] }
 0x1de   :  { %v6970_v32 = vpop.permute.xlu0 %646  ;;  %v1424_v11 = vsel %vm1418_vm14, %v1395_v4, %v6869_v20 }
 0x1df   :  { %v6974_v31 = vpop.permute.xlu2 %868 }
 0x1e0   :  { %1687 = vrot.lane.b32.xlu1 %v6962_v44, %s9332_s1 }
 0x1e2   :  { %v6980_v14 = vpop.permute.xlu1 %742 }
 0x1e3   :  { %9397 = vst [vmem:[#allocation87_spill] sm:$0xff] %v6980_v14 }
 0x1e4   :  { %836 = vrot.lane.b32.xlu0 %v632_v24, %s9398_s5  ;;  %v9401_v24 = vld [vmem:[#allocation13_spill] sm:$0xff] }
 0x1e5   :  { %746 = vrot.lane.b32.xlu2 %v6873_v48, %s9336_s23  ;;  %v1738_v0 = vsel %vm998_vm0, %v9401_v24, %v9400_v22  ;;  %v9409_v22 = vld [vmem:[#allocation56_spill] sm:$0xff]  ;;  %v9418_v48 = vld [vmem:[#allocation43_spill] sm:$0xff] }
 0x1e6   :  { %v2004_v53 = vpop.permute.xlu0 %2003  ;;  %v1766_v59 = vsel %vm1041_vm1, %v1738_v0, %v9404_v13  ;;  %v1741_v61 = vsel %vm998_vm0, %v9419_v46, %v9418_v48 }
 0x1e7   :  { %v6992_v39 = vpop.permute.xlu2 %792  ;;  %v6995_v21 = vsel %vm9202_vm15, %v1424_v11, %v2004_v53  ;;  %v1786_v4 = vsel %vm1070_vm2, %v1766_v59, %v9405_v2  ;;  %v9407_v11 = vld [vmem:[#allocation15_spill] sm:$0xff]  ;;  %v7012_v53 = vor.u32 %v904_v5, %v901_v7  ;;  %vm9412_vm15 = vcmask 195584  }
 0x1e8   :  { %2298 = vst [vmem:[#allocation1 + $0x7] ss:$9 sm:$0xff] %v6995_v21  ;;  %1701 = vrot.lane.b32.xlu1 %v6984_v19, %s9335_s29  ;;  %v1810_v24 = vsel %vm1099_vm3, %v1786_v4, %v9409_v22  ;;  %v2076_v12 = vrot.slane %v6995_v21, 1  ;;  %v2077_v25 = vrot.slane %v6995_v21, 2  ;;  %v9411_v7 = vld [vmem:[#allocation47_spill] sm:$0xff]  ;;  %v9413_v22 = vld [vmem:[#allocation14_spill] sm:$0xff] }
 0x1e9   :  { %9408 = vst [vmem:[#allocation13_spill] sm:$0xff] %v7012_v53  ;;  %v1834_v38 = vsel %vm1128_vm4, %v1810_v24, %v6306_v56  ;;  %v92_v56 = vld [vmem:[%s9255_s26 + $0xb0] sm:$0xff]  ;;  %v110_v4 = vld [vmem:[%s9255_s26 + $0x140] sm:$0xff]  ;;  %v9414_v24 = vshll.u32 %v9413_v22, 16  ;;  %v9423_v48 = vshrl.u32 %v9413_v22, 16 }
 0x1ea   :  { %v7004_v20 = vpop.permute.xlu1 %700  ;;  %v1858_v5 = vsel %vm9412_vm15, %v1834_v38, %v9411_v7  ;;  %v7047_v7 = vpack.c.bf16 %v92_v56, %v92_v56  ;;  %v7053_v18 = vpack.c.bf16 %v110_v4, %v110_v4  ;;  %v9422_v56 = vld [vmem:[#allocation61_spill] sm:$0xff]  ;;  %v9424_v4 = vld [vmem:[#allocation64_spill] sm:$0xff] }
 0x1eb   :  { %9403 = vst [vmem:[#allocation53_spill] sm:$0xff] %v7004_v20  ;;  %v1768_v54 = vsel %vm1041_vm1, %v1741_v61, %v9422_v56  ;;  %v9426_v61 = vld [vmem:[#allocation67_spill] sm:$0xff] }
 0x1ec   :  { %872 = vrot.lane.b32.xlu0 %v9407_v11, %s9406_s30  ;;  %v111_v11 = vld [vmem:[%s9255_s26 + $0x148] sm:$0x7]  ;;  %9417 = vst [vmem:[#allocation41_spill] sm:$0xff] %v7047_v7  ;;  %v93_v20 = vld [vmem:[%s9255_s26 + $0xb8] sm:$0x7] }
 0x1ed   :  { %762 = vrot.lane.b32.xlu2 %v748_v58, %s9344_s24  ;;  %9420 = vst [vmem:[#allocation54_spill] sm:$0xff] %v7053_v18  ;;  %v155_v52 = vpack.c.bf16 %v111_v11, %v111_v11  ;;  %v137_v34 = vpack.c.bf16 %v93_v20, %v93_v20 }
 0x1ee   :  { %v7020_v0 = vpop.permute.xlu0 %744 }
 0x1ef   :  { %9410 = vst [vmem:[#allocation12_spill] sm:$0xff] %v7020_v0  ;;  %v2299_v13 = vld [vmem:[#allocation1] sm:$0xff]  ;;  %v7023_v59 = vpop.permute.xlu2 %976 }
 0x1f0   :  { %2301 = vst [vmem:[#allocation1] ss:$9 sm:$0xff] %v2076_v12  ;;  %1719 = vrot.lane.b32.xlu1 %v7012_v53, %s9336_s23  ;;  %5220 = vmatmul.msk.bf16.vlgmr.msra.gmra.mxu0 %vm9217_vm5, %v2299_v13  ;;  %v817_v12 = vrot.slane %v9414_v24, 1  ;;  %v9415_v13 = vld [vmem:[#allocation52_spill] sm:$0xff]  ;;  %v1010_v24 = vsel %vm998_vm0, %v5817_v6, %v6748_v57  ;;  %v1788_v6 = vsel %vm1070_vm2, %v1768_v54, %v9424_v4  ;;  %v9425_v57 = vld [vmem:[#allocation19_spill] sm:$0xff]  ;;  %vm9433_vm5 = vmmov %vm9412_vm15 }
 0x1f1   :  { %2303 = vst [vmem:[#allocation1 + $0x1] ss:$9 sm:$0xff] %v2077_v25  ;;  %v1882_v38 = vsel %vm1186_vm6, %v1858_v5, %v9415_v13  ;;  %v9416_v25 = vld [vmem:[#allocation16_spill] sm:$0xff]  ;;  %v9421_v5 = vld [vmem:[#allocation55_spill] sm:$0xff]  ;;  %v1049_v11 = vsel %vm1041_vm1, %v1010_v24, %v9425_v57  ;;  %v1812_v56 = vsel %vm1099_vm3, %v1788_v6, %v9426_v61 }
 0x1f2   :  { %v7033_v2 = vpop.permute.xlu1 %756  ;;  %v1902_v13 = vsel %vm1215_vm7, %v1882_v38, %v9421_v5  ;;  %v818_v46 = vor.u32 %v817_v12, %v9423_v48  ;;  %v7074_v38 = vunpack.c.l.b16 %v7053_v18  ;;  %v1450_v5 = vunpack.c.l.b16 %v155_v52  ;;  %v9427_v0 = vld [vmem:[#allocation28_spill] sm:$0xff]  ;;  %v9431_v61 = vld [vmem:[#allocation31_spill] sm:$0xff] }
 0x1f3   :  { %v1947_v29 = vshll.u32 %v1902_v13, 16  ;;  %v1078_v12 = vsel %vm1070_vm2, %v1049_v11, %v9427_v0  ;;  %v9429_v4 = vld [vmem:[#allocation20_spill] sm:$0xff]  ;;  %v9430_v11 = vld [vmem:[#allocation63_spill] sm:$0xff] }
 0x1f4   :  { %916 = vrot.lane.b32.xlu0 %v9416_v25, %s9348_s0  ;;  %v1107_v24 = vsel %vm1099_vm3, %v1078_v12, %v6895_v27  ;;  %v7088_v52 = vpack.c.b16 %v1450_v5, %v7074_v38  ;;  %v94_v0 = vld [vmem:[%s9255_s26 + $0xc0] sm:$0xff]  ;;  %v1945_v5 = vshrl.u32 %v1902_v13, 16  ;;  %v9434_v12 = vld [vmem:[#allocation17_spill] sm:$0xff] }
 0x1f5   :  { %946 = vrot.lane.b32.xlu2 %v748_v58, %s9372_s25  ;;  %v179_v58 = vunpack.c.l.b16 %v7047_v7  ;;  %v9428_v7 = vld [vmem:[#allocation59_spill] sm:$0xff]  ;;  %v1949_v57 = vrot.slane %v1947_v29, 1  ;;  %v1136_v27 = vsel %vm1128_vm4, %v1107_v24, %v9431_v61  ;;  %v9436_v61 = vld [vmem:[#allocation65_spill] sm:$0xff] }
 0x1f6   :  { %v791_v49 = vpop.permute.xlu0 %790  ;;  %v1836_v54 = vsel %vm1128_vm4, %v1812_v56, %v9428_v7  ;;  %v1165_v29 = vsel %vm9433_vm5, %v1136_v27, %v6970_v32  ;;  %v9437_v13 = vld [vmem:[#allocation5_spill] sm:$0xff] }
 0x1f7   :  { %v7060_v25 = vpop.permute.xlu2 %308  ;;  %v193_v48 = vpack.c.b16 %v179_v58, %v179_v58  ;;  %v1860_v7 = vsel %vm9412_vm15, %v1836_v54, %v9430_v11  ;;  %v7110_v54 = vpack.c.bf16 %v94_v0, %v94_v0  ;;  %v1950_v24 = vor.u32 %v1949_v57, %v1945_v5  ;;  %v9438_v32 = vld [vmem:[#allocation29_spill] sm:$0xff] }
 0x1f8   :  { %796 = vrot.lane.b32.xlu1 %v9413_v22, %s9394_s3  ;;  %v1013_v14 = vsel %vm998_vm0, %v9437_v13, %v6836_v17  ;;  %v1194_v27 = vsel %vm1186_vm6, %v1165_v29, %v9438_v32  ;;  %v9440_v57 = vshll.u32 %v7088_v52, 16  ;;  %v9441_v17 = vld [vmem:[#allocation70_spill] sm:$0xff]  ;;  %v9442_v29 = vld [vmem:[#allocation23_spill] sm:$0xff]  ;;  %v9444_v32 = vld [vmem:[#allocation21_spill] sm:$0xff]  ;;  %v347_v0 = vunpack.c.l.b16 %v137_v34 }
 0x1f9   :  { %v252_v56 = vshll.u32 %v193_v48, 16  ;;  %9435 = vst [vmem:[#allocation15_spill] sm:$0xff] %v7110_v54  ;;  %vm9452_vm15 = vcmask 523264  }
 0x1fa   :  { %v833_v43 = vpop.permute.xlu1 %832  ;;  %v1489_v5 = vrot.slane %v9440_v57, 1 }
 0x1fb   :  { %v254_v18 = vrot.slane %v252_v56, 1 }
 0x1fc   :  { %838 = vrot.lane.b32.xlu0 %v818_v46, %s9398_s5 }
 0x1fd   :  { %874 = vrot.lane.b32.xlu2 %v9429_v4, %s9406_s30  ;;  %v934_v4 = vrot.slane %v9434_v12, 2  ;;  %v250_v12 = vshrl.u32 %v193_v48, 16  ;;  %v9443_v48 = vld [vmem:[#allocation34_spill] sm:$0xff] }
 0x1fe   :  { %v7090_v6 = vpop.permute.xlu0 %758  ;;  %v1223_v20 = vsel %vm1215_vm7, %v1194_v27, %v9443_v48 }
 0x1ff   :  { %v7095_v46 = vpop.permute.xlu2 %978  ;;  %v255_v57 = vor.u32 %v254_v18, %v250_v12 }
 0x200   :  { %980 = vrot.lane.b32.xlu1 %v9413_v22, %s9432_s19  ;;  %v1884_v22 = vsel %vm1186_vm6, %v1860_v7, %v9436_v61  ;;  %v7125_v7 = vunpack.c.l.b16 %v7110_v54 }
 0x201   :  { %v1904_v13 = vsel %vm1215_vm7, %v1884_v22, %v9441_v17  ;;  %v9445_v22 = vshrl.u32 %v7088_v52, 16 }
 0x202   :  { %v913_v11 = vpop.permute.xlu1 %912  ;;  %v1953_v27 = vshll.u32 %v1904_v13, 16 }
 0x203   :  { %v7142_v17 = vor.u32 %v1489_v5, %v9445_v22 }
 0x204   :  { %2009 = vrot.lane.b32.xlu0 %v1950_v24, %s9439_s28  ;;  %v1051_v24 = vsel %vm1041_vm1, %v1013_v14, %v9442_v29  ;;  %v7146_v14 = vpack.c.b16 %v7125_v7, %v7125_v7  ;;  %v9446_v29 = vld [vmem:[#allocation25_spill] sm:$0xff]  ;;  %v1955_v5 = vrot.slane %v1953_v27, 1 }
 0x205   :  { %948 = vrot.lane.b32.xlu2 %v934_v4, %s9372_s25  ;;  %v1252_v4 = vsel %vm1244_vm8, %v1223_v20, %v7033_v2  ;;  %v1080_v48 = vsel %vm1070_vm2, %v1051_v24, %v9446_v29  ;;  %v9448_v24 = vld [vmem:[#allocation30_spill] sm:$0xff] }
 0x206   :  { %v943_v61 = vpop.permute.xlu0 %942  ;;  %v1281_v54 = vsel %vm1273_vm9, %v1252_v4, %v791_v49  ;;  %v1109_v18 = vsel %vm1099_vm3, %v1080_v48, %v6916_v42  ;;  %v7156_v49 = vpack.c.b16 %v347_v0, %v179_v58  ;;  %v259_v12 = vshll.u32 %v7146_v14, 16  ;;  %v9451_v48 = vld [vmem:[#allocation24_spill] sm:$0xff] }
 0x207   :  { %v7133_v56 = vpop.permute.xlu2 %310  ;;  %v1310_v2 = vsel %vm1302_vm10, %v1281_v54, %v833_v43  ;;  %v1138_v43 = vsel %vm1128_vm4, %v1109_v18, %v9448_v24  ;;  %v257_v22 = vshrl.u32 %v7146_v14, 16 }
 0x208   :  { %918 = vrot.lane.b32.xlu1 %v9444_v32, %s9348_s0  ;;  %v1339_v34 = vsel %vm1331_vm11, %v1310_v2, %v6974_v31  ;;  %v1167_v42 = vsel %vm9433_vm5, %v1138_v43, %v6950_v36  ;;  %v1951_v31 = vshrl.u32 %v1904_v13, 16  ;;  %v9450_v32 = vld [vmem:[#allocation22_spill] sm:$0xff]  ;;  %v261_v27 = vrot.slane %v259_v12, 1  ;;  %vm9459_vm5 = vmmov %vm9452_vm15 }
 0x209   :  { %v1368_v54 = vsel %vm1360_vm12, %v1339_v34, %v913_v11  ;;  %v1196_v11 = vsel %vm1186_vm6, %v1167_v42, %v9451_v48  ;;  %v2078_v13 = vrot.slane %v6995_v21, 3  ;;  %v467_v34 = vshrl.u32 %v7156_v49, 16  ;;  %v9453_v42 = vld [vmem:[#allocation27_spill] sm:$0xff] }
 0x20a   :  { %v7151_v20 = vpop.permute.xlu1 %834  ;;  %v1397_v58 = vsel %vm1389_vm13, %v1368_v54, %v943_v61  ;;  %v1956_v29 = vor.u32 %v1955_v5, %v1951_v31  ;;  %v96_v61 = vld [vmem:[%s9255_s26 + $0xd0] sm:$0xff]  ;;  %v470_v12 = vshll.u32 %v7156_v49, 16  ;;  %v1225_v21 = vsel %vm1215_vm7, %v1196_v11, %v9453_v42 }
 0x20b   :  { %v1426_v36 = vsel %vm1418_vm14, %v1397_v58, %v7023_v59  ;;  %v95_v59 = vld [vmem:[%s9255_s26 + $0xc8] sm:$0x7]  ;;  %v7194_v31 = vor.u32 %v261_v27, %v257_v22  ;;  %v1254_v41 = vsel %vm1244_vm8, %v1225_v21, %v7090_v6  ;;  %v9456_v42 = vrot.slane %v7088_v52, 1 }
 0x20c   :  { %312 = vrot.lane.b32.xlu0 %v255_v57, %s9447_s16  ;;  %v375_v57 = vrot.slane %v7156_v49, 1  ;;  %v472_v22 = vrot.slane %v470_v12, 2  ;;  %v139_v27 = vpack.c.bf16 %v95_v59, %v95_v59  ;;  %v1283_v6 = vsel %vm1273_vm9, %v1254_v41, %v6992_v39 }
 0x20d   :  { %1517 = vrot.lane.b32.xlu2 %v7142_v17, %s9447_s16  ;;  %v9457_v12 = vshrl.u32 %v7088_v52, 16  ;;  %v9458_v59 = vshll.u32 %v7088_v52, 16 }
 0x20e   :  { %v871_v4 = vpop.permute.xlu0 %870 }
 0x20f   :  { %v7169_v0 = vpop.permute.xlu2 %408  ;;  %v1537_v21 = vrot.slane %v9458_v59, 2 }
 0x210   :  { %9449 = vst [vmem:[#allocation56_spill] sm:$0xff] %v7169_v0  ;;  %982 = vrot.lane.b32.xlu1 %v9450_v32, %s9432_s19  ;;  %v7196_v32 = vpack.c.bf16 %v96_v61, %v96_v61 }
 0x212   :  { %v2006_v2 = vpop.permute.xlu1 %2005  ;;  %9454 = vst [vmem:[#allocation47_spill] sm:$0xff] %v7196_v32 }
 0x213   :  { %v2035_v18 = vsel %vm9452_vm15, %v1426_v36, %v2006_v2  ;;  %vm9460_vm15 = vcmask 818176  }
 0x214   :  { %v2079_v5 = vrot.slane %v2035_v18, 1  ;;  %v2080_v24 = vrot.slane %v2035_v18, 2  ;;  %v2134_v43 = vunpack.i.h.s16 %v2035_v18  ;;  %396 = vrot.lane.b32.xlu0 %v375_v57, %s9378_s22  ;;  %v5172_v58 = vpack.i.b16 %v2035_v18, %v2078_v13  ;;  %v112_v57 = vld [vmem:[%s9255_s26 + $0x150] sm:$0xff] }
 0x215   :  { %2011 = vrot.lane.b32.xlu2 %v1956_v29, %s9439_s28  ;;  %v2081_v48 = vrot.slane %v2035_v18, 3  ;;  %v469_v29 = vrot.slane %v467_v34, 1  ;;  %v156_v18 = vpack.c.bf16 %v112_v57, %v112_v57 }
 0x216   :  { %v2136_v2 = vunpack.i.h.s16 %v2079_v5  ;;  %v2138_v36 = vunpack.i.h.s16 %v2080_v24  ;;  %v5173_v54 = vpack.i.b16 %v2079_v5, %v2134_v43  ;;  %v915_v0 = vpop.permute.xlu0 %914  ;;  %2305 = vst [vmem:[#allocation1 + $0x2] ss:$9 sm:$0xff] %v5172_v58  ;;  %v7209_v5 = vunpack.c.l.b16 %v7196_v32 }
 0x217   :  { %v7203_v11 = vpop.permute.xlu2 %548  ;;  %v473_v34 = vor.u32 %v472_v22, %v469_v29  ;;  %v348_v58 = vunpack.c.l.b16 %v139_v27  ;;  %v1554_v57 = vunpack.c.l.b16 %v156_v18  ;;  %v557_v22 = vrot.slane %v7156_v49, 2 }
 0x218   :  { %9455 = vst [vmem:[#allocation14_spill] sm:$0xff] %v7203_v11  ;;  %v5174_v61 = vpack.i.b16 %v2080_v24, %v2136_v2  ;;  %v5175_v13 = vpack.i.b16 %v2081_v48, %v2138_v36  ;;  %1531 = vrot.lane.b32.xlu1 %v9456_v42, %s9378_s22  ;;  %v1536_v24 = vrot.slane %v9457_v12, 1  ;;  %v7226_v41 = vpack.c.b16 %v7209_v5, %v7209_v5 }
 0x219   :  { %2307 = vst [vmem:[#allocation1 + $0x3] ss:$9 sm:$0xff] %v5173_v54  ;;  %v1312_v54 = vsel %vm1302_vm10, %v1283_v6, %v7151_v20 }
 0x21a   :  { %2309 = vst [vmem:[#allocation1 + $0x4] ss:$9 sm:$0xff] %v5174_v61  ;;  %v945_v43 = vpop.permute.xlu1 %944  ;;  %v1341_v48 = vsel %vm1331_vm11, %v1312_v54, %v871_v4  ;;  %v7235_v29 = vor.u32 %v1537_v21, %v1536_v24  ;;  %v7238_v4 = vpack.c.b16 %v348_v58, %v7125_v7  ;;  %v266_v27 = vshll.u32 %v7226_v41, 16  ;;  %v113_v58 = vld [vmem:[%s9255_s26 + $0x158] sm:$0x7] }
 0x21b   :  { %2311 = vst [vmem:[#allocation1 + $0x5] ss:$9 sm:$0xff] %v5175_v13  ;;  %v1370_v39 = vsel %vm1360_vm12, %v1341_v48, %v915_v0  ;;  %v264_v49 = vshrl.u32 %v7226_v41, 16 }
 0x21c   :  { %314 = vrot.lane.b32.xlu0 %v7194_v31, %s9447_s16  ;;  %v1399_v2 = vsel %vm1389_vm13, %v1370_v39, %v945_v43  ;;  %v9225_v7 = vrot.slane %v7238_v4, 1  ;;  %v268_v43 = vrot.slane %v266_v27, 1  ;;  %v475_v24 = vshrl.u32 %v7238_v4, 16 }
 0x21d   :  { %1515 = vrot.lane.b32.xlu2 %v6962_v44, %s9447_s16  ;;  %v1556_v44 = vpack.c.b16 %v1554_v57, %v1554_v57  ;;  %v1428_v0 = vsel %vm1418_vm14, %v1399_v2, %v7095_v46  ;;  %v478_v54 = vshll.u32 %v7238_v4, 16 }
 0x21e   :  { %v7229_v20 = vpop.permute.xlu0 %574  ;;  %v7263_v59 = vor.u32 %v268_v43, %v264_v49  ;;  %v477_v2 = vrot.slane %v475_v24, 1 }
 0x21f   :  { %v7232_v36 = vpop.permute.xlu2 %1625  ;;  %v1599_v18 = vshrl.u32 %v1556_v44, 16  ;;  %v1602_v12 = vshll.u32 %v1556_v44, 16 }
 0x220   :  { %536 = vrot.lane.b32.xlu1 %v473_v34, %s9382_s27 }
 0x221   :  { %v1601_v34 = vrot.slane %v1599_v18, 7 }
 0x222   :  { %v2008_v61 = vpop.permute.xlu1 %2007 }
 0x223   :  { %v7245_v13 = vsel %vm9459_vm5, %v1428_v0, %v2008_v61  ;;  %v1604_v39 = vor.u32 %v1602_v12, %v1601_v34  ;;  %v97_v61 = vld [vmem:[%s9255_s26 + $0xd8] sm:$0x7]  ;;  %v157_v0 = vpack.c.bf16 %v113_v58, %v113_v58  ;;  %vm9471_vm5 = vcmask 195584  }
 0x224   :  { %v2082_v42 = vrot.slane %v7245_v13, 1  ;;  %2313 = vst [vmem:[#allocation1 + $0x6] ss:$9 sm:$0xff] %v7245_v13  ;;  %1549 = vrot.lane.b32.xlu0 %v7235_v29, %s9382_s27  ;;  %v2083_v48 = vrot.slane %v7245_v13, 2  ;;  %v141_v43 = vpack.c.bf16 %v97_v61, %v97_v61 }
 0x225   :  { %578 = vrot.lane.b32.xlu2 %v557_v22, %s9325_s4  ;;  %v480_v22 = vrot.slane %v478_v54, 2  ;;  %v1648_v34 = vunpack.c.l.b16 %v157_v0 }
 0x226   :  { %2315 = vst [vmem:[#allocation1 + $0x7] ss:$9 sm:$0xff] %v2082_v42  ;;  %v7254_v46 = vpop.permute.xlu0 %1511  ;;  %v349_v24 = vunpack.c.l.b16 %v141_v43 }
 0x227   :  { %v7256_v6 = vpop.permute.xlu2 %760  ;;  %v7284_v49 = vor.u32 %v480_v22, %v477_v2  ;;  %v1650_v54 = vpack.c.b16 %v1648_v34, %v1554_v57  ;;  %v7301_v2 = vpack.c.b16 %v7074_v38, %v7074_v38  ;;  %v9228_v22 = vrot.slane %v7238_v4, 2 }
 0x228   :  { %398 = vrot.lane.b32.xlu1 %v9225_v7, %s9378_s22 }
 0x229   :  { %9464 = vst [vmem:[#allocation18_spill] sm:$0xff] %v7301_v2  ;;  %v1592_v0 = vshrl.u32 %v7301_v2, 16 }
 0x22a   :  { %v7265_v21 = vpop.permute.xlu1 %1513 }
 0x22b   :  { %v1594_v34 = vrot.slane %v1592_v0, 7 }
 0x22c   :  { %1529 = vrot.lane.b32.xlu0 %v6984_v19, %s9378_s22 }
 0x22d   :  { %v2316_v27 = vld [vmem:[#allocation1] sm:$0xff]  ;;  %316 = vrot.lane.b32.xlu2 %v7263_v59, %s9447_s16 }
 0x22e   :  { %2318 = vst [vmem:[#allocation1] ss:$9 sm:$0xff] %v2083_v48  ;;  %5221 = vmatmul.msk.bf16.gmra.mxu0 %vm9460_vm15, %v2316_v27  ;;  %v7279_v42 = vpop.permute.xlu0 %650  ;;  %v1661_v27 = vshll.u32 %v1650_v54, 16  ;;  %vm9475_vm15 = vmmov %vm9471_vm5 }
 0x22f   :  { %v7281_v18 = vpop.permute.xlu2 %794 }
 0x230   :  { %1631 = vrot.lane.b32.xlu1 %v1604_v39, %s9325_s4  ;;  %v363_v39 = vpack.c.b16 %v349_v24, %v7209_v5  ;;  %v1663_v5 = vrot.slane %v1661_v27, 1 }
 0x232   :  { %v7286_v12 = vpop.permute.xlu1 %1527  ;;  %v7307_v57 = vrot.slane %v363_v39, 1  ;;  %v483_v24 = vshrl.u32 %v363_v39, 16  ;;  %v486_v7 = vshll.u32 %v363_v39, 16 }
 0x233   :  { %9461 = vst [vmem:[#allocation52_spill] sm:$0xff] %v7286_v12 }
 0x234   :  { %538 = vrot.lane.b32.xlu0 %v7284_v49, %s9382_s27  ;;  %v485_v19 = vrot.slane %v483_v24, 1 }
 0x235   :  { %1547 = vrot.lane.b32.xlu2 %v7012_v53, %s9382_s27 }
 0x236   :  { %v7292_v58 = vpop.permute.xlu0 %1545 }
 0x237   :  { %9462 = vst [vmem:[#allocation16_spill] sm:$0xff] %v7292_v58  ;;  %v7294_v48 = vpop.permute.xlu2 %702  ;;  %v488_v58 = vrot.slane %v486_v7, 2 }
 0x238   :  { %9463 = vst [vmem:[#allocation43_spill] sm:$0xff] %v7294_v48  ;;  %612 = vrot.lane.b32.xlu1 %v7146_v14, %s9390_s2  ;;  %v1659_v14 = vshrl.u32 %v1650_v54, 16 }
 0x239   :  { %v7330_v0 = vor.u32 %v488_v58, %v485_v19  ;;  %v1694_v19 = vrot.slane %v1650_v54, 1 }
 0x23a   :  { %v7304_v61 = vpop.permute.xlu1 %576  ;;  %v1664_v32 = vor.u32 %v1663_v5, %v1659_v14  ;;  %v1710_v54 = vrot.slane %v1659_v14, 1 }
 0x23c   :  { %1643 = vrot.lane.b32.xlu0 %v1556_v44, %s9390_s2  ;;  %v1595_v44 = vshll.u32 %v7301_v2, 16 }
 0x23d   :  { %580 = vrot.lane.b32.xlu2 %v9228_v22, %s9325_s4 }
 0x23e   :  { %v7313_v43 = vpop.permute.xlu0 %1627  ;;  %v1597_v22 = vor.u32 %v1595_v44, %v1594_v34  ;;  %v1016_v44 = vsel %vm998_vm0, %v5822_v9, %v7060_v25 }
 0x23f   :  { %9465 = vst [vmem:[#allocation55_spill] sm:$0xff] %v7313_v43  ;;  %v7315_v38 = vpop.permute.xlu2 %746  ;;  %v1053_v24 = vsel %vm1041_vm1, %v1016_v44, %v6130_v23 }
 0x240   :  { %9466 = vst [vmem:[#allocation61_spill] sm:$0xff] %v7315_v38  ;;  %400 = vrot.lane.b32.xlu1 %v7307_v57, %s9378_s22  ;;  %v1082_v9 = vsel %vm1070_vm2, %v1053_v24, %v6145_v40  ;;  %v9472_v24 = vld [vmem:[#allocation37_spill] sm:$0xff]  ;;  %s9648_s22 = sld [smem:[#allocation95_spill]] }
 0x242   :  { %v7320_v53 = vpop.permute.xlu1 %624 }
 0x243   :  { %9467 = vst [vmem:[#allocation64_spill] sm:$0xff] %v7320_v53 }
 0x244   :  { %654 = vrot.lane.b32.xlu0 %v7194_v31, %s9332_s1  ;;  %v9468_v31 = vrot.slane %v7238_v4, 1 }
 0x245   :  { %1691 = vrot.lane.b32.xlu2 %v1664_v32, %s9332_s1  ;;  %v7341_v32 = vrot.slane %v363_v39, 2 }
 0x246   :  { %v7325_v38 = vpop.permute.xlu0 %1639 }
 0x247   :  { %v7327_v43 = vpop.permute.xlu2 %762 }
 0x248   :  { %1629 = vrot.lane.b32.xlu1 %v1597_v22, %s9325_s4 }
 0x24a   :  { %v653_v12 = vpop.permute.xlu1 %652 }
 0x24c   :  { %540 = vrot.lane.b32.xlu0 %v7330_v0, %s9382_s27 }
 0x24d   :  { %690 = vrot.lane.b32.xlu2 %v9468_v31, %s9335_s29  ;;  %v1711_v31 = vrot.slane %v1661_v27, 2 }
 0x24e   :  { %v7337_v5 = vpop.permute.xlu0 %1685 }
 0x24f   :  { %v947_v7 = vpop.permute.xlu2 %946  ;;  %v1712_v27 = vor.u32 %v1711_v31, %v1710_v54 }
 0x250   :  { %614 = vrot.lane.b32.xlu1 %v7226_v41, %s9390_s2 }
 0x252   :  { %v7343_v34 = vpop.permute.xlu1 %1687 }
 0x253   :  { %9469 = vst [vmem:[#allocation19_spill] sm:$0xff] %v7343_v34 }
 0x254   :  { %1641 = vrot.lane.b32.xlu0 %v7301_v2, %s9390_s2  ;;  %v9470_v2 = vld [vmem:[#allocation48_spill] sm:$0xff] }
 0x255   :  { %582 = vrot.lane.b32.xlu2 %v7341_v32, %s9325_s4  ;;  %v7365_v34 = vpack.c.b16 %v9470_v2, %v9470_v2 }
 0x256   :  { %v837_v58 = vpop.permute.xlu0 %836 }
 0x257   :  { %v7349_v22 = vpop.permute.xlu2 %874  ;;  %v273_v14 = vshll.u32 %v7365_v34, 16 }
 0x258   :  { %1705 = vrot.lane.b32.xlu1 %v1694_v19, %s9335_s29  ;;  %v1111_v19 = vsel %vm1099_vm3, %v1082_v9, %v7229_v20  ;;  %v1019_v20 = vsel %vm998_vm0, %v5896_v55, %v7133_v56  ;;  %v9473_v9 = vld [vmem:[#allocation32_spill] sm:$0xff] }
 0x259   :  { %v275_v44 = vrot.slane %v273_v14, 1 }
 0x25a   :  { %v7355_v39 = vpop.permute.xlu1 %1701 }
 0x25c   :  { %656 = vrot.lane.b32.xlu0 %v7263_v59, %s9332_s1 }
 0x25d   :  { %1689 = vrot.lane.b32.xlu2 %v7142_v17, %s9332_s1  ;;  %v1140_v17 = vsel %vm1128_vm4, %v1111_v19, %v6112_v8 }
 0x25e   :  { %v873_v25 = vpop.permute.xlu0 %872  ;;  %v1169_v40 = vsel %vm9471_vm5, %v1140_v17, %v7279_v42  ;;  %v1055_v42 = vsel %vm1041_vm1, %v1019_v20, %v6190_v30  ;;  %v9474_v30 = vrot.slane %v7238_v4, 2  ;;  %vm9477_vm5 = vcmask 523264  }
 0x25f   :  { %v7371_v23 = vpop.permute.xlu2 %948  ;;  %v1198_v8 = vsel %vm1186_vm6, %v1169_v40, %v9472_v24 }
 0x260   :  { %734 = vrot.lane.b32.xlu1 %v7284_v49, %s9336_s23  ;;  %v271_v49 = vshrl.u32 %v7365_v34, 16  ;;  %v1227_v55 = vsel %vm1215_vm7, %v1198_v8, %v9473_v9 }
 0x261   :  { %v1256_v17 = vsel %vm1244_vm8, %v1227_v55, %v7256_v6  ;;  %v9476_v6 = vrot.slane %v7088_v52, 1 }
 0x262   :  { %v7378_v2 = vpop.permute.xlu1 %1719  ;;  %v7399_v56 = vor.u32 %v275_v44, %v271_v49 }
 0x264   :  { %1723 = vrot.lane.b32.xlu0 %v1712_v27, %s9336_s23  ;;  %v1084_v27 = vsel %vm1070_vm2, %v1055_v42, %v6140_v28  ;;  %v1285_v28 = vsel %vm1273_vm9, %v1256_v17, %v7281_v18 }
 0x265   :  { %692 = vrot.lane.b32.xlu2 %v7307_v57, %s9335_s29  ;;  %v1113_v14 = vsel %vm1099_vm3, %v1084_v27, %v7304_v61  ;;  %v1314_v44 = vsel %vm1302_vm10, %v1285_v28, %v837_v58 }
 0x266   :  { %v917_v54 = vpop.permute.xlu0 %916  ;;  %v1142_v20 = vsel %vm1128_vm4, %v1113_v14, %v6204_v10  ;;  %v1343_v4 = vsel %vm1331_vm11, %v1314_v44, %v873_v25  ;;  %v2084_v25 = vrot.slane %v7245_v13, 3 }
 0x267   :  { %v7391_v31 = vpop.permute.xlu2 %1517  ;;  %v1171_v61 = vsel %vm9475_vm15, %v1142_v20, %v653_v12  ;;  %v1372_v24 = vsel %vm1360_vm12, %v1343_v4, %v917_v54  ;;  %v9478_v20 = vld [vmem:[#allocation57_spill] sm:$0xff]  ;;  %vm9479_vm15 = vmmov %vm9477_vm5 }
 0x268   :  { %616 = vrot.lane.b32.xlu1 %v7365_v34, %s9390_s2  ;;  %v1200_v10 = vsel %vm1186_vm6, %v1171_v61, %v9351_v37  ;;  %v1401_v18 = vsel %vm1389_vm13, %v1372_v24, %v947_v7  ;;  %v9480_v24 = vld [vmem:[#allocation60_spill] sm:$0xff]  ;;  %s9649_s2 = sld [smem:[#allocation97_spill]] }
 0x269   :  { %v1229_v52 = vsel %vm1215_vm7, %v1200_v10, %v9353_v51 }
 0x26a   :  { %v797_v19 = vpop.permute.xlu1 %796  ;;  %v1258_v7 = vsel %vm1244_vm8, %v1229_v52, %v7327_v43 }
 0x26b   :  { %v1287_v51 = vsel %vm1273_vm9, %v1258_v7, %v797_v19 }
 0x26c   :  { %764 = vrot.lane.b32.xlu0 %v9474_v30, %s9344_s24 }
 0x26d   :  { %658 = vrot.lane.b32.xlu2 %v7399_v56, %s9332_s1 }
 0x26e   :  { %v839_v40 = vpop.permute.xlu0 %838 }
 0x26f   :  { %v2012_v49 = vpop.permute.xlu2 %2011  ;;  %v1316_v13 = vsel %vm1302_vm10, %v1287_v51, %v839_v40 }
 0x270   :  { %1703 = vrot.lane.b32.xlu1 %v9476_v6, %s9335_s29  ;;  %v1345_v61 = vsel %vm1331_vm11, %v1316_v13, %v7349_v22 }
 0x272   :  { %v981_v8 = vpop.permute.xlu1 %980 }
 0x273   :  { %v1430_v12 = vsel %vm1418_vm14, %v1401_v18, %v981_v8 }
 0x274   :  { %736 = vrot.lane.b32.xlu0 %v7330_v0, %s9336_s23 }
 0x275   :  { %1721 = vrot.lane.b32.xlu2 %v7235_v29, %s9336_s23 }
 0x276   :  { %v2010_v58 = vpop.permute.xlu0 %2009 }
 0x277   :  { %v7434_v54 = vpop.permute.xlu2 %1515  ;;  %v2039_v37 = vsel %vm9477_vm5, %v1430_v12, %v2010_v58  ;;  %v9482_v58 = vld [vmem:[#allocation45_spill] sm:$0xff]  ;;  %vm9483_vm5 = vcmask 818176  }
 0x278   :  { %v2085_v42 = vrot.slane %v2039_v37, 1  ;;  %798 = vrot.lane.b32.xlu1 %v7226_v41, %s9394_s3  ;;  %v2086_v29 = vrot.slane %v2039_v37, 2  ;;  %v2148_v9 = vunpack.i.h.s16 %v2039_v37  ;;  %v5176_v55 = vpack.i.b16 %v2039_v37, %v2084_v25 }
 0x279   :  { %v2087_v17 = vrot.slane %v2039_v37, 3  ;;  %v1743_v25 = vsel %vm998_vm0, %v9482_v58, %v6622_v1  ;;  %v9484_v1 = vld [vmem:[#allocation79_spill] sm:$0xff] }
 0x27a   :  { %v2150_v27 = vunpack.i.h.s16 %v2085_v42  ;;  %v919_v14 = vpop.permute.xlu1 %918  ;;  %2320 = vst [vmem:[#allocation1 + $0x1] ss:$9 sm:$0xff] %v5176_v55  ;;  %v2152_v30 = vunpack.i.h.s16 %v2086_v29  ;;  %v5177_v28 = vpack.i.b16 %v2085_v42, %v2148_v9  ;;  %v9485_v55 = vld [vmem:[#allocation66_spill] sm:$0xff] }
 0x27b   :  { %v1374_v40 = vsel %vm1360_vm12, %v1345_v61, %v919_v14  ;;  %v9486_v51 = vshll.u32 %v9485_v55, 16  ;;  %v9490_v61 = vld [vmem:[#allocation69_spill] sm:$0xff] }
 0x27c   :  { %694 = vrot.lane.b32.xlu0 %v9478_v20, %s9335_s29  ;;  %v5178_v41 = vpack.i.b16 %v2086_v29, %v2150_v27  ;;  %v5179_v43 = vpack.i.b16 %v2087_v17, %v2152_v30  ;;  %2322 = vst [vmem:[#allocation1 + $0x2] ss:$9 sm:$0xff] %v5177_v28  ;;  %s5690_s29 = smov 96  }
 0x27d   :  { %840 = vrot.lane.b32.xlu2 %v7263_v59, %s9398_s5  ;;  %v1403_v59 = vsel %vm1389_vm13, %v1374_v40, %v7371_v23  ;;  %v282_v27 = vrot.slane %v9486_v51, 1  ;;  %v9494_v51 = vld [vmem:[#allocation44_spill] sm:$0xff] }
 0x27e   :  { %v7449_v19 = vpop.permute.xlu0 %312  ;;  %2324 = vst [vmem:[#allocation1 + $0x3] ss:$9 sm:$0xff] %v5178_v41  ;;  %v9488_v41 = vshrl.u32 %v9485_v55, 16 }
 0x27f   :  { %v7452_v44 = vpop.permute.xlu2 %578  ;;  %2326 = vst [vmem:[#allocation1 + $0x4] ss:$9 sm:$0xff] %v5179_v43 }
 0x280   :  { %766 = vrot.lane.b32.xlu1 %v7341_v32, %s9344_s24  ;;  %v7524_v43 = vor.u32 %v282_v27, %v9488_v41 }
 0x282   :  { %v983_v6 = vpop.permute.xlu1 %982 }
 0x283   :  { %v1432_v4 = vsel %vm1418_vm14, %v1403_v59, %v983_v6  ;;  %v9491_v59 = vld [vmem:[#allocation84_spill] sm:$0xff] }
 0x284   :  { %v7460_v22 = vsel %vm9479_vm15, %v1432_v4, %v2012_v49  ;;  %738 = vrot.lane.b32.xlu0 %v9480_v24, %s9336_s23  ;;  %v9481_v49 = vld [vmem:[#allocation50_spill] sm:$0xff]  ;;  %vm9487_vm15 = vcmask 195584  }
 0x285   :  { %v2088_v8 = vrot.slane %v7460_v22, 1  ;;  %v2089_v10 = vrot.slane %v7460_v22, 2  ;;  %2328 = vst [vmem:[#allocation1 + $0x5] ss:$9 sm:$0xff] %v7460_v22  ;;  %876 = vrot.lane.b32.xlu2 %v7307_v57, %s9406_s30  ;;  %v7476_v52 = vrot.slane %v9481_v49, 2  ;;  %v1769_v57 = vsel %vm1041_vm1, %v1743_v25, %v6636_v45  ;;  %v9492_v4 = vld [vmem:[#allocation58_spill] sm:$0xff] }
 0x286   :  { %v7469_v18 = vpop.permute.xlu0 %396  ;;  %v1789_v29 = vsel %vm1070_vm2, %v1769_v57, %v9484_v1  ;;  %v9493_v49 = vld [vmem:[#allocation6_spill] sm:$0xff] }
 0x287   :  { %2330 = vst [vmem:[#allocation1 + $0x6] ss:$9 sm:$0xff] %v2088_v8  ;;  %v7471_v23 = vpop.permute.xlu2 %316  ;;  %v1814_v9 = vsel %vm1099_vm3, %v1789_v29, %v6732_v60  ;;  %v1745_v8 = vsel %vm998_vm0, %v9492_v4, %v9491_v59  ;;  %v9499_v59 = vld [vmem:[#allocation7_spill] sm:$0xff] }
 0x288   :  { %2332 = vst [vmem:[#allocation1 + $0x7] ss:$9 sm:$0xff] %v2089_v10  ;;  %800 = vrot.lane.b32.xlu1 %v7365_v34, %s9394_s3  ;;  %v1837_v14 = vsel %vm1128_vm4, %v1814_v9, %v6673_v62  ;;  %v1770_v25 = vsel %vm1041_vm1, %v1745_v8, %v9493_v49  ;;  %v9515_v62 = vld [vmem:[#allocation74_spill] sm:$0xff] }
 0x289   :  { %v1862_v13 = vsel %vm9487_vm15, %v1837_v14, %v6832_v3  ;;  %v9489_v3 = vld [vmem:[#allocation85_spill] sm:$0xff]  ;;  %v1790_v29 = vsel %vm1070_vm2, %v1770_v25, %v6759_v26  ;;  %v9501_v25 = vld [vmem:[#allocation87_spill] sm:$0xff] }
 0x28a   :  { %v7478_v12 = vpop.permute.xlu1 %1531  ;;  %v1885_v60 = vsel %vm1186_vm6, %v1862_v13, %v6881_v15  ;;  %v1747_v40 = vsel %vm998_vm0, %v9490_v61, %v9489_v3  ;;  %v9495_v13 = vld [vmem:[#allocation36_spill] sm:$0xff]  ;;  %v9516_v26 = vld [vmem:[#allocation75_spill] sm:$0xff] }
 0x28b   :  { %v1905_v28 = vsel %vm1215_vm7, %v1885_v60, %v6906_v50  ;;  %v1816_v60 = vsel %vm1099_vm3, %v1790_v29, %v9495_v13  ;;  %v9502_v29 = vld [vmem:[#allocation53_spill] sm:$0xff]  ;;  %v9504_v13 = vld [vmem:[#allocation62_spill] sm:$0xff]  ;;  %v9514_v15 = vld [vmem:[#allocation56_spill] sm:$0xff] }
 0x28c   :  { %768 = vrot.lane.b32.xlu0 %v7476_v52, %s9344_s24  ;;  %v1959_v6 = vshll.u32 %v1905_v28, 16  ;;  %v1957_v9 = vshrl.u32 %v1905_v28, 16 }
 0x28d   :  { %920 = vrot.lane.b32.xlu2 %v7330_v0, %s9348_s0 }
 0x28e   :  { %v7489_v37 = vpop.permute.xlu0 %314  ;;  %v1961_v57 = vrot.slane %v1959_v6, 1 }
 0x28f   :  { %v2333_v42 = vld [vmem:[#allocation1] sm:$0xff]  ;;  %v7491_v7 = vpop.permute.xlu2 %1547 }
 0x290   :  { %5222 = vmatmul.msk.bf16.gmra.mxu0 %vm9483_vm5, %v2333_v42  ;;  %842 = vrot.lane.b32.xlu1 %v7399_v56, %s9398_s5  ;;  %v1962_v41 = vor.u32 %v1961_v57, %v1957_v9  ;;  %vm9497_vm5 = vmmov %vm9487_vm15 }
 0x291   :  { %vm9500_vm15 = vmmov %vm9497_vm5 }
 0x292   :  { %v7500_v0 = vpop.permute.xlu1 %536 }
 0x294   :  { %802 = vrot.lane.b32.xlu0 %v9485_v55, %s9394_s3 }
 0x295   :  { %950 = vrot.lane.b32.xlu2 %v7341_v32, %s9372_s25 }
 0x296   :  { %v7512_v17 = vpop.permute.xlu0 %1549 }
 0x297   :  { %v7516_v30 = vpop.permute.xlu2 %580 }
 0x298   :  { %878 = vrot.lane.b32.xlu1 %v9478_v20, %s9406_s30  ;;  %v1771_v20 = vsel %vm1041_vm1, %v1747_v40, %v6791_v63  ;;  %v1838_v40 = vsel %vm1128_vm4, %v1816_v60, %v6867_v33  ;;  %v561_v60 = vrot.slane %v9504_v13, 2 }
 0x299   :  { %v1864_v28 = vsel %vm9497_vm5, %v1838_v40, %v6931_v35 }
 0x29a   :  { %v7526_v32 = vpop.permute.xlu1 %398 }
 0x29c   :  { %844 = vrot.lane.b32.xlu0 %v7524_v43, %s9398_s5 }
 0x29d   :  { %984 = vrot.lane.b32.xlu2 %v7365_v34, %s9432_s19  ;;  %v1791_v34 = vsel %vm1070_vm2, %v1771_v20, %v9494_v51 }
 0x29e   :  { %v7540_v10 = vpop.permute.xlu0 %1529  ;;  %v1818_v27 = vsel %vm1099_vm3, %v1791_v34, %v6914_v47  ;;  %v9498_v47 = vld [vmem:[#allocation86_spill] sm:$0xff] }
 0x29f   :  { %v7544_v42 = vpop.permute.xlu2 %1691  ;;  %v1839_v3 = vsel %vm1128_vm4, %v1818_v27, %v6948_v16  ;;  %v1886_v6 = vsel %vm1186_vm6, %v1864_v28, %v9498_v47  ;;  %v9503_v27 = vld [vmem:[#allocation12_spill] sm:$0xff] }
 0x2a0   :  { %922 = vrot.lane.b32.xlu1 %v9480_v24, %s9348_s0  ;;  %v9496_v24 = vld [vmem:[#allocation68_spill] sm:$0xff]  ;;  %v1866_v8 = vsel %vm9500_vm15, %v1839_v3, %v9499_v59  ;;  %v1906_v57 = vsel %vm1215_vm7, %v1886_v6, %v9501_v25  ;;  %vm9527_vm15 = vmmov %vm9497_vm5 }
 0x2a1   :  { %v1887_v9 = vsel %vm1186_vm6, %v1866_v8, %v9502_v29 }
 0x2a2   :  { %v7554_v14 = vpop.permute.xlu1 %1631  ;;  %v1907_v35 = vsel %vm1215_vm7, %v1887_v9, %v9503_v27  ;;  %v1963_v9 = vshrl.u32 %v1906_v57, 16 }
 0x2a3   :  { %v1971_v40 = vshll.u32 %v1907_v35, 16  ;;  %v1969_v13 = vshrl.u32 %v1907_v35, 16 }
 0x2a4   :  { %880 = vrot.lane.b32.xlu0 %v9496_v24, %s9406_s30  ;;  %v9505_v24 = vld [vmem:[#allocation72_spill] sm:$0xff] }
 0x2a5   :  { %2013 = vrot.lane.b32.xlu2 %v1962_v41, %s9439_s28  ;;  %v1965_v41 = vshll.u32 %v1906_v57, 16  ;;  %v1973_v59 = vrot.slane %v1971_v40, 1  ;;  %v9506_v40 = vld [vmem:[#allocation73_spill] sm:$0xff] }
 0x2a6   :  { %v7571_v20 = vpop.permute.xlu0 %538 }
 0x2a7   :  { %v7577_v34 = vpop.permute.xlu2 %690  ;;  %v1967_v28 = vrot.slane %v1965_v41, 1  ;;  %v1974_v16 = vor.u32 %v1973_v59, %v1969_v13 }
 0x2a8   :  { %952 = vrot.lane.b32.xlu1 %v7476_v52, %s9372_s25 }
 0x2a9   :  { %v1968_v27 = vor.u32 %v1967_v28, %v1963_v9  ;;  %v9508_v28 = vshrl.u32 %v9506_v40, 16 }
 0x2aa   :  { %v7584_v3 = vpop.permute.xlu1 %612 }
 0x2ac   :  { %924 = vrot.lane.b32.xlu0 %v9505_v24, %s9348_s0 }
 0x2ad   :  { %954 = vrot.lane.b32.xlu2 %v561_v60, %s9372_s25 }
 0x2ae   :  { %v7589_v6 = vpop.permute.xlu0 %1643 }
 0x2af   :  { %v7591_v8 = vpop.permute.xlu2 %582 }
 0x2b0   :  { %986 = vrot.lane.b32.xlu1 %v9485_v55, %s9432_s19  ;;  %v9507_v55 = vshll.u32 %v9506_v40, 16 }
 0x2b2   :  { %v7595_v29 = vpop.permute.xlu1 %400  ;;  %v289_v35 = vrot.slane %v9507_v55, 1  ;;  %v9509_v55 = vld [vmem:[#allocation71_spill] sm:$0xff] }
 0x2b4   :  { %2015 = vrot.lane.b32.xlu0 %v1968_v27, %s9439_s28  ;;  %v7621_v59 = vor.u32 %v289_v35, %v9508_v28  ;;  %v7638_v35 = vrot.slane %v9509_v55, 2  ;;  %v9510_v28 = vld [vmem:[#allocation77_spill] sm:$0xff] }
 0x2b5   :  { %2017 = vrot.lane.b32.xlu2 %v1974_v16, %s9439_s28  ;;  %v9511_v51 = vshll.u32 %v9510_v28, 16 }
 0x2b6   :  { %v7599_v24 = vpop.permute.xlu0 %654 }
 0x2b7   :  { %v7601_v41 = vpop.permute.xlu2 %1689  ;;  %v296_v63 = vrot.slane %v9511_v51, 1  ;;  %v9513_v51 = vld [vmem:[#allocation76_spill] sm:$0xff] }
 0x2b8   :  { %988 = vrot.lane.b32.xlu1 %v9506_v40, %s9432_s19 }
 0x2ba   :  { %v7605_v57 = vpop.permute.xlu1 %1629 }
 0x2bc   :  { %318 = vrot.lane.b32.xlu0 %v7399_v56, %s9447_s16 }
 0x2bd   :  { %584 = vrot.lane.b32.xlu2 %v7476_v52, %s9325_s4 }
 0x2be   :  { %v7613_v27 = vpop.permute.xlu0 %540 }
 0x2bf   :  { %v7615_v16 = vpop.permute.xlu2 %692 }
 0x2c0   :  { %320 = vrot.lane.b32.xlu1 %v7524_v43, %s9447_s16 }
 0x2c2   :  { %v7623_v9 = vpop.permute.xlu1 %614 }
 0x2c4   :  { %586 = vrot.lane.b32.xlu0 %v561_v60, %s9325_s4 }
 0x2c5   :  { %662 = vrot.lane.b32.xlu2 %v7621_v59, %s9332_s1 }
 0x2c6   :  { %v7628_v56 = vpop.permute.xlu0 %1641 }
 0x2c7   :  { %v7630_v52 = vpop.permute.xlu2 %658 }
 0x2c8   :  { %660 = vrot.lane.b32.xlu1 %v7524_v43, %s9332_s1  ;;  %v9512_v43 = vshrl.u32 %v9510_v28, 16 }
 0x2ca   :  { %v7634_v13 = vpop.permute.xlu1 %1705  ;;  %v7652_v47 = vor.u32 %v296_v63, %v9512_v43 }
 0x2cc   :  { %770 = vrot.lane.b32.xlu0 %v561_v60, %s9344_s24 }
 0x2cd   :  { %804 = vrot.lane.b32.xlu2 %v9506_v40, %s9394_s3  ;;  %v1749_v40 = vsel %vm998_vm0, %v9513_v51, %v7254_v46 }
 0x2ce   :  { %v7644_v61 = vpop.permute.xlu0 %656  ;;  %v1772_v63 = vsel %vm1041_vm1, %v1749_v40, %v9514_v15  ;;  %v9517_v40 = vld [vmem:[#allocation80_spill] sm:$0xff] }
 0x2cf   :  { %v7646_v25 = vpop.permute.xlu2 %1721  ;;  %v1792_v33 = vsel %vm1070_vm2, %v1772_v63, %v7203_v11  ;;  %v9518_v11 = vld [vmem:[#allocation78_spill] sm:$0xff] }
 0x2d0   :  { %772 = vrot.lane.b32.xlu1 %v7638_v35, %s9344_s24  ;;  %v1820_v51 = vsel %vm1099_vm3, %v1792_v33, %v7232_v36  ;;  %v7684_v15 = vrot.slane %v9518_v11, 2  ;;  %v9520_v36 = vld [vmem:[#allocation81_spill] sm:$0xff] }
 0x2d1   :  { %v1840_v49 = vsel %vm1128_vm4, %v1820_v51, %v7320_v53  ;;  %v9521_v51 = vld [vmem:[#allocation52_spill] sm:$0xff] }
 0x2d2   :  { %v735_v60 = vpop.permute.xlu1 %734  ;;  %v1868_v63 = vsel %vm9497_vm5, %v1840_v49, %v7337_v5  ;;  %v9522_v5 = vld [vmem:[#allocation41_spill] sm:$0xff]  ;;  %v9523_v49 = vld [vmem:[#allocation16_spill] sm:$0xff] }
 0x2d3   :  { %v1888_v33 = vsel %vm1186_vm6, %v1868_v63, %v7294_v48  ;;  %v1022_v11 = vsel %vm998_vm0, %v9522_v5, %v7449_v19  ;;  %v9525_v48 = vld [vmem:[#allocation61_spill] sm:$0xff] }
 0x2d4   :  { %806 = vrot.lane.b32.xlu0 %v9510_v28, %s9394_s3 }
 0x2d5   :  { %848 = vrot.lane.b32.xlu2 %v7652_v47, %s9398_s5 }
 0x2d6   :  { %v7661_v55 = vpop.permute.xlu0 %1723 }
 0x2d7   :  { %v841_v50 = vpop.permute.xlu2 %840 }
 0x2d8   :  { %846 = vrot.lane.b32.xlu1 %v7621_v59, %s9398_s5 }
 0x2da   :  { %v7667_v43 = vpop.permute.xlu1 %616 }
 0x2dc   :  { %882 = vrot.lane.b32.xlu0 %v9515_v62, %s9406_s30 }
 0x2dd   :  { %926 = vrot.lane.b32.xlu2 %v9516_v26, %s9348_s0  ;;  %v9519_v26 = vld [vmem:[#allocation35_spill] sm:$0xff] }
 0x2de   :  { %v765_v46 = vpop.permute.xlu0 %764  ;;  %v1752_v45 = vsel %vm998_vm0, %v9519_v26, %v7265_v21  ;;  %v1057_v21 = vsel %vm1041_vm1, %v1022_v11, %v7469_v18  ;;  %v9524_v26 = vld [vmem:[#allocation55_spill] sm:$0xff] }
 0x2df   :  { %v877_v1 = vpop.permute.xlu2 %876  ;;  %v1086_v19 = vsel %vm1070_vm2, %v1057_v21, %v7500_v0 }
 0x2e0   :  { %884 = vrot.lane.b32.xlu1 %v9517_v40, %s9406_s30  ;;  %v1774_v40 = vsel %vm1041_vm1, %v1752_v45, %v9521_v51  ;;  %v1908_v45 = vsel %vm1215_vm7, %v1888_v33, %v9525_v48  ;;  %v1115_v33 = vsel %vm1099_vm3, %v1086_v19, %v7452_v44 }
 0x2e1   :  { %v1794_v53 = vsel %vm1070_vm2, %v1774_v40, %v9523_v49  ;;  %v9526_v40 = vld [vmem:[#allocation19_spill] sm:$0xff]  ;;  %v1977_v11 = vshll.u32 %v1908_v45, 16  ;;  %v1975_v19 = vshrl.u32 %v1908_v45, 16 }
 0x2e2   :  { %v7686_v62 = vpop.permute.xlu1 %1703 }
 0x2e4   :  { %928 = vrot.lane.b32.xlu0 %v9520_v36, %s9348_s0  ;;  %v1822_v36 = vsel %vm1099_vm3, %v1794_v53, %v9524_v26  ;;  %v9528_v26 = vld [vmem:[#allocation38_spill] sm:$0xff] }
 0x2e5   :  { %958 = vrot.lane.b32.xlu2 %v7684_v15, %s9372_s25  ;;  %v1842_v5 = vsel %vm1128_vm4, %v1822_v36, %v7325_v38  ;;  %v1144_v38 = vsel %vm1128_vm4, %v1115_v33, %v7584_v3 }
 0x2e6   :  { %v7706_v63 = vpop.permute.xlu0 %736  ;;  %v1870_v18 = vsel %vm9527_vm15, %v1842_v5, %v9526_v40  ;;  %v1173_v21 = vsel %vm9497_vm5, %v1144_v38, %v7599_v24  ;;  %vm9531_vm15 = vcmask 523264  }
 0x2e7   :  { %v921_v51 = vpop.permute.xlu2 %920  ;;  %v1890_v53 = vsel %vm1186_vm6, %v1870_v18, %v7355_v39  ;;  %v1979_v39 = vrot.slane %v1977_v11, 1  ;;  %v1202_v44 = vsel %vm1186_vm6, %v1173_v21, %v7577_v34 }
 0x2e8   :  { %956 = vrot.lane.b32.xlu1 %v7638_v35, %s9372_s25  ;;  %v1910_v0 = vsel %vm1215_vm7, %v1890_v53, %v7378_v2  ;;  %v1231_v3 = vsel %vm1215_vm7, %v1202_v44, %v735_v60  ;;  %v9529_v60 = vshll.u32 %v9528_v26, 16 }
 0x2e9   :  { %v1983_v36 = vshll.u32 %v1910_v0, 16  ;;  %v1260_v24 = vsel %vm1244_vm8, %v1231_v3, %v765_v46  ;;  %v1980_v11 = vor.u32 %v1979_v39, %v1975_v19  ;;  %v1981_v33 = vshrl.u32 %v1910_v0, 16 }
 0x2ea   :  { %v799_v49 = vpop.permute.xlu1 %798  ;;  %v638_v45 = vrot.slane %v9529_v60, 1  ;;  %v9530_v0 = vshrl.u32 %v9528_v26, 16  ;;  %v2090_v19 = vrot.slane %v7460_v22, 3  ;;  %v9532_v22 = vld [vmem:[#allocation40_spill] sm:$0xff] }
 0x2eb   :  { %v1985_v40 = vrot.slane %v1983_v36, 1  ;;  %v1289_v18 = vsel %vm1273_vm9, %v1260_v24, %v799_v49 }
 0x2ec   :  { %324 = vrot.lane.b32.xlu0 %v7652_v47, %s9447_s16  ;;  %v1318_v34 = vsel %vm1302_vm10, %v1289_v18, %v841_v50  ;;  %v639_v21 = vor.u32 %v638_v45, %v9530_v0  ;;  %v749_v45 = vrot.slane %v9532_v22, 2 }
 0x2ed   :  { %992 = vrot.lane.b32.xlu2 %v9528_v26, %s9432_s19  ;;  %v1347_v49 = vsel %vm1331_vm11, %v1318_v34, %v877_v1 }
 0x2ee   :  { %v7734_v5 = vpop.permute.xlu0 %694  ;;  %v1376_v50 = vsel %vm1360_vm12, %v1347_v49, %v921_v51 }
 0x2ef   :  { %v951_v2 = vpop.permute.xlu2 %950 }
 0x2f0   :  { %990 = vrot.lane.b32.xlu1 %v9510_v28, %s9432_s19  ;;  %v1986_v28 = vor.u32 %v1985_v40, %v1981_v33 }
 0x2f2   :  { %v7743_v53 = vpop.permute.xlu1 %766 }
 0x2f4   :  { %2019 = vrot.lane.b32.xlu0 %v1980_v11, %s9439_s28 }
 0x2f5   :  { %322 = vrot.lane.b32.xlu2 %v7621_v59, %s9447_s16  ;;  %v1405_v59 = vsel %vm1389_vm13, %v1376_v50, %v951_v2  ;;  %s9651_s16 = sld [smem:[#allocation100_spill]] }
 0x2f6   :  { %v7751_v38 = vpop.permute.xlu0 %738 }
 0x2f7   :  { %v985_v46 = vpop.permute.xlu2 %984 }
 0x2f8   :  { %2021 = vrot.lane.b32.xlu1 %v1986_v28, %s9439_s28  ;;  %v1434_v1 = vsel %vm1418_vm14, %v1405_v59, %v985_v46 }
 0x2fa   :  { %v7757_v39 = vpop.permute.xlu1 %800 }
 0x2fc   :  { %590 = vrot.lane.b32.xlu0 %v7684_v15, %s9325_s4 }
 0x2fd   :  { %666 = vrot.lane.b32.xlu2 %v639_v21, %s9332_s1 }
 0x2fe   :  { %v7764_v36 = vpop.permute.xlu0 %768 }
 0x2ff   :  { %v2014_v44 = vpop.permute.xlu2 %2013 }
 0x300   :  { %v2043_v3 = vsel %vm9531_vm15, %v1434_v1, %v2014_v44  ;;  %588 = vrot.lane.b32.xlu1 %v7638_v35, %s9325_s4  ;;  %v9533_v35 = vld [vmem:[#allocation49_spill] sm:$0xff]  ;;  %vm9542_vm15 = vmmov %vm9497_vm5  ;;  %s9581_s4 = sld [smem:[#allocation93_spill]] }
 0x301   :  { %v2091_v51 = vrot.slane %v2043_v3, 1  ;;  %v2092_v24 = vrot.slane %v2043_v3, 2  ;;  %v2162_v40 = vunpack.i.h.s16 %v2043_v3  ;;  %v5180_v18 = vpack.i.b16 %v2043_v3, %v2090_v19  ;;  %v9536_v19 = vld [vmem:[#allocation54_spill] sm:$0xff] }
 0x302   :  { %v7771_v11 = vpop.permute.xlu1 %842  ;;  %v2093_v33 = vrot.slane %v2043_v3, 3  ;;  %v9535_v1 = vshrl.u32 %v9533_v35, 16  ;;  %v1758_v3 = vsel %vm998_vm0, %v9536_v19, %v7391_v31  ;;  %v9543_v19 = vld [vmem:[#allocation46_spill] sm:$0xff] }
 0x303   :  { %v2164_v2 = vunpack.i.h.s16 %v2091_v51  ;;  %v2166_v34 = vunpack.i.h.s16 %v2092_v24  ;;  %v5181_v60 = vpack.i.b16 %v2091_v51, %v2162_v40  ;;  %2335 = vst [vmem:[#allocation1] ss:$9 sm:$0xff] %v5180_v18  ;;  %v1778_v40 = vsel %vm1041_vm1, %v1758_v3, %v7478_v12 }
 0x304   :  { %664 = vrot.lane.b32.xlu0 %v7652_v47, %s9332_s1  ;;  %v9534_v47 = vshll.u32 %v9533_v35, 16  ;;  %s9646_s1 = sld [smem:[#allocation96_spill]] }
 0x305   :  { %v5182_v28 = vpack.i.b16 %v2092_v24, %v2164_v2  ;;  %v5183_v46 = vpack.i.b16 %v2093_v33, %v2166_v34  ;;  %2337 = vst [vmem:[#allocation1 + $0x1] ss:$9 sm:$0xff] %v5181_v60  ;;  %810 = vrot.lane.b32.xlu2 %v9533_v35, %s9394_s3  ;;  %v9538_v34 = vld [vmem:[#allocation88_spill] sm:$0xff]  ;;  %v9539_v60 = vld [vmem:[#allocation13_spill] sm:$0xff] }
 0x306   :  { %v7778_v49 = vpop.permute.xlu0 %802  ;;  %v824_v50 = vrot.slane %v9534_v47, 1 }
 0x307   :  { %2339 = vst [vmem:[#allocation1 + $0x2] ss:$9 sm:$0xff] %v5182_v28  ;;  %v7780_v0 = vpop.permute.xlu2 %954 }
 0x308   :  { %2341 = vst [vmem:[#allocation1 + $0x3] ss:$9 sm:$0xff] %v5183_v46  ;;  %776 = vrot.lane.b32.xlu1 %v749_v45, %s9344_s24  ;;  %v825_v44 = vor.u32 %v824_v50, %v9535_v1  ;;  %v9541_v46 = vld [vmem:[#allocation47_spill] sm:$0xff] }
 0x309   :  { %v1028_v47 = vsel %vm998_vm0, %v9541_v46, %v7471_v23 }
 0x30a   :  { %v879_v59 = vpop.permute.xlu1 %878 }
 0x30c   :  { %774 = vrot.lane.b32.xlu0 %v7684_v15, %s9344_s24  ;;  %v1798_v15 = vsel %vm1070_vm2, %v1778_v40, %v7512_v17  ;;  %v9540_v17 = vld [vmem:[#allocation10_spill] sm:$0xff]  ;;  %s9639_s24 = sld [smem:[#allocation90_spill]] }
 0x30d   :  { %808 = vrot.lane.b32.xlu2 %v9528_v26, %s9394_s3  ;;  %v1826_v18 = vsel %vm1099_vm3, %v1798_v15, %v7554_v14  ;;  %v9537_v26 = vld [vmem:[#allocation15_spill] sm:$0xff]  ;;  %v1755_v14 = vsel %vm998_vm0, %v9540_v17, %v7434_v54  ;;  %v1061_v54 = vsel %vm1041_vm1, %v1028_v47, %v7595_v29 }
 0x30e   :  { %v845_v51 = vpop.permute.xlu0 %844  ;;  %v1846_v31 = vsel %vm1128_vm4, %v1826_v18, %v7589_v6  ;;  %v1025_v2 = vsel %vm998_vm0, %v9537_v26, %v7489_v37 }
 0x30f   :  { %v7796_v24 = vpop.permute.xlu2 %2017  ;;  %v1059_v12 = vsel %vm1041_vm1, %v1025_v2, %v7526_v32  ;;  %v1874_v28 = vsel %vm9497_vm5, %v1846_v31, %v7544_v42  ;;  %v1776_v32 = vsel %vm1041_vm1, %v1755_v14, %v7540_v10  ;;  %v1090_v42 = vsel %vm1070_vm2, %v1061_v54, %v7613_v27 }
 0x310   :  { %852 = vrot.lane.b32.xlu1 %v825_v44, %s9398_s5  ;;  %v1088_v6 = vsel %vm1070_vm2, %v1059_v12, %v7571_v20  ;;  %v1894_v50 = vsel %vm1186_vm6, %v1874_v28, %v7634_v13  ;;  %v1796_v10 = vsel %vm1070_vm2, %v1776_v32, %v7491_v7  ;;  %v9544_v7 = vld [vmem:[#allocation26_spill] sm:$0xff] }
 0x311   :  { %v1914_v20 = vsel %vm1215_vm7, %v1894_v50, %v7661_v55  ;;  %v1117_v23 = vsel %vm1099_vm3, %v1088_v6, %v7516_v30  ;;  %v1824_v29 = vsel %vm1099_vm3, %v1796_v10, %v7605_v57  ;;  %v1119_v30 = vsel %vm1099_vm3, %v1090_v42, %v7591_v8  ;;  %v9545_v57 = vld [vmem:[#allocation51_spill] sm:$0xff] }
 0x312   :  { %v923_v33 = vpop.permute.xlu1 %922  ;;  %v1146_v13 = vsel %vm1128_vm4, %v1117_v23, %v7623_v9  ;;  %v1844_v27 = vsel %vm1128_vm4, %v1824_v29, %v7628_v56  ;;  %v935_v3 = vrot.slane %v9544_v7, 2  ;;  %v1148_v9 = vsel %vm1128_vm4, %v1119_v30, %v7667_v43 }
 0x313   :  { %v1175_v55 = vsel %vm9542_vm15, %v1146_v13, %v7644_v61  ;;  %v1872_v56 = vsel %vm9497_vm5, %v1844_v27, %v7601_v41  ;;  %vm9546_vm15 = vmmov %vm9497_vm5  ;;  %vm9548_vm5 = vcmask 523264  }
 0x314   :  { %888 = vrot.lane.b32.xlu0 %v9538_v34, %s9406_s30  ;;  %v1204_v61 = vsel %vm1186_vm6, %v1175_v55, %v7615_v16  ;;  %v1892_v31 = vsel %vm1186_vm6, %v1872_v56, %v7686_v62  ;;  %v1177_v43 = vsel %vm9546_vm15, %v1148_v9, %v7630_v52  ;;  %v1993_v16 = vshrl.u32 %v1914_v20, 16  ;;  %vm9549_vm15 = vmmov %vm9548_vm5 }
 0x315   :  { %932 = vrot.lane.b32.xlu2 %v9539_v60, %s9348_s0  ;;  %v1233_v8 = vsel %vm1215_vm7, %v1204_v61, %v7706_v63  ;;  %v1206_v41 = vsel %vm1186_vm6, %v1177_v43, %v7734_v5 }
 0x316   :  { %v881_v37 = vpop.permute.xlu0 %880  ;;  %v1262_v26 = vsel %vm1244_vm8, %v1233_v8, %v7743_v53  ;;  %v1235_v2 = vsel %vm1215_vm7, %v1206_v41, %v7751_v38  ;;  %v1912_v53 = vsel %vm1215_vm7, %v1892_v31, %v7646_v25  ;;  %v9547_v38 = vld [vmem:[#allocation18_spill] sm:$0xff]  ;;  %v9553_v41 = vld [vmem:[#allocation79_spill] sm:$0xff] }
 0x317   :  { %v7830_v1 = vpop.permute.xlu2 %584  ;;  %v1291_v63 = vsel %vm1273_vm9, %v1262_v26, %v7757_v39  ;;  %v1264_v12 = vsel %vm1244_vm8, %v1235_v2, %v7764_v36  ;;  %v1989_v25 = vshll.u32 %v1912_v53, 16  ;;  %v1987_v50 = vshrl.u32 %v1912_v53, 16  ;;  %v9551_v8 = vld [vmem:[#allocation82_spill] sm:$0xff]  ;;  %v9554_v2 = vld [vmem:[#allocation8_spill] sm:$0xff]  ;;  %v9555_v53 = vld [vmem:[#allocation83_spill] sm:$0xff] }
 0x318   :  { %850 = vrot.lane.b32.xlu1 %v639_v21, %s9398_s5  ;;  %v1995_v21 = vshll.u32 %v1914_v20, 16  ;;  %v1320_v62 = vsel %vm1302_vm10, %v1291_v63, %v7771_v11  ;;  %v1293_v5 = vsel %vm1273_vm9, %v1264_v12, %v7778_v49  ;;  %v9552_v26 = vld [vmem:[#allocation6_spill] sm:$0xff]  ;;  %s5692_s5 = smov [#allocation2]  }
 0x319   :  { %v1349_v60 = vsel %vm1331_vm11, %v1320_v62, %v879_v59  ;;  %v1322_v11 = vsel %vm1302_vm10, %v1293_v5, %v845_v51  ;;  %v1991_v46 = vrot.slane %v1989_v25, 1 }
 0x31a   :  { %v953_v44 = vpop.permute.xlu1 %952  ;;  %v1997_v15 = vrot.slane %v1995_v21, 1  ;;  %v1378_v39 = vsel %vm1360_vm12, %v1349_v60, %v923_v33  ;;  %v1351_v14 = vsel %vm1331_vm11, %v1322_v11, %v881_v37  ;;  %v9558_v11 = vld [vmem:[#allocation9_spill] sm:$0xff] }
 0x31b   :  { %v1407_v17 = vsel %vm1389_vm13, %v1378_v39, %v953_v44  ;;  %v1992_v22 = vor.u32 %v1991_v46, %v1987_v50  ;;  %v9557_v39 = vld [vmem:[#allocation39_spill] sm:$0xff] }
 0x31c   :  { %886 = vrot.lane.b32.xlu0 %v9543_v19, %s9406_s30  ;;  %v1998_v52 = vor.u32 %v1997_v15, %v1993_v16  ;;  %v9562_v46 = vld [vmem:[#allocation87_spill] sm:$0xff] }
 0x31d   :  { %930 = vrot.lane.b32.xlu2 %v9545_v57, %s9348_s0 }
 0x31e   :  { %v925_v40 = vpop.permute.xlu0 %924 }
 0x31f   :  { %v7866_v18 = vpop.permute.xlu2 %662  ;;  %v1380_v6 = vsel %vm1360_vm12, %v1351_v14, %v925_v40 }
 0x320   :  { %962 = vrot.lane.b32.xlu1 %v935_v3, %s9372_s25  ;;  %v1409_v37 = vsel %vm1389_vm13, %v1380_v6, %v7780_v0 }
 0x322   :  { %v987_v34 = vpop.permute.xlu1 %986 }
 0x323   :  { %v1436_v36 = vsel %vm1418_vm14, %v1407_v17, %v987_v34 }
 0x324   :  { %996 = vrot.lane.b32.xlu0 %v9547_v38, %s9432_s19 }
 0x325   :  { %2025 = vrot.lane.b32.xlu2 %v1998_v52, %s9439_s28 }
 0x326   :  { %v2016_v59 = vpop.permute.xlu0 %2015 }
 0x327   :  { %v2045_v49 = vsel %vm9548_vm5, %v1436_v36, %v2016_v59  ;;  %v7903_v51 = vpop.permute.xlu2 %804  ;;  %vm9550_vm5 = vcmask 818176   ;;  %v9561_v59 = vld [vmem:[#allocation86_spill] sm:$0xff] }
 0x328   :  { %v2094_v33 = vrot.slane %v2045_v49, 1  ;;  %v2095_v28 = vrot.slane %v2045_v49, 2  ;;  %2343 = vst [vmem:[#allocation1 + $0x4] ss:$9 sm:$0xff] %v2045_v49  ;;  %960 = vrot.lane.b32.xlu1 %v749_v45, %s9372_s25  ;;  %v2096_v54 = vrot.slane %v2045_v49, 3  ;;  %s9587_s25 = sld [smem:[#allocation94_spill]] }
 0x32a   :  { %2345 = vst [vmem:[#allocation1 + $0x5] ss:$9 sm:$0xff] %v2094_v33  ;;  %v989_v47 = vpop.permute.xlu1 %988 }
 0x32b   :  { %2347 = vst [vmem:[#allocation1 + $0x6] ss:$9 sm:$0xff] %v2095_v28  ;;  %v1438_v32 = vsel %vm1418_vm14, %v1409_v37, %v989_v47 }
 0x32c   :  { %v2047_v20 = vsel %vm9549_vm15, %v1438_v32, %v7796_v24  ;;  %994 = vrot.lane.b32.xlu0 %v9533_v35, %s9432_s19  ;;  %vm9556_vm15 = vcmask 195584  }
 0x32d   :  { %v5184_v45 = vpack.i.b16 %v2047_v20, %v2096_v54  ;;  %v2097_v23 = vrot.slane %v2047_v20, 1  ;;  %v2098_v10 = vrot.slane %v2047_v20, 2  ;;  %v2176_v0 = vunpack.i.h.s16 %v2047_v20 }
 0x32e   :  { %v319_v42 = vpop.permute.xlu0 %318  ;;  %v2099_v21 = vrot.slane %v2047_v20, 3 }
 0x32f   :  { %2349 = vst [vmem:[#allocation1 + $0x7] ss:$9 sm:$0xff] %v5184_v45  ;;  %v2178_v44 = vunpack.i.h.s16 %v2097_v23  ;;  %v849_v29 = vpop.permute.xlu2 %848  ;;  %v2180_v55 = vunpack.i.h.s16 %v2098_v10  ;;  %v5185_v27 = vpack.i.b16 %v2097_v23, %v2176_v0  ;;  %v1031_v61 = vsel %vm998_vm0, %v9482_v58, %v319_v42 }
 0x330   :  { %2023 = vrot.lane.b32.xlu1 %v1992_v22, %s9439_s28  ;;  %v1063_v31 = vsel %vm1041_vm1, %v1031_v61, %v9551_v8 }
 0x331   :  { %v5186_v24 = vpack.i.b16 %v2098_v10, %v2178_v44  ;;  %v5187_v7 = vpack.i.b16 %v2099_v21, %v2180_v55  ;;  %v1092_v63 = vsel %vm1070_vm2, %v1063_v31, %v9553_v41 }
 0x332   :  { %v321_v13 = vpop.permute.xlu1 %320  ;;  %v1121_v58 = vsel %vm1099_vm3, %v1092_v63, %v7830_v1  ;;  %v9560_v1 = vld [vmem:[#allocation11_spill] sm:$0xff] }
 0x333   :  { %v1034_v56 = vsel %vm998_vm0, %v9492_v4, %v321_v13  ;;  %v1150_v12 = vsel %vm1128_vm4, %v1121_v58, %v9555_v53 }
 0x334   :  { %v1065_v16 = vsel %vm1041_vm1, %v1034_v56, %v9552_v26 }
 0x335   :  { %v1094_v62 = vsel %vm1070_vm2, %v1065_v16, %v9554_v2  ;;  %v9566_v2 = vld [vmem:[#allocation76_spill] sm:$0xff] }
 0x336   :  { %v587_v30 = vpop.permute.xlu0 %586  ;;  %v2350_v19 = vld [vmem:[#allocation1] sm:$0xff] }
 0x337   :  { %2352 = vst [vmem:[#allocation1] ss:$9 sm:$0xff] %v5185_v27  ;;  %5223 = vmatmul.msk.bf16.gmra.mxu0 %vm9550_vm5, %v2350_v19  ;;  %v927_v3 = vpop.permute.xlu2 %926  ;;  %v1123_v52 = vsel %vm1099_vm3, %v1094_v62, %v587_v30  ;;  %vm9559_vm5 = vmmov %vm9556_vm15 }
 0x338   :  { %2354 = vst [vmem:[#allocation1 + $0x1] ss:$9 sm:$0xff] %v5186_v24  ;;  %v1152_v38 = vsel %vm1128_vm4, %v1123_v52, %v9557_v39  ;;  %v9567_v52 = vld [vmem:[#allocation56_spill] sm:$0xff] }
 0x339   :  { %2356 = vst [vmem:[#allocation1 + $0x2] ss:$9 sm:$0xff] %v5187_v7  ;;  %v1181_v14 = vsel %vm9559_vm5, %v1152_v38, %v7866_v18 }
 0x33a   :  { %v661_v35 = vpop.permute.xlu1 %660  ;;  %v1210_v6 = vsel %vm1186_vm6, %v1181_v14, %v9561_v59  ;;  %v9572_v59 = vld [vmem:[#allocation42_spill] sm:$0xff] }
 0x33b   :  { %v1179_v5 = vsel %vm9556_vm15, %v1150_v12, %v661_v35  ;;  %v1239_v47 = vsel %vm1215_vm7, %v1210_v6, %v9562_v46  ;;  %vm9563_vm15 = vcmask 523264   ;;  %v9568_v12 = vld [vmem:[#allocation14_spill] sm:$0xff] }
 0x33c   :  { %v1208_v17 = vsel %vm1186_vm6, %v1179_v5, %v9558_v11  ;;  %vm9564_vm5 = vmmov %vm9563_vm15  ;;  %v9569_v11 = vld [vmem:[#allocation64_spill] sm:$0xff] }
 0x33d   :  { %v1237_v36 = vsel %vm1215_vm7, %v1208_v17, %v9560_v1 }
 0x33e   :  { %v771_v9 = vpop.permute.xlu0 %770 }
 0x33f   :  { %v959_v15 = vpop.permute.xlu2 %958  ;;  %v1266_v28 = vsel %vm1244_vm8, %v1237_v36, %v771_v9 }
 0x340   :  { %v1295_v18 = vsel %vm1273_vm9, %v1266_v28, %v7903_v51 }
 0x342   :  { %v773_v57 = vpop.permute.xlu1 %772 }
 0x343   :  { %v1268_v37 = vsel %vm1244_vm8, %v1239_v47, %v773_v57  ;;  %v9574_v47 = vld [vmem:[#allocation44_spill] sm:$0xff] }
 0x346   :  { %v807_v40 = vpop.permute.xlu0 %806 }
 0x347   :  { %v993_v4 = vpop.permute.xlu2 %992  ;;  %v1297_v50 = vsel %vm1273_vm9, %v1268_v37, %v807_v40 }
 0x348   :  { %v1326_v22 = vsel %vm1302_vm10, %v1297_v50, %v849_v29 }
 0x34a   :  { %v847_v43 = vpop.permute.xlu1 %846 }
 0x34b   :  { %v1324_v54 = vsel %vm1302_vm10, %v1295_v18, %v847_v43 }
 0x34e   :  { %v883_v34 = vpop.permute.xlu0 %882 }
 0x34f   :  { %v323_v33 = vpop.permute.xlu2 %322  ;;  %v1353_v20 = vsel %vm1331_vm11, %v1324_v54, %v883_v34 }
 0x350   :  { %v1382_v10 = vsel %vm1360_vm12, %v1353_v20, %v927_v3  ;;  %v9575_v20 = vld [vmem:[#allocation33_spill] sm:$0xff] }
 0x352   :  { %v885_v60 = vpop.permute.xlu1 %884 }
 0x353   :  { %v1355_v42 = vsel %vm1331_vm11, %v1326_v22, %v885_v60 }
 0x356   :  { %v929_v25 = vpop.permute.xlu0 %928 }
 0x357   :  { %v1384_v23 = vsel %vm1360_vm12, %v1355_v42, %v929_v25  ;;  %v667_v0 = vpop.permute.xlu2 %666  ;;  %v9570_v25 = vld [vmem:[#allocation69_spill] sm:$0xff] }
 0x358   :  { %v1413_v51 = vsel %vm1389_vm13, %v1384_v23, %v959_v15  ;;  %v1037_v14 = vsel %vm998_vm0, %v9570_v25, %v323_v33 }
 0x359   :  { %v1442_v24 = vsel %vm1418_vm14, %v1413_v51, %v993_v4  ;;  %v1067_v6 = vsel %vm1041_vm1, %v1037_v14, %v9572_v59 }
 0x35a   :  { %v957_v49 = vpop.permute.xlu1 %956  ;;  %v1096_v37 = vsel %vm1070_vm2, %v1067_v6, %v9574_v47 }
 0x35b   :  { %v1411_v13 = vsel %vm1389_vm13, %v1382_v10, %v957_v49  ;;  %v9573_v49 = vld [vmem:[#allocation43_spill] sm:$0xff] }
 0x35e   :  { %v325_v32 = vpop.permute.xlu0 %324 }
 0x35f   :  { %v811_v40 = vpop.permute.xlu2 %810  ;;  %v1040_v62 = vsel %vm998_vm0, %v9566_v2, %v325_v32 }
 0x360   :  { %v1069_v4 = vsel %vm1041_vm1, %v1040_v62, %v9567_v52  ;;  %v8009_v52 = vld [vmem:[%s9581_s4] ss:$0 sm:$0xff] }
 0x361   :  { %v1098_v60 = vsel %vm1070_vm2, %v1069_v4, %v9568_v12  ;;  %vm9579_vm2 = vcmask 523264   ;;  %v2455_v4 = vpop.f32.mrf.mxu0 }
 0x362   :  { %v991_v45 = vpop.permute.xlu1 %990  ;;  %v2456_v12 = vadd.f32 %v8009_v52, %v2455_v4 }
 0x363   :  { %v1440_v44 = vsel %vm1418_vm14, %v1411_v13, %v991_v45  ;;  %v9577_v13 = vld [vmem:[#allocation53_spill] sm:$0xff] }
 0x366   :  { %v2020_v55 = vpop.permute.xlu0 %2019 }
 0x367   :  { %v2049_v21 = vsel %vm9563_vm15, %v1440_v44, %v2020_v55  ;;  %vm9565_vm15 = vcmask 818176   ;;  %v809_v34 = vpop.permute.xlu2 %808 }
 0x368   :  { %v2100_v27 = vrot.slane %v2049_v21, 1  ;;  %v2101_v30 = vrot.slane %v2049_v21, 2  ;;  %2358 = vst [vmem:[#allocation1 + $0x3] ss:$9 sm:$0xff] %v2049_v21  ;;  %v2102_v19 = vrot.slane %v2049_v21, 3 }
 0x36a   :  { %2360 = vst [vmem:[#allocation1 + $0x4] ss:$9 sm:$0xff] %v2100_v27  ;;  %v2022_v29 = vpop.permute.xlu1 %2021  ;;  %v9578_v27 = vld [vmem:[#allocation12_spill] sm:$0xff] }
 0x36b   :  { %2362 = vst [vmem:[#allocation1 + $0x5] ss:$9 sm:$0xff] %v2101_v30  ;;  %v2051_v7 = vsel %vm9564_vm5, %v1442_v24, %v2022_v29  ;;  %vm9571_vm5 = vcmask 195584  }
 0x36c   :  { %v2103_v35 = vrot.slane %v2051_v7, 1  ;;  %v2190_v3 = vunpack.i.h.s16 %v2051_v7  ;;  %v5188_v9 = vpack.i.b16 %v2051_v7, %v2102_v19  ;;  %v2104_v15 = vrot.slane %v2051_v7, 2  ;;  %vm9576_vm1 = vmmov %vm9571_vm5 }
 0x36d   :  { %v2105_v43 = vrot.slane %v2051_v7, 3 }
 0x36e   :  { %v5189_v57 = vpack.i.b16 %v2103_v35, %v2190_v3  ;;  %v591_v61 = vpop.permute.xlu0 %590  ;;  %2364 = vst [vmem:[#allocation1 + $0x6] ss:$9 sm:$0xff] %v5188_v9  ;;  %v2192_v56 = vunpack.i.h.s16 %v2103_v35  ;;  %v2194_v31 = vunpack.i.h.s16 %v2104_v15 }
 0x36f   :  { %v1127_v5 = vsel %vm1099_vm3, %v1098_v60, %v591_v61  ;;  %v933_v38 = vpop.permute.xlu2 %932 }
 0x370   :  { %2366 = vst [vmem:[#allocation1 + $0x7] ss:$9 sm:$0xff] %v5189_v57  ;;  %v5190_v26 = vpack.i.b16 %v2104_v15, %v2192_v56  ;;  %v5191_v41 = vpack.i.b16 %v2105_v43, %v2194_v31  ;;  %v1156_v17 = vsel %vm1128_vm4, %v1127_v5, %v9569_v11 }
 0x371   :  { %v1185_v1 = vsel %vm9571_vm5, %v1156_v17, %v667_v0 }
 0x372   :  { %v589_v8 = vpop.permute.xlu1 %588  ;;  %v1214_v28 = vsel %vm1186_vm6, %v1185_v1, %v9573_v49  ;;  %v2457_v1 = vpop.f32.mrf.mxu0 }
 0x373   :  { %v1243_v32 = vsel %vm1215_vm7, %v1214_v28, %v9525_v48  ;;  %v1125_v50 = vsel %vm1099_vm3, %v1096_v37, %v589_v8  ;;  %v2458_v49 = vadd.f32 %v8009_v52, %v2457_v1 }
 0x374   :  { %v1154_v22 = vsel %vm1128_vm4, %v1125_v50, %v9575_v20  ;;  %vm9580_vm4 = vmmov %vm9579_vm2 }
 0x376   :  { %v665_v16 = vpop.permute.xlu0 %664 }
 0x377   :  { %v2367_v63 = vld [vmem:[#allocation1] sm:$0xff]  ;;  %v931_v18 = vpop.permute.xlu2 %930  ;;  %v1183_v42 = vsel %vm9576_vm1, %v1154_v22, %v665_v16 }
 0x378   :  { %2369 = vst [vmem:[#allocation1] ss:$9 sm:$0xff] %v5190_v26  ;;  %5224 = vmatmul.msk.bf16.gmra.mxu0 %vm9565_vm15, %v2367_v63  ;;  %v1212_v48 = vsel %vm1186_vm6, %v1183_v42, %v9577_v13 }
 0x379   :  { %2371 = vst [vmem:[#allocation1 + $0x1] ss:$9 sm:$0xff] %v5191_v41  ;;  %v1241_v30 = vsel %vm1215_vm7, %v1212_v48, %v9578_v27 }
 0x37a   :  { %v777_v58 = vpop.permute.xlu1 %776 }
 0x37b   :  { %v1272_v33 = vsel %vm1244_vm8, %v1243_v32, %v777_v58 }
 0x37c   :  { %v1301_v45 = vsel %vm1273_vm9, %v1272_v33, %v811_v40  ;;  %v2460_v33 = vpop.f32.mrf.mxu0 }
 0x37e   :  { %v775_v53 = vpop.permute.xlu0 %774 }
 0x37f   :  { %v2026_v21 = vpop.permute.xlu2 %2025  ;;  %v1270_v24 = vsel %vm1244_vm8, %v1241_v30, %v775_v53  ;;  %vm9582_vm8 = vmmov %vm9565_vm15 }
 0x380   :  { %v1299_v9 = vsel %vm1273_vm9, %v1270_v24, %v809_v34  ;;  %vm2489_vm9 = vcmp.ge.f32.partialorder %v2456_v12, 0.0 }
 0x382   :  { %v853_v39 = vpop.permute.xlu1 %852 }
 0x383   :  { %v1330_v23 = vsel %vm1302_vm10, %v1301_v45, %v853_v39  ;;  %v2461_v45 = vadd.f32 %v8009_v52, %v2460_v33 }
 0x385   :  { %v2504_v42 = vmul.f32 0.01, %v2461_v45 }
 0x386   :  { %v889_v36 = vpop.permute.xlu0 %888 }
 0x387   :  { %v1359_v10 = vsel %vm1331_vm11, %v1330_v23, %v889_v36 }
 0x388   :  { %v1388_v44 = vsel %vm1360_vm12, %v1359_v10, %v933_v38  ;;  %v2502_v38 = vmul.f32 0.01, %v2456_v12 }
 0x38a   :  { %v851_v46 = vpop.permute.xlu1 %850  ;;  %v2515_v11 = vsel %vm2489_vm9, %v2456_v12, %v2502_v38 }
 0x38b   :  { %v1328_v15 = vsel %vm1302_vm10, %v1299_v9, %v851_v46  ;;  %v2541_v17 = vrot.slane %v2515_v11, 1  ;;  %v2542_v14 = vrot.slane %v2515_v11, 2  ;;  %v2543_v36 = vrot.slane %v2515_v11, 3 }
 0x38c   :  { %v2544_v59 = vrot.slane %v2515_v11, 4  ;;  %v2545_v6 = vrot.slane %v2515_v11, 5  ;;  %v2546_v28 = vrot.slane %v2515_v11, 6  ;;  %v2503_v46 = vmul.f32 0.01, %v2458_v49 }
 0x38d   :  { %vm2490_vm10 = vcmp.ge.f32.partialorder %v2458_v49, 0.0  ;;  %v2547_v37 = vrot.slane %v2515_v11, 7 }
 0x38e   :  { %v887_v54 = vpop.permute.xlu0 %886  ;;  %v2516_v47 = vsel %vm2490_vm10, %v2458_v49, %v2503_v46 }
 0x38f   :  { %v1357_v56 = vsel %vm1331_vm11, %v1328_v15, %v887_v54  ;;  %vm9583_vm11 = vmmov %vm9582_vm8  ;;  %v2548_v50 = vrot.slane %v2516_v47, 1  ;;  %v2550_v54 = vrot.slane %v2516_v47, 3  ;;  %v2551_v20 = vrot.slane %v2516_v47, 4 }
 0x390   :  { %v1386_v43 = vsel %vm1360_vm12, %v1357_v56, %v931_v18  ;;  %v2549_v18 = vrot.slane %v2516_v47, 2  ;;  %v2552_v22 = vrot.slane %v2516_v47, 5  ;;  %vm2491_vm12 = vcmp.ge.f32.partialorder %v2461_v45, 0.0 }
 0x391   :  { %v2553_v23 = vrot.slane %v2516_v47, 6  ;;  %v2517_v10 = vsel %vm2491_vm12, %v2461_v45, %v2504_v42  ;;  %vm9584_vm12 = vcmask 523264  }
 0x392   :  { %v963_v0 = vpop.permute.xlu1 %962  ;;  %v2555_v48 = vrot.slane %v2517_v10, 1  ;;  %v2559_v24 = vrot.slane %v2517_v10, 5  ;;  %v2561_v9 = vrot.slane %v2517_v10, 7 }
 0x393   :  { %v1417_v55 = vsel %vm1389_vm13, %v1388_v44, %v963_v0  ;;  %v2554_v0 = vrot.slane %v2516_v47, 7  ;;  %v2556_v44 = vrot.slane %v2517_v10, 2 }
 0x396   :  { %v997_v51 = vpop.permute.xlu0 %996 }
 0x397   :  { %v1446_v29 = vsel %vm1418_vm14, %v1417_v55, %v997_v51  ;;  %v2462_v55 = vpop.f32.mrf.mxu0  ;;  %v2557_v51 = vrot.slane %v2517_v10, 3 }
 0x398   :  { %v2055_v19 = vsel %vm9579_vm2, %v1446_v29, %v2026_v21  ;;  %v2558_v21 = vrot.slane %v2517_v10, 4  ;;  %v2463_v27 = vadd.f32 %v8009_v52, %v2462_v55 }
 0x399   :  { %v2109_v7 = vrot.slane %v2055_v19, 1  ;;  %v2204_v35 = vunpack.i.h.s16 %v2055_v19  ;;  %v2110_v57 = vrot.slane %v2055_v19, 2  ;;  %v2111_v60 = vrot.slane %v2055_v19, 3 }
 0x39a   :  { %v961_v3 = vpop.permute.xlu1 %960  ;;  %v2505_v30 = vmul.f32 0.01, %v2463_v27 }
 0x39b   :  { %v2206_v61 = vunpack.i.h.s16 %v2109_v7  ;;  %v5193_v40 = vpack.i.b16 %v2109_v7, %v2204_v35  ;;  %v1415_v26 = vsel %vm1389_vm13, %v1386_v43, %v961_v3  ;;  %v2208_v53 = vunpack.i.h.s16 %v2110_v57 }
 0x39c   :  { %vm2492_vm13 = vcmp.ge.f32.partialorder %v2463_v27, 0.0  ;;  %v2560_v7 = vrot.slane %v2517_v10, 6 }
 0x39d   :  { %v5194_v8 = vpack.i.b16 %v2110_v57, %v2206_v61  ;;  %2381 = vst [vmem:[#allocation1 + $0x6] ss:$9 sm:$0xff] %v5193_v40  ;;  %v5195_v5 = vpack.i.b16 %v2111_v60, %v2208_v53  ;;  %v2518_v35 = vsel %vm2492_vm13, %v2463_v27, %v2505_v30  ;;  %vm9585_vm13 = vmmov %vm9584_vm12 }
 0x39e   :  { %v995_v31 = vpop.permute.xlu0 %994  ;;  %v2562_v61 = vrot.slane %v2518_v35, 1  ;;  %v2563_v15 = vrot.slane %v2518_v35, 2  ;;  %v2566_v4 = vrot.slane %v2518_v35, 5  ;;  %v2567_v12 = vrot.slane %v2518_v35, 6 }
 0x39f   :  { %2383 = vst [vmem:[#allocation1 + $0x7] ss:$9 sm:$0xff] %v5194_v8  ;;  %v1444_v16 = vsel %vm1418_vm14, %v1415_v26, %v995_v31  ;;  %v2465_v56 = vpop.f32.mrf.mxu0  ;;  %v2564_v8 = vrot.slane %v2518_v35, 3  ;;  %v2568_v38 = vrot.slane %v2518_v35, 7 }
 0x3a2   :  { %v2024_v41 = vpop.permute.xlu1 %2023 }
 0x3a3   :  { %v2053_v63 = vsel %vm9580_vm4, %v1444_v16, %v2024_v41  ;;  %v2466_v16 = vadd.f32 %v8009_v52, %v2465_v56 }
 0x3a4   :  { %v2106_v2 = vrot.slane %v2053_v63, 1  ;;  %v2107_v62 = vrot.slane %v2053_v63, 2  ;;  %v2108_v34 = vrot.slane %v2053_v63, 3  ;;  %2373 = vst [vmem:[#allocation1 + $0x2] ss:$9 sm:$0xff] %v2053_v63 }
 0x3a5   :  { %vm2493_vm14 = vcmp.ge.f32.partialorder %v2466_v16, 0.0 }
 0x3a6   :  { %v5192_v58 = vpack.i.b16 %v2055_v19, %v2108_v34  ;;  %2375 = vst [vmem:[#allocation1 + $0x3] ss:$9 sm:$0xff] %v2106_v2 }
 0x3a7   :  { %2377 = vst [vmem:[#allocation1 + $0x4] ss:$9 sm:$0xff] %v2107_v62  ;;  %v2506_v62 = vmul.f32 0.01, %v2466_v16 }
 0x3a8   :  { %2379 = vst [vmem:[#allocation1 + $0x5] ss:$9 sm:$0xff] %v5192_v58  ;;  %v2565_v58 = vrot.slane %v2518_v35, 4 }
 0x3a9   :  { %v2519_v60 = vsel %vm2493_vm14, %v2466_v16, %v2506_v62  ;;  %vm3217_vm14 = vcmask 1040384  }
 0x3af   :  { %v2384_v39 = vld [vmem:[#allocation1] sm:$0xff] }
 0x3b0   :  { %2386 = vst [vmem:[#allocation1] ss:$9 sm:$0xff] %v5195_v5  ;;  %5225 = vmatmul.msk.bf16.gmra.mxu0 %vm9582_vm8, %v2384_v39 }
 0x3b7   :  { %v2387_v25 = vld [vmem:[#allocation1] sm:$0xff] }
 0x3b8   :  { %2626 = vst [vmem:[#allocation1] ss:$9 sm:$0xff] %v2515_v11 }
 0x3b9   :  { %2628 = vst [vmem:[#allocation1 + $0x1] ss:$9 sm:$0xff] %v2541_v17  ;;  %v2569_v17 = vrot.slane %v2519_v60, 1 }
 0x3ba   :  { %2630 = vst [vmem:[#allocation1 + $0x2] ss:$9 sm:$0xff] %v2542_v14  ;;  %v2467_v14 = vpop.f32.mrf.mxu0 }
 0x3bb   :  { %2632 = vst [vmem:[#allocation1 + $0x3] ss:$9 sm:$0xff] %v2543_v36  ;;  %v2468_v49 = vadd.f32 %v8009_v52, %v2467_v14 }
 0x3bc   :  { %2634 = vst [vmem:[#allocation1 + $0x4] ss:$9 sm:$0xff] %v2544_v59 }
 0x3bd   :  { %2636 = vst [vmem:[#allocation1 + $0x5] ss:$9 sm:$0xff] %v2545_v6  ;;  %vm2494_vm15 = vcmp.ge.f32.partialorder %v2468_v49, 0.0 }
 0x3be   :  { %2638 = vst [vmem:[#allocation1 + $0x6] ss:$9 sm:$0xff] %v2546_v28 }
 0x3c0   :  { %5226 = vmatmul.msk.bf16.gmra.mxu0 %vm9583_vm11, %v2387_v25  ;;  %v2570_v25 = vrot.slane %v2519_v60, 2  ;;  %vm3096_vm11 = vcmask 785408  }
 0x3c2   :  { %v2470_v27 = vpop.f32.mrf.mxu0 }
 0x3c5   :  { %v8015_v32 = vld [vmem:[#allocation1] sm:$0xff] }
 0x3c6   :  { %2640 = vst [vmem:[#allocation1] ss:$9 sm:$0xff] %v2547_v37  ;;  %v8045_v39 = vpack.c.bf16 %v8015_v32, %v8015_v32  ;;  %v2507_v32 = vmul.f32 0.01, %v2468_v49 }
 0x3c7   :  { %2641 = vst [vmem:[#allocation1 + $0x1] ss:$9 sm:$0xff] %v2516_v47 }
 0x3c8   :  { %2642 = vst [vmem:[#allocation1 + $0x2] ss:$9 sm:$0xff] %v2548_v50  ;;  %v2782_v59 = vunpack.c.l.b16 %v8045_v39  ;;  %v2573_v50 = vrot.slane %v2519_v60, 5  ;;  %v2520_v42 = vsel %vm2494_vm15, %v2468_v49, %v2507_v32  ;;  %vm3223_vm15 = vcmask 1041409  }
 0x3c9   :  { %2643 = vst [vmem:[#allocation1 + $0x3] ss:$9 sm:$0xff] %v2549_v18  ;;  %v2580_v56 = vrot.slane %v2520_v42, 5  ;;  %v2582_v16 = vrot.slane %v2520_v42, 7 }
 0x3ca   :  { %2644 = vst [vmem:[#allocation1 + $0x4] ss:$9 sm:$0xff] %v2550_v54  ;;  %v8058_v47 = vpack.c.b16 %v2782_v59, %v2782_v59  ;;  %v2574_v54 = vrot.slane %v2519_v60, 6 }
 0x3cb   :  { %2645 = vst [vmem:[#allocation1 + $0x5] ss:$9 sm:$0xff] %v2551_v20 }
 0x3cc   :  { %2646 = vst [vmem:[#allocation1 + $0x6] ss:$9 sm:$0xff] %v2552_v22  ;;  %v2805_v33 = vshll.u32 %v8058_v47, 16  ;;  %v2575_v22 = vrot.slane %v2519_v60, 7  ;;  %v2803_v55 = vshrl.u32 %v8058_v47, 16 }
 0x3d3   :  { %v2647_v13 = vld [vmem:[#allocation1] sm:$0xff] }
 0x3d4   :  { %2648 = vst [vmem:[#allocation1] ss:$9 sm:$0xff] %v2553_v23  ;;  %v8019_v29 = vpack.c.bf16 %v2647_v13, %v2647_v13  ;;  %v2571_v23 = vrot.slane %v2519_v60, 3  ;;  %v2572_v13 = vrot.slane %v2519_v60, 4 }
 0x3d5   :  { %2649 = vst [vmem:[#allocation1 + $0x1] ss:$9 sm:$0xff] %v2554_v0  ;;  %v2807_v0 = vrot.slane %v2805_v33, 1 }
 0x3d6   :  { %2650 = vst [vmem:[#allocation1 + $0x2] ss:$9 sm:$0xff] %v2517_v10  ;;  %v2783_v19 = vunpack.c.l.b16 %v8019_v29 }
 0x3d7   :  { %2651 = vst [vmem:[#allocation1 + $0x3] ss:$9 sm:$0xff] %v2555_v48  ;;  %v2576_v48 = vrot.slane %v2520_v42, 1 }
 0x3d8   :  { %2652 = vst [vmem:[#allocation1 + $0x4] ss:$9 sm:$0xff] %v2556_v44  ;;  %v8022_v57 = vpack.c.b16 %v2783_v19, %v2783_v19  ;;  %v2577_v19 = vrot.slane %v2520_v42, 2 }
 0x3d9   :  { %2653 = vst [vmem:[#allocation1 + $0x5] ss:$9 sm:$0xff] %v2557_v51  ;;  %v2808_v51 = vor.u32 %v2807_v0, %v2803_v55 }
 0x3da   :  { %2654 = vst [vmem:[#allocation1 + $0x6] ss:$9 sm:$0xff] %v2558_v21  ;;  %v2812_v40 = vshll.u32 %v8022_v57, 16  ;;  %v2810_v31 = vshrl.u32 %v8022_v57, 16  ;;  %v2893_v36 = vrot.slane %v8022_v57, 1 }
 0x3dc   :  { %v2814_v43 = vrot.slane %v2812_v40, 1 }
 0x3de   :  { %v8029_v41 = vor.u32 %v2814_v43, %v2810_v31  ;;  %v2581_v31 = vrot.slane %v2520_v42, 6 }
 0x3e0   :  { %2874 = vrot.lane.b32.xlu1 %v8029_v41, %s9336_s23 }
 0x3e1   :  { %v2655_v3 = vld [vmem:[#allocation1] sm:$0xff] }
 0x3e2   :  { %2656 = vst [vmem:[#allocation1] ss:$9 sm:$0xff] %v2559_v24  ;;  %v8026_v26 = vpack.c.bf16 %v2655_v3, %v2655_v3  ;;  %v2471_v24 = vadd.f32 %v8009_v52, %v2470_v27  ;;  %v2578_v3 = vrot.slane %v2520_v42, 3 }
 0x3e3   :  { %2657 = vst [vmem:[#allocation1 + $0x1] ss:$9 sm:$0xff] %v2560_v7 }
 0x3e4   :  { %2658 = vst [vmem:[#allocation1 + $0x2] ss:$9 sm:$0xff] %v2561_v9  ;;  %v2784_v63 = vunpack.c.l.b16 %v8026_v26  ;;  %vm2495_vm5 = vcmp.ge.f32.partialorder %v2471_v24, 0.0 }
 0x3e5   :  { %2659 = vst [vmem:[#allocation1 + $0x3] ss:$9 sm:$0xff] %v2518_v35 }
 0x3e6   :  { %2660 = vst [vmem:[#allocation1 + $0x4] ss:$9 sm:$0xff] %v2562_v61  ;;  %v8034_v2 = vpack.c.b16 %v2784_v63, %v2784_v63  ;;  %v2579_v61 = vrot.slane %v2520_v42, 4 }
 0x3e7   :  { %2661 = vst [vmem:[#allocation1 + $0x5] ss:$9 sm:$0xff] %v2563_v15 }
 0x3e8   :  { %2662 = vst [vmem:[#allocation1 + $0x6] ss:$9 sm:$0xff] %v2564_v8  ;;  %v8037_v34 = vrot.slane %v8034_v2, 1  ;;  %v2819_v21 = vshll.u32 %v8034_v2, 16  ;;  %v2817_v7 = vshrl.u32 %v8034_v2, 16 }
 0x3e9   :  { %v2508_v8 = vmul.f32 0.01, %v2471_v24 }
 0x3ea   :  { %2966 = vrot.lane.b32.xlu2 %v8037_v34, %s9336_s23  ;;  %v2821_v30 = vrot.slane %v2819_v21, 1 }
 0x3eb   :  { %v2521_v62 = vsel %vm2495_vm5, %v2471_v24, %v2508_v8  ;;  %vm3229_vm5 = vcmask 1042434  }
 0x3ec   :  { %v8088_v40 = vor.u32 %v2821_v30, %v2817_v7  ;;  %v2586_v14 = vrot.slane %v2521_v62, 4  ;;  %v2588_v49 = vrot.slane %v2521_v62, 6 }
 0x3ef   :  { %v2663_v53 = vld [vmem:[#allocation1] sm:$0xff] }
 0x3f0   :  { %2664 = vst [vmem:[#allocation1] ss:$9 sm:$0xff] %v2565_v58  ;;  %v8041_v5 = vpack.c.bf16 %v2663_v53, %v2663_v53 }
 0x3f1   :  { %2665 = vst [vmem:[#allocation1 + $0x1] ss:$9 sm:$0xff] %v2566_v4  ;;  %v2892_v4 = vrot.slane %v8058_v47, 1 }
 0x3f2   :  { %2666 = vst [vmem:[#allocation1 + $0x2] ss:$9 sm:$0xff] %v2567_v12  ;;  %v2785_v11 = vunpack.c.l.b16 %v8041_v5  ;;  %2964 = vrot.lane.b32.xlu2 %v2893_v36, %s9336_s23  ;;  %v2583_v12 = vrot.slane %v2521_v62, 1 }
 0x3f3   :  { %2667 = vst [vmem:[#allocation1 + $0x3] ss:$9 sm:$0xff] %v2568_v38  ;;  %v2584_v38 = vrot.slane %v2521_v62, 2 }
 0x3f4   :  { %2668 = vst [vmem:[#allocation1 + $0x4] ss:$9 sm:$0xff] %v2519_v60  ;;  %v8048_v1 = vpack.c.b16 %v2785_v11, %v2785_v11 }
 0x3f5   :  { %2669 = vst [vmem:[#allocation1 + $0x5] ss:$9 sm:$0xff] %v2569_v17  ;;  %v2472_v17 = vpop.f32.mrf.mxu0 }
 0x3f6   :  { %2670 = vst [vmem:[#allocation1 + $0x6] ss:$9 sm:$0xff] %v2570_v25  ;;  %2992 = vrot.lane.b32.xlu0 %v8048_v1, %s9439_s28  ;;  %v2826_v6 = vshll.u32 %v8048_v1, 16  ;;  %v2824_v28 = vshrl.u32 %v8048_v1, 16  ;;  %v8065_v18 = vrot.slane %v8048_v1, 1  ;;  %v2585_v25 = vrot.slane %v2521_v62, 3 }
 0x3f7   :  { %v2473_v59 = vadd.f32 %v8009_v52, %v2472_v17 }
 0x3f8   :  { %v2828_v46 = vrot.slane %v2826_v6, 1 }
 0x3f9   :  { %vm2496_vm1 = vcmp.ge.f32.partialorder %v2473_v59, 0.0 }
 0x3fa   :  { %v8060_v37 = vor.u32 %v2828_v46, %v2824_v28  ;;  %2904 = vrot.lane.b32.xlu2 %v2893_v36, %s9439_s28  ;;  %v2587_v36 = vrot.slane %v2521_v62, 5  ;;  %v2589_v28 = vrot.slane %v2521_v62, 7  ;;  %v2509_v46 = vmul.f32 0.01, %v2473_v59 }
 0x3fc   :  { %3026 = vrot.lane.b32.xlu1 %v8060_v37, %s5690_s29 }
 0x3fd   :  { %v2671_v20 = vld [vmem:[#allocation1] sm:$0xff] }
 0x3fe   :  { %2674 = vst [vmem:[#allocation1 + $0x2] ss:$9 sm:$0xff] %v2573_v50  ;;  %2968 = vrot.lane.b32.xlu0 %v8065_v18, %s9336_s23  ;;  %v8071_v45 = vpack.c.bf16 %v2671_v20, %v2671_v20  ;;  %v2522_v50 = vsel %vm2496_vm1, %v2473_v59, %v2509_v46  ;;  %vm3225_vm1 = vcmask 1042433  }
 0x3ff   :  { %2675 = vst [vmem:[#allocation1 + $0x3] ss:$9 sm:$0xff] %v2574_v54  ;;  %v2590_v20 = vrot.slane %v2522_v50, 1  ;;  %v2593_v0 = vrot.slane %v2522_v50, 4  ;;  %v2596_v7 = vrot.slane %v2522_v50, 7 }
 0x400   :  { %2676 = vst [vmem:[#allocation1 + $0x4] ss:$9 sm:$0xff] %v2575_v22  ;;  %v2786_v10 = vunpack.c.l.b16 %v8071_v45  ;;  %v2591_v22 = vrot.slane %v2522_v50, 2 }
 0x401   :  { %2677 = vst [vmem:[#allocation1 + $0x5] ss:$9 sm:$0xff] %v2520_v42  ;;  %v2475_v42 = vpop.f32.mrf.mxu0 }
 0x402   :  { %2672 = vst [vmem:[#allocation1] ss:$9 sm:$0xff] %v2571_v23  ;;  %v8074_v44 = vpack.c.b16 %v2786_v10, %v2786_v10  ;;  %2872 = vrot.lane.b32.xlu2 %v2808_v51, %s9336_s23  ;;  %v2592_v10 = vrot.slane %v2522_v50, 3 }
 0x403   :  { %2673 = vst [vmem:[#allocation1 + $0x1] ss:$9 sm:$0xff] %v2572_v13  ;;  %v2594_v13 = vrot.slane %v2522_v50, 5 }
 0x404   :  { %2678 = vst [vmem:[#allocation1 + $0x6] ss:$9 sm:$0xff] %v2576_v48  ;;  %2994 = vrot.lane.b32.xlu1 %v8074_v44, %s9439_s28  ;;  %v2833_v35 = vshll.u32 %v8074_v44, 16  ;;  %v8091_v15 = vrot.slane %v8074_v44, 1  ;;  %v2831_v63 = vshrl.u32 %v8074_v44, 16  ;;  %v2595_v48 = vrot.slane %v2522_v50, 6 }
 0x406   :  { %2990 = vrot.lane.b32.xlu0 %v8034_v2, %s9439_s28  ;;  %v2835_v43 = vrot.slane %v2833_v35, 1 }
 0x408   :  { %v8098_v58 = vor.u32 %v2835_v43, %v2831_v63 }
 0x40a   :  { %2970 = vrot.lane.b32.xlu2 %v8091_v15, %s9336_s23 }
 0x40b   :  { %v2679_v9 = vld [vmem:[#allocation1] sm:$0xff] }
 0x40c   :  { %2680 = vst [vmem:[#allocation1] ss:$9 sm:$0xff] %v2577_v19  ;;  %2930 = vrot.lane.b32.xlu1 %v8034_v2, %s5690_s29  ;;  %v2763_v2 = vpack.c.bf16 %v2679_v9, %v2679_v9 }
 0x40d   :  { %2681 = vst [vmem:[#allocation1 + $0x1] ss:$9 sm:$0xff] %v2578_v3 }
 0x40e   :  { %2682 = vst [vmem:[#allocation1 + $0x2] ss:$9 sm:$0xff] %v2579_v61  ;;  %2876 = vrot.lane.b32.xlu0 %v8088_v40, %s9336_s23  ;;  %v2924_v53 = vunpack.c.l.b16 %v2763_v2 }
 0x40f   :  { %2683 = vst [vmem:[#allocation1 + $0x3] ss:$9 sm:$0xff] %v2580_v56 }
 0x410   :  { %2684 = vst [vmem:[#allocation1 + $0x4] ss:$9 sm:$0xff] %v2581_v31  ;;  %v8106_v60 = vpack.c.b16 %v2924_v53, %v2924_v53 }
 0x411   :  { %2685 = vst [vmem:[#allocation1 + $0x5] ss:$9 sm:$0xff] %v2582_v16 }
 0x412   :  { %2686 = vst [vmem:[#allocation1 + $0x6] ss:$9 sm:$0xff] %v2521_v62  ;;  %2902 = vrot.lane.b32.xlu2 %v2892_v4, %s9439_s28  ;;  %v2951_v6 = vshll.u32 %v8106_v60, 16  ;;  %v2949_v32 = vshrl.u32 %v8106_v60, 16  ;;  %v2962_v59 = vrot.slane %v8106_v60, 1 }
 0x414   :  { %3028 = vrot.lane.b32.xlu1 %v8098_v58, %s5690_s29  ;;  %v2953_v47 = vrot.slane %v2951_v6, 1 }
 0x416   :  { %3024 = vrot.lane.b32.xlu0 %v8088_v40, %s5690_s29  ;;  %v8121_v33 = vor.u32 %v2953_v47, %v2949_v32 }
 0x419   :  { %v8108_v11 = vld [vmem:[#allocation1] sm:$0xff] }
 0x41a   :  { %2688 = vst [vmem:[#allocation1] ss:$9 sm:$0xff] %v2583_v12  ;;  %2878 = vrot.lane.b32.xlu2 %v8060_v37, %s9336_s23  ;;  %v2764_v12 = vpack.c.bf16 %v8108_v11, %v8108_v11 }
 0x41b   :  { %2689 = vst [vmem:[#allocation1 + $0x1] ss:$9 sm:$0xff] %v2584_v38 }
 0x41c   :  { %2690 = vst [vmem:[#allocation1 + $0x2] ss:$9 sm:$0xff] %v2585_v25  ;;  %2996 = vrot.lane.b32.xlu1 %v8106_v60, %s9439_s28  ;;  %v2986_v6 = vunpack.c.l.b16 %v2764_v12 }
 0x41d   :  { %2691 = vst [vmem:[#allocation1 + $0x3] ss:$9 sm:$0xff] %v2586_v14 }
 0x41e   :  { %2692 = vst [vmem:[#allocation1 + $0x4] ss:$9 sm:$0xff] %v2587_v36  ;;  %2906 = vrot.lane.b32.xlu0 %v8037_v34, %s9439_s28 }
 0x41f   :  { %2693 = vst [vmem:[#allocation1 + $0x5] ss:$9 sm:$0xff] %v2588_v49 }
 0x420   :  { %2694 = vst [vmem:[#allocation1 + $0x6] ss:$9 sm:$0xff] %v2589_v28 }
 0x422   :  { %3030 = vrot.lane.b32.xlu2 %v8121_v33, %s5690_s29 }
 0x424   :  { %2932 = vrot.lane.b32.xlu1 %v8048_v1, %s5690_s29 }
 0x426   :  { %2928 = vrot.lane.b32.xlu0 %v8022_v57, %s5690_s29  ;;  %v2476_v57 = vadd.f32 %v8009_v52, %v2475_v42 }
 0x427   :  { %v2695_v54 = vld [vmem:[#allocation1] sm:$0xff] }
 0x428   :  { %2696 = vst [vmem:[#allocation1] ss:$9 sm:$0xff] %v2522_v50  ;;  %v8127_v23 = vpack.c.bf16 %v2695_v54, %v2695_v54  ;;  %v2510_v21 = vmul.f32 0.01, %v2476_v57  ;;  %vm2497_vm2 = vcmp.ge.f32.partialorder %v2476_v57, 0.0  ;;  %v8159_v54 = vpack.c.b16 %v2986_v6, %v2986_v6 }
 0x429   :  { %2697 = vst [vmem:[#allocation1 + $0x1] ss:$9 sm:$0xff] %v2590_v20 }
 0x42a   :  { %2698 = vst [vmem:[#allocation1 + $0x2] ss:$9 sm:$0xff] %v2591_v22  ;;  %v2787_v1 = vunpack.c.l.b16 %v8127_v23  ;;  %v2523_v19 = vsel %vm2497_vm2, %v2476_v57, %v2510_v21  ;;  %vm3231_vm2 = vcmask 1043458  }
 0x42b   :  { %2699 = vst [vmem:[#allocation1 + $0x3] ss:$9 sm:$0xff] %v2592_v10  ;;  %v2597_v3 = vrot.slane %v2523_v19, 1  ;;  %v2598_v61 = vrot.slane %v2523_v19, 2  ;;  %v2599_v56 = vrot.slane %v2523_v19, 3  ;;  %v2600_v31 = vrot.slane %v2523_v19, 4 }
 0x42c   :  { %2700 = vst [vmem:[#allocation1 + $0x4] ss:$9 sm:$0xff] %v2593_v0  ;;  %2934 = vrot.lane.b32.xlu1 %v8074_v44, %s5690_s29  ;;  %v2797_v55 = vpack.c.b16 %v2787_v1, %v2787_v1  ;;  %v2477_v44 = vpop.f32.mrf.mxu0  ;;  %v2601_v43 = vrot.slane %v2523_v19, 5  ;;  %v2602_v38 = vrot.slane %v2523_v19, 6  ;;  %v2603_v25 = vrot.slane %v2523_v19, 7 }
 0x42d   :  { %2701 = vst [vmem:[#allocation1 + $0x5] ss:$9 sm:$0xff] %v2594_v13  ;;  %v2478_v16 = vadd.f32 %v8009_v52, %v2477_v44  ;;  %v3013_v1 = vshll.u32 %v8159_v54, 16 }
 0x42e   :  { %2702 = vst [vmem:[#allocation1 + $0x6] ss:$9 sm:$0xff] %v2595_v48  ;;  %2908 = vrot.lane.b32.xlu0 %v8065_v18, %s9439_s28  ;;  %v2840_v51 = vshll.u32 %v2797_v55, 16  ;;  %v2838_v27 = vshrl.u32 %v2797_v55, 16  ;;  %v2897_v2 = vrot.slane %v2797_v55, 1 }
 0x42f   :  { %v2511_v4 = vmul.f32 0.01, %v2478_v16  ;;  %vm2498_vm4 = vcmp.ge.f32.partialorder %v2478_v16, 0.0 }
 0x430   :  { %v2842_v30 = vrot.slane %v2840_v51, 1 }
 0x431   :  { %v2524_v17 = vsel %vm2498_vm4, %v2478_v16, %v2511_v4  ;;  %vm9586_vm4 = vcmask 1041408  }
 0x432   :  { %v2843_v24 = vor.u32 %v2842_v30, %v2838_v27  ;;  %v2604_v49 = vrot.slane %v2524_v17, 1  ;;  %v2605_v28 = vrot.slane %v2524_v17, 2  ;;  %v2606_v11 = vrot.slane %v2524_v17, 3 }
 0x433   :  { %v2607_v32 = vrot.slane %v2524_v17, 4  ;;  %v2608_v51 = vrot.slane %v2524_v17, 5  ;;  %v3015_v27 = vrot.slane %v3013_v1, 1 }
 0x434   :  { %2882 = vrot.lane.b32.xlu1 %v2843_v24, %s9336_s23  ;;  %v2480_v53 = vpop.f32.mrf.mxu0  ;;  %v2609_v24 = vrot.slane %v2524_v17, 6 }
 0x435   :  { %v2703_v35 = vld [vmem:[#allocation1] sm:$0xff]  ;;  %v2481_v47 = vadd.f32 %v8009_v52, %v2480_v53 }
 0x436   :  { %2704 = vst [vmem:[#allocation1] ss:$9 sm:$0xff] %v2596_v7  ;;  %v8136_v9 = vpack.c.bf16 %v2703_v35, %v2703_v35 }
 0x437   :  { %2705 = vst [vmem:[#allocation1 + $0x1] ss:$9 sm:$0xff] %v2523_v19  ;;  %v2512_v10 = vmul.f32 0.01, %v2481_v47  ;;  %vm2499_vm8 = vcmp.ge.f32.partialorder %v2481_v47, 0.0  ;;  %v2610_v19 = vrot.slane %v2524_v17, 7 }
 0x438   :  { %2706 = vst [vmem:[#allocation1 + $0x2] ss:$9 sm:$0xff] %v2597_v3  ;;  %v2788_v8 = vunpack.c.l.b16 %v8136_v9  ;;  %v3011_v3 = vshrl.u32 %v8159_v54, 16 }
 0x439   :  { %2707 = vst [vmem:[#allocation1 + $0x3] ss:$9 sm:$0xff] %v2598_v61  ;;  %v2525_v55 = vsel %vm2499_vm8, %v2481_v47, %v2512_v10  ;;  %vm9588_vm8 = vmmov %vm9584_vm12 }
 0x43a   :  { %2708 = vst [vmem:[#allocation1 + $0x4] ss:$9 sm:$0xff] %v2599_v56  ;;  %v8140_v63 = vpack.c.b16 %v2788_v8, %v2788_v8  ;;  %v2611_v35 = vrot.slane %v2525_v55, 1  ;;  %v2612_v8 = vrot.slane %v2525_v55, 2 }
 0x43b   :  { %2709 = vst [vmem:[#allocation1 + $0x5] ss:$9 sm:$0xff] %v2600_v31  ;;  %v2613_v31 = vrot.slane %v2525_v55, 3 }
 0x43c   :  { %2710 = vst [vmem:[#allocation1 + $0x6] ss:$9 sm:$0xff] %v2601_v43  ;;  %v2898_v62 = vrot.slane %v8140_v63, 1  ;;  %2912 = vrot.lane.b32.xlu1 %v2897_v2, %s9439_s28  ;;  %v2482_v20 = vpop.f32.mrf.mxu0  ;;  %v2847_v42 = vshll.u32 %v8140_v63, 16  ;;  %v2845_v30 = vshrl.u32 %v8140_v63, 16  ;;  %v3016_v43 = vor.u32 %v3015_v27, %v3011_v3 }
 0x43d   :  { %v2483_v2 = vadd.f32 %v8009_v52, %v2482_v20 }
 0x43e   :  { %2974 = vrot.lane.b32.xlu2 %v2898_v62, %s9336_s23  ;;  %v2849_v48 = vrot.slane %v2847_v42, 1 }
 0x43f   :  { %v2513_v12 = vmul.f32 0.01, %v2483_v2  ;;  %vm2500_vm9 = vcmp.ge.f32.partialorder %v2483_v2, 0.0 }
 0x440   :  { %v8176_v44 = vor.u32 %v2849_v48, %v2845_v30 }
 0x441   :  { %v2526_v6 = vsel %vm2500_vm9, %v2483_v2, %v2513_v12  ;;  %vm9589_vm9 = vmmov %vm9588_vm8 }
 0x442   :  { %v2618_v20 = vrot.slane %v2526_v6, 1  ;;  %v2619_v42 = vrot.slane %v2526_v6, 2  ;;  %v2621_v3 = vrot.slane %v2526_v6, 4  ;;  %v2624_v2 = vrot.slane %v2526_v6, 7 }
 0x443   :  { %v2711_v14 = vld [vmem:[#allocation1] sm:$0xff] }
 0x444   :  { %2712 = vst [vmem:[#allocation1] ss:$9 sm:$0xff] %v2602_v38  ;;  %v8149_v36 = vpack.c.bf16 %v2711_v14, %v2711_v14  ;;  %2938 = vrot.lane.b32.xlu1 %v8140_v63, %s5690_s29  ;;  %v8166_v13 = vpop.permute.xlu2 %2966  ;;  %v2485_v61 = vpop.f32.mrf.mxu0  ;;  %v2614_v14 = vrot.slane %v2525_v55, 4 }
 0x445   :  { %2713 = vst [vmem:[#allocation1 + $0x1] ss:$9 sm:$0xff] %v2603_v25  ;;  %v3122_v63 = vsel %vm1215_vm7, %v8088_v40, %v8166_v13 }
 0x446   :  { %2714 = vst [vmem:[#allocation1 + $0x2] ss:$9 sm:$0xff] %v2524_v17  ;;  %v2789_v46 = vunpack.c.l.b16 %v8149_v36  ;;  %2972 = vrot.lane.b32.xlu2 %v2962_v59, %s9336_s23 }
 0x447   :  { %2715 = vst [vmem:[#allocation1 + $0x3] ss:$9 sm:$0xff] %v2604_v49  ;;  %v2615_v49 = vrot.slane %v2525_v55, 5 }
 0x448   :  { %2716 = vst [vmem:[#allocation1 + $0x4] ss:$9 sm:$0xff] %v2605_v28  ;;  %v2799_v50 = vpack.c.b16 %v2789_v46, %v2789_v46  ;;  %v2616_v46 = vrot.slane %v2525_v55, 6 }
 0x449   :  { %2717 = vst [vmem:[#allocation1 + $0x5] ss:$9 sm:$0xff] %v2606_v11 }
 0x44a   :  { %2718 = vst [vmem:[#allocation1 + $0x6] ss:$9 sm:$0xff] %v2607_v32  ;;  %3000 = vrot.lane.b32.xlu0 %v2799_v50, %s9439_s28  ;;  %v2854_v22 = vshll.u32 %v2799_v50, 16  ;;  %v2852_v57 = vshrl.u32 %v2799_v50, 16  ;;  %v8191_v17 = vrot.slane %v2799_v50, 1  ;;  %v2617_v32 = vrot.slane %v2525_v55, 7 }
 0x44c   :  { %v2856_v0 = vrot.slane %v2854_v22, 1  ;;  %2936 = vrot.lane.b32.xlu1 %v8106_v60, %s5690_s29  ;;  %v8185_v4 = vpop.permute.xlu2 %2964  ;;  %v2487_v38 = vpop.f32.mrf.mxu0 }
 0x44e   :  { %2998 = vrot.lane.b32.xlu2 %v8159_v54, %s9439_s28  ;;  %v8170_v21 = vor.u32 %v2856_v0, %v2852_v57  ;;  %v2486_v57 = vadd.f32 %v8009_v52, %v2485_v61  ;;  %v2620_v52 = vrot.slane %v2526_v6, 3 }
 0x450   :  { %vm2501_vm10 = vcmp.ge.f32.partialorder %v2486_v57, 0.0 }
 0x451   :  { %v2719_v7 = vld [vmem:[#allocation1] sm:$0xff] }
 0x452   :  { %2720 = vst [vmem:[#allocation1] ss:$9 sm:$0xff] %v2608_v51  ;;  %3034 = vrot.lane.b32.xlu0 %v8170_v21, %s5690_s29  ;;  %v8178_v56 = vpack.c.bf16 %v2719_v7, %v2719_v7  ;;  %v2875_v48 = vpop.permute.xlu1 %2874 }
 0x453   :  { %2721 = vst [vmem:[#allocation1 + $0x1] ss:$9 sm:$0xff] %v2609_v24  ;;  %v2514_v24 = vmul.f32 0.01, %v2486_v57 }
 0x454   :  { %2722 = vst [vmem:[#allocation1 + $0x2] ss:$9 sm:$0xff] %v2610_v19  ;;  %2884 = vrot.lane.b32.xlu1 %v8176_v44, %s9336_s23  ;;  %v2790_v16 = vunpack.c.l.b16 %v8178_v56  ;;  %v8199_v22 = vpop.permute.xlu2 %2904 }
 0x455   :  { %2723 = vst [vmem:[#allocation1 + $0x3] ss:$9 sm:$0xff] %v2525_v55 }
 0x456   :  { %2724 = vst [vmem:[#allocation1 + $0x4] ss:$9 sm:$0xff] %v2611_v35  ;;  %3032 = vrot.lane.b32.xlu2 %v3016_v43, %s5690_s29  ;;  %v8187_v53 = vpack.c.b16 %v2790_v16, %v2790_v16  ;;  %v2623_v16 = vrot.slane %v2526_v6, 6 }
 0x457   :  { %2725 = vst [vmem:[#allocation1 + $0x5] ss:$9 sm:$0xff] %v2612_v8  ;;  %v2527_v8 = vsel %vm2501_vm10, %v2486_v57, %v2514_v24  ;;  %vm9590_vm10 = vmmov %vm9588_vm8 }
 0x458   :  { %2726 = vst [vmem:[#allocation1 + $0x6] ss:$9 sm:$0xff] %v2613_v31  ;;  %v2861_v25 = vshll.u32 %v8187_v53, 16  ;;  %v8223_v35 = vrot.slane %v8187_v53, 1  ;;  %v2622_v31 = vrot.slane %v2526_v6, 5  ;;  %v2625_v12 = vrot.slane %v2527_v8, 1 }
 0x45a   :  { %2880 = vrot.lane.b32.xlu0 %v8098_v58, %s9336_s23  ;;  %v2863_v11 = vrot.slane %v2861_v25, 1 }
 0x45c   :  { %2940 = vrot.lane.b32.xlu1 %v2799_v50, %s5690_s29  ;;  %v2859_v50 = vshrl.u32 %v8187_v53, 16  ;;  %v8220_v7 = vpop.permute.xlu2 %2872 }
 0x45e   :  { %2976 = vrot.lane.b32.xlu2 %v8191_v17, %s9336_s23  ;;  %v8205_v0 = vor.u32 %v2863_v11, %v2859_v50 }
 0x45f   :  { %v2727_v28 = vld [vmem:[#allocation1] sm:$0xff] }
 0x460   :  { %2728 = vst [vmem:[#allocation1] ss:$9 sm:$0xff] %v2614_v14  ;;  %v8197_v47 = vpack.c.bf16 %v2727_v28, %v2727_v28 }
 0x461   :  { %2729 = vst [vmem:[#allocation1 + $0x1] ss:$9 sm:$0xff] %v2615_v49 }
 0x462   :  { %2730 = vst [vmem:[#allocation1 + $0x2] ss:$9 sm:$0xff] %v2616_v46  ;;  %2910 = vrot.lane.b32.xlu0 %v8091_v15, %s9439_s28  ;;  %v2791_v10 = vunpack.c.l.b16 %v8197_v47 }
 0x463   :  { %2731 = vst [vmem:[#allocation1 + $0x3] ss:$9 sm:$0xff] %v2617_v32 }
 0x464   :  { %2732 = vst [vmem:[#allocation1 + $0x4] ss:$9 sm:$0xff] %v2526_v6  ;;  %2886 = vrot.lane.b32.xlu1 %v8170_v21, %s9336_s23  ;;  %v8209_v1 = vpack.c.b16 %v2791_v10, %v2791_v10  ;;  %v8237_v49 = vpop.permute.xlu2 %2970 }
 0x465   :  { %2733 = vst [vmem:[#allocation1 + $0x5] ss:$9 sm:$0xff] %v2618_v20 }
 0x466   :  { %2734 = vst [vmem:[#allocation1 + $0x6] ss:$9 sm:$0xff] %v2619_v42  ;;  %3036 = vrot.lane.b32.xlu2 %v8205_v0, %s5690_s29  ;;  %v2868_v55 = vshll.u32 %v8209_v1, 16  ;;  %v2866_v27 = vshrl.u32 %v8209_v1, 16  ;;  %v8235_v14 = vrot.slane %v8209_v1, 1 }
 0x468   :  { %v2993_v51 = vpop.permute.xlu0 %2992  ;;  %v2870_v30 = vrot.slane %v2868_v55, 1  ;;  %v3200_v55 = vrot.slane %v8065_v18, 6 }
 0x469   :  { %v3150_v11 = vsel %vm9584_vm12, %v3122_v63, %v2993_v51  ;;  %v5551_v63 = vld [vmem:[%s9587_s25 + $0x30] sm:$0xff]  ;;  %vm9591_vm12 = vmmov %vm9588_vm8 }
 0x46a   :  { %3002 = vrot.lane.b32.xlu0 %v8187_v53, %s9439_s28  ;;  %v8218_v19 = vor.u32 %v2870_v30, %v2866_v27 }
 0x46c   :  { %3038 = vrot.lane.b32.xlu1 %v8218_v19, %s5690_s29 }
 0x46d   :  { %v2735_v61 = vld [vmem:[#allocation1] sm:$0xff] }
 0x46e   :  { %2736 = vst [vmem:[#allocation1] ss:$9 sm:$0xff] %v2620_v52  ;;  %2978 = vrot.lane.b32.xlu2 %v8223_v35, %s9336_s23  ;;  %v3027_v43 = vpop.permute.xlu1 %3026  ;;  %v2770_v25 = vpack.c.bf16 %v2735_v61, %v2735_v61 }
 0x46f   :  { %2737 = vst [vmem:[#allocation1 + $0x1] ss:$9 sm:$0xff] %v2621_v3  ;;  %v3170_v20 = vsel %vm3096_vm11, %v3150_v11, %v3027_v43  ;;  %v5552_v43 = vld [vmem:[%s9587_s25 + $0x38] sm:$0xff] }
 0x470   :  { %2738 = vst [vmem:[#allocation1 + $0x2] ss:$9 sm:$0xff] %v2622_v31  ;;  %v8229_v38 = vpop.permute.xlu0 %2968  ;;  %v2925_v28 = vunpack.c.l.b16 %v2770_v25  ;;  %v3199_v40 = vrot.slane %v3170_v20, 7  ;;  %3660 = vmatpush.bf16.msra.mxu1 %v5552_v43 }
 0x471   :  { %2739 = vst [vmem:[#allocation1 + $0x3] ss:$9 sm:$0xff] %v2623_v16  ;;  %v5560_v16 = vld [vmem:[%s9587_s25 + $0x78] sm:$0xff] }
 0x472   :  { %2740 = vst [vmem:[#allocation1 + $0x4] ss:$9 sm:$0xff] %v2624_v2  ;;  %2914 = vrot.lane.b32.xlu0 %v2898_v62, %s9439_s28  ;;  %v3051_v62 = vsel %vm1215_vm7, %v8019_v29, %v2875_v48  ;;  %v8254_v42 = vpack.c.b16 %v2925_v28, %v2925_v28  ;;  %v8261_v48 = vpop.permute.xlu2 %2902  ;;  %3688 = vmatpush.bf16.msra.mxu2 %v5560_v16 }
 0x473   :  { %2741 = vst [vmem:[#allocation1 + $0x5] ss:$9 sm:$0xff] %v2527_v8  ;;  %v3079_v10 = vsel %vm9585_vm13, %v3051_v62, %v8199_v22  ;;  %v5559_v62 = vld [vmem:[%s9587_s25 + $0x70] sm:$0xff]  ;;  %vm9592_vm13 = vmmov %vm9586_vm4 }
 0x474   :  { %2742 = vst [vmem:[#allocation1 + $0x6] ss:$9 sm:$0xff] %v2625_v12  ;;  %v2963_v57 = vrot.slane %v8254_v42, 1  ;;  %v2958_v28 = vshll.u32 %v8254_v42, 16  ;;  %3661 = vmatpush.bf16.msra.mxu1 %v5551_v63 }
 0x476   :  { %2980 = vrot.lane.b32.xlu2 %v8235_v14, %s9336_s23  ;;  %v8241_v6 = vpop.permute.xlu1 %2994  ;;  %v2960_v20 = vrot.slane %v2958_v28, 1  ;;  %3689 = vmatpush.bf16.msra.mxu2 %v5559_v62 }
 0x478   :  { %v8243_v46 = vpop.permute.xlu0 %2990 }
 0x47a   :  { %3004 = vrot.lane.b32.xlu0 %v8209_v1, %s9439_s28 }
 0x47b   :  { %v2743_v32 = vld [vmem:[#allocation1] sm:$0xff] }
 0x47c   :  { %v2771_v50 = vpack.c.bf16 %v2743_v32, %v2743_v32 }
 0x47e   :  { %2916 = vrot.lane.b32.xlu2 %v8191_v17, %s9439_s28  ;;  %v2987_v29 = vunpack.c.l.b16 %v2771_v50  ;;  %v2931_v13 = vpop.permute.xlu1 %2930 }
 0x47f   :  { %v3100_v51 = vsel %vm3096_vm11, %v3079_v10, %v2931_v13  ;;  %v5550_v10 = vld [vmem:[%s9587_s25 + $0x28] sm:$0xff]  ;;  %v2956_v13 = vshrl.u32 %v8254_v42, 16 }
 0x480   :  { %v8265_v22 = vpack.c.b16 %v2987_v29, %v2987_v29  ;;  %v3236_v27 = vsel %vm3217_vm14, %v3100_v51, %v3199_v40  ;;  %v3240_v30 = vsel %vm3223_vm15, %v3100_v51, %v3199_v40  ;;  %v3244_v24 = vsel %vm3229_vm5, %v3100_v51, %v3199_v40  ;;  %v2877_v52 = vpop.permute.xlu0 %2876  ;;  %v5558_v40 = vld [vmem:[%s9587_s25 + $0x68] sm:$0xff]  ;;  %v8302_v29 = vpop.permute.xlu2 %2878  ;;  %3662 = vmatpush.bf16.msra.mxu1 %v5550_v10  ;;  %v5549_v51 = vld [vmem:[%s9587_s25 + $0x20] sm:$0xff] }
 0x481   :  { %v8271_v3 = vsel %vm9586_vm4, %v3236_v27, %v3200_v55  ;;  %v3241_v61 = vsel %vm3225_vm1, %v3240_v30, %v3200_v55  ;;  %v3245_v8 = vsel %vm3231_vm2, %v3244_v24, %v3200_v55  ;;  %v8309_v55 = vor.u32 %v2960_v20, %v2956_v13  ;;  %3690 = vmatpush.bf16.msra.mxu2 %v5558_v40  ;;  %v5557_v27 = vld [vmem:[%s9587_s25 + $0x60] sm:$0xff]  ;;  %v5546_v40 = vld [vmem:[%s9587_s25 + $0x8] sm:$0xff]  ;;  %vm9593_vm4 = vmmov %vm9588_vm8 }
 0x482   :  { %2982 = vrot.lane.b32.xlu0 %v2963_v57, %s9336_s23  ;;  %3008 = vrot.lane.b32.xlu1 %v8265_v22, %s9439_s28  ;;  %v3243_v18 = vrot.slane %v3241_v61, 1  ;;  %v3358_v31 = vunpack.i.h.s16 %v8271_v3  ;;  %v3247_v2 = vrot.slane %v3245_v8, 2  ;;  %v5548_v61 = vld [vmem:[%s9587_s25 + $0x18] sm:$0xff]  ;;  %v3054_v28 = vsel %vm1215_vm7, %v8026_v26, %v2877_v52 }
 0x483   :  { %v5556_v8 = vld [vmem:[%s9587_s25 + $0x58] sm:$0xff] }
 0x484   :  { %v3360_v12 = vunpack.i.h.s16 %v3243_v18  ;;  %v5228_v25 = vpack.i.b16 %v3243_v18, %v3358_v31  ;;  %3663 = vmatpush.bf16.msra.mxu1 %v5549_v51  ;;  %v3125_v18 = vsel %vm1215_vm7, %v8060_v37, %v8229_v38  ;;  %v3119_v37 = vsel %vm1215_vm7, %v8029_v41, %v8185_v4 }
 0x485   :  { %3691 = vmatpush.bf16.msra.mxu2 %v5557_v27  ;;  %v3152_v31 = vsel %vm9588_vm8, %v3125_v18, %v8241_v6  ;;  %v5547_v6 = vld [vmem:[%s9587_s25 + $0x10] sm:$0xff]  ;;  %v3018_v41 = vshrl.u32 %v8265_v22, 16  ;;  %v3128_v27 = vsel %vm1215_vm7, %v8098_v58, %v8237_v49  ;;  %vm9594_vm8 = vmmov %vm9592_vm13 }
 0x486   :  { %2888 = vrot.lane.b32.xlu2 %v8205_v0, %s9336_s23  ;;  %v5229_v11 = vpack.i.b16 %v3247_v2, %v3360_v12  ;;  %3477 = vst [vmem:[#allocation1 + $0x3] ss:$9 sm:$0xff] %v5228_v25  ;;  %v3029_v32 = vpop.permute.xlu1 %3028  ;;  %v5562_v2 = vld [vmem:[%s9587_s25 + $0x88] sm:$0xff]  ;;  %v5555_v12 = vld [vmem:[%s9587_s25 + $0x50] sm:$0xff]  ;;  %v3148_v25 = vsel %vm9589_vm9, %v3119_v37, %v8243_v46  ;;  %v3202_v46 = vrot.slane %v8091_v15, 6  ;;  %vm9595_vm9 = vmmov %vm9593_vm4 }
 0x487   :  { %v3172_v16 = vsel %vm3096_vm11, %v3152_v31, %v3029_v32  ;;  %3722 = vmatpush.bf16.msra.mxu3 %v5562_v2  ;;  %v3048_v32 = vsel %vm1215_vm7, %v8045_v39, %v8220_v7  ;;  %v5554_v39 = vld [vmem:[%s9587_s25 + $0x48] sm:$0xff] }
 0x488   :  { %3480 = vst [vmem:[#allocation1 + $0x4] ss:$9 sm:$0xff] %v5229_v11  ;;  %v3025_v50 = vpop.permute.xlu0 %3024  ;;  %v3031_v43 = vpop.permute.xlu2 %3030  ;;  %3664 = vmatpush.bf16.msra.mxu1 %v5548_v61  ;;  %v3201_v63 = vrot.slane %v3172_v16, 7  ;;  %v3077_v15 = vsel %vm9591_vm12, %v3048_v32, %v8261_v48  ;;  %v3204_v32 = vrot.slane %v2962_v59, 6  ;;  %vm9597_vm12 = vmmov %vm9593_vm4 }
 0x489   :  { %3692 = vmatpush.bf16.msra.mxu2 %v5556_v8  ;;  %v3168_v4 = vsel %vm3096_vm11, %v3148_v25, %v3025_v50 }
 0x48a   :  { %3006 = vrot.lane.b32.xlu0 %v8254_v42, %s9439_s28  ;;  %2942 = vrot.lane.b32.xlu1 %v8187_v53, %s5690_s29  ;;  %v3020_v53 = vshll.u32 %v8265_v22, 16  ;;  %v3197_v7 = vrot.slane %v3168_v4, 7 }
 0x48c   :  { %v3022_v38 = vrot.slane %v3020_v53, 1  ;;  %3665 = vmatpush.bf16.msra.mxu1 %v5547_v6  ;;  %v5553_v6 = vld [vmem:[%s9587_s25 + $0x40] sm:$0xff] }
 0x48d   :  { %3693 = vmatpush.bf16.msra.mxu2 %v5555_v12 }
 0x48e   :  { %3040 = vrot.lane.b32.xlu2 %v8309_v55, %s5690_s29  ;;  %v2997_v30 = vpop.permute.xlu1 %2996  ;;  %v3023_v52 = vor.u32 %v3022_v38, %v3018_v41  ;;  %v5545_v38 = vld [vmem:[%s9587_s25] sm:$0xff]  ;;  %v3057_v41 = vsel %vm1215_vm7, %v8041_v5, %v8302_v29 }
 0x48f   :  { %v3154_v61 = vsel %vm9593_vm4, %v3128_v27, %v2997_v30 }
 0x490   :  { %v2907_v24 = vpop.permute.xlu0 %2906  ;;  %3666 = vmatpush.bf16.msra.mxu1 %v5546_v40  ;;  %v3174_v12 = vsel %vm3096_vm11, %v3154_v61, %v3031_v43 }
 0x491   :  { %v3081_v62 = vsel %vm9590_vm10, %v3054_v28, %v2907_v24  ;;  %v3198_v24 = vrot.slane %v8037_v34, 6  ;;  %3694 = vmatpush.bf16.msra.mxu2 %v5554_v39  ;;  %v5561_v28 = vld [vmem:[%s9587_s25 + $0x80] sm:$0xff]  ;;  %vm9596_vm10 = vmmov %vm9594_vm8  ;;  %s9647_s25 = sld [smem:[#allocation98_spill]] }
 0x492   :  { %2890 = vrot.lane.b32.xlu0 %v8218_v19, %s9336_s23  ;;  %2918 = vrot.lane.b32.xlu1 %v8223_v35, %s9439_s28  ;;  %s5157_s23 = sshll.u32 %s5692_s5, 4  ;;  %s5158_s23 = int_to_ptr.vmem [resolvable:$true] %s5157_s23 }
 0x493   :  { %3723 = vmatpush.bf16.msra.mxu3 %v5561_v28 }
 0x494   :  { %3667 = vmatpush.bf16.msra.mxu1 %v5545_v38 }
 0x495   :  { %3695 = vmatpush.bf16.msra.mxu2 %v5553_v6 }
 0x496   :  { %2920 = vrot.lane.b32.xlu2 %v8235_v14, %s9439_s28  ;;  %v2933_v11 = vpop.permute.xlu1 %2932 }
 0x497   :  { %v3102_v26 = vsel %vm3096_vm11, %v3081_v62, %v2933_v11  ;;  %v3203_v11 = vrot.slane %v3174_v12, 7 }
 0x498   :  { %v3249_v20 = vsel %vm3217_vm14, %v3102_v26, %v3201_v63  ;;  %v3253_v10 = vsel %vm3223_vm15, %v3102_v26, %v3201_v63  ;;  %v2929_v50 = vpop.permute.xlu0 %2928  ;;  %v2975_v34 = vpop.permute.xlu2 %2974  ;;  %v3257_v2 = vsel %vm3229_vm5, %v3102_v26, %v3201_v63 }
 0x499   :  { %v3251_v13 = vsel %vm9592_vm13, %v3249_v20, %v3202_v46  ;;  %v3254_v51 = vsel %vm3225_vm1, %v3253_v10, %v3202_v46  ;;  %v3098_v48 = vsel %vm3096_vm11, %v3077_v15, %v2929_v50  ;;  %v3258_v4 = vsel %vm3231_vm2, %v3257_v2, %v3202_v46  ;;  %vm9598_vm13 = vmmov %vm9593_vm4 }
 0x49a   :  { %3042 = vrot.lane.b32.xlu0 %v3023_v52, %s5690_s29  ;;  %2946 = vrot.lane.b32.xlu1 %v8254_v42, %s5690_s29  ;;  %v3256_v53 = vrot.slane %v3254_v51, 1  ;;  %3483 = vst [vmem:[#allocation1 + $0x5] ss:$9 sm:$0xff] %v3251_v13  ;;  %v3219_v8 = vsel %vm3217_vm14, %v3098_v48, %v3197_v7  ;;  %v3224_v18 = vsel %vm3223_vm15, %v3098_v48, %v3197_v7  ;;  %v3260_v26 = vrot.slane %v3258_v4, 2  ;;  %vm9599_vm4 = vmmov %vm9594_vm8 }
 0x49b   :  { %v3230_v31 = vsel %vm3229_vm5, %v3098_v48, %v3197_v7  ;;  %v3221_v58 = vsel %vm9594_vm8, %v3219_v8, %v3198_v24  ;;  %v3226_v49 = vsel %vm3225_vm1, %v3224_v18, %v3198_v24  ;;  %vm9600_vm8 = vmmov %vm9595_vm9 }
 0x49c   :  { %3486 = vst [vmem:[#allocation1 + $0x6] ss:$9 sm:$0xff] %v3256_v53  ;;  %v3232_v16 = vsel %vm3231_vm2, %v3230_v31, %v3198_v24  ;;  %v3228_v37 = vrot.slane %v3226_v49, 1 }
 0x49d   :  { %v3234_v30 = vrot.slane %v3232_v16, 2  ;;  %3468 = vst [vmem:[#allocation1] ss:$9 sm:$0xff] %v3221_v58  ;;  %v3134_v58 = vsel %vm1215_vm7, %v8176_v44, %v2975_v34 }
 0x49e   :  { %v2935_v25 = vpop.permute.xlu1 %2934  ;;  %3471 = vst [vmem:[#allocation1 + $0x1] ss:$9 sm:$0xff] %v3228_v37 }
 0x49f   :  { %v5227_v63 = vpack.i.b16 %v8271_v3, %v3234_v30 }
 0x4a0   :  { %v2909_v62 = vpop.permute.xlu0 %2908  ;;  %v2973_v59 = vpop.permute.xlu2 %2972 }
 0x4a1   :  { %3474 = vst [vmem:[#allocation1 + $0x2] ss:$9 sm:$0xff] %v5227_v63  ;;  %v3083_v43 = vsel %vm9595_vm9, %v3057_v41, %v2909_v62  ;;  %vm9601_vm9 = vmmov %vm9600_vm8 }
 0x4a2   :  { %2944 = vrot.lane.b32.xlu0 %v8209_v1, %s5690_s29  ;;  %v3104_v3 = vsel %vm3096_vm11, %v3083_v43, %v2935_v25  ;;  %v3208_v25 = vrot.slane %v8191_v17, 6 }
 0x4a3   :  { %v3262_v5 = vsel %vm3217_vm14, %v3104_v3, %v3203_v11  ;;  %v3266_v29 = vsel %vm3223_vm15, %v3104_v3, %v3203_v11  ;;  %v3270_v50 = vsel %vm3229_vm5, %v3104_v3, %v3203_v11 }
 0x4a4   :  { %v3264_v46 = vsel %vm9596_vm10, %v3262_v5, %v3204_v32  ;;  %v3267_v52 = vsel %vm3225_vm1, %v3266_v29, %v3204_v32  ;;  %v3271_v1 = vsel %vm3231_vm2, %v3270_v50, %v3204_v32  ;;  %v3131_v29 = vsel %vm1215_vm7, %v8121_v33, %v2973_v59  ;;  %vm9602_vm10 = vmmov %vm9599_vm4 }
 0x4a5   :  { %v5230_v20 = vpack.i.b16 %v3264_v46, %v3260_v26  ;;  %v3269_v10 = vrot.slane %v3267_v52, 1  ;;  %v3368_v40 = vunpack.i.h.s16 %v3264_v46  ;;  %v3273_v15 = vrot.slane %v3271_v1, 2 }
 0x4a6   :  { %v2883_v60 = vpop.permute.xlu1 %2882 }
 0x4a7   :  { %3489 = vst [vmem:[#allocation1 + $0x7] ss:$9 sm:$0xff] %v5230_v20  ;;  %v3370_v39 = vunpack.i.h.s16 %v3269_v10  ;;  %v5231_v7 = vpack.i.b16 %v3269_v10, %v3368_v40  ;;  %v3063_v49 = vsel %vm1215_vm7, %v8127_v23, %v2883_v60  ;;  %v3044_v20 = vrot.slane %v8159_v54, 1 }
 0x4a8   :  { %v2999_v48 = vpop.permute.xlu2 %2998 }
 0x4a9   :  { %v5232_v13 = vpack.i.b16 %v3273_v15, %v3370_v39  ;;  %v3156_v46 = vsel %vm9600_vm8, %v3131_v29, %v2999_v48  ;;  %v3206_v40 = vrot.slane %v3044_v20, 6  ;;  %v3212_v20 = vrot.slane %v8235_v14, 6 }
 0x4ae   :  { %v3490_v51 = vld [vmem:[#allocation1] sm:$0xff]  ;;  %v3491_v27 = vld [vmem:[#allocation1 + $0x9] sm:$0xff]  ;;  %v3492_v53 = vld [vmem:[#allocation1 + $0x12] sm:$0xff]  ;;  %v2913_v24 = vpop.permute.xlu1 %2912 }
 0x4af   :  { %3494 = vst [vmem:[#allocation1] ss:$9 sm:$0xff] %v5231_v7  ;;  %3668 = vmatmul.bf16.vlgmr.msra.gmra.mxu1 %v3490_v51  ;;  %3696 = vmatmul.bf16.vlgmr.msra.gmra.mxu2 %v3491_v27  ;;  %v3087_v2 = vsel %vm9598_vm13, %v3063_v49, %v2913_v24  ;;  %vm9604_vm13 = vmmov %vm9600_vm8 }
 0x4b0   :  { %3496 = vst [vmem:[#allocation1 + $0x1] ss:$9 sm:$0xff] %v5232_v13  ;;  %5314 = vmatmul.msk.bf16.vlgmr.msra.gmra.mxu3 %vm1215_vm7, %v3492_v53  ;;  %v3033_v8 = vpop.permute.xlu2 %3032 }
 0x4b1   :  { %v3176_v52 = vsel %vm3096_vm11, %v3156_v46, %v3033_v8 }
 0x4b2   :  { %v3205_v60 = vrot.slane %v3176_v52, 7 }
 0x4b6   :  { %v2939_v61 = vpop.permute.xlu1 %2938 }
 0x4b7   :  { %v3108_v6 = vsel %vm3096_vm11, %v3087_v2, %v2939_v61 }
 0x4b8   :  { %v2977_v30 = vpop.permute.xlu2 %2976 }
 0x4b9   :  { %v3137_v61 = vsel %vm1215_vm7, %v8170_v21, %v2977_v30 }
 0x4bc   :  { %v3001_v18 = vpop.permute.xlu0 %3000 }
 0x4bd   :  { %v3158_v16 = vsel %vm9597_vm12, %v3134_v58, %v3001_v18  ;;  %vm9603_vm12 = vmmov %vm9600_vm8 }
 0x4be   :  { %v2937_v31 = vpop.permute.xlu1 %2936 }
 0x4c0   :  { %v3037_v5 = vpop.permute.xlu2 %3036 }
 0x4c4   :  { %v3035_v37 = vpop.permute.xlu0 %3034 }
 0x4c5   :  { %v3178_v38 = vsel %vm3096_vm11, %v3158_v16, %v3035_v37 }
 0x4c6   :  { %v3207_v12 = vrot.slane %v3178_v38, 7  ;;  %v2885_v26 = vpop.permute.xlu1 %2884  ;;  %v3210_v38 = vrot.slane %v8223_v35, 6 }
 0x4c7   :  { %v3066_v49 = vsel %vm1215_vm7, %v8136_v9, %v2885_v26 }
 0x4c8   :  { %v3288_v28 = vsel %vm3217_vm14, %v3108_v6, %v3207_v12  ;;  %v3292_v44 = vsel %vm3223_vm15, %v3108_v6, %v3207_v12  ;;  %v3296_v34 = vsel %vm3229_vm5, %v3108_v6, %v3207_v12  ;;  %v2979_v51 = vpop.permute.xlu2 %2978 }
 0x4c9   :  { %v3290_v23 = vsel %vm9599_vm4, %v3288_v28, %v3208_v25  ;;  %v3293_v63 = vsel %vm3225_vm1, %v3292_v44, %v3208_v25  ;;  %v3297_v41 = vsel %vm3231_vm2, %v3296_v34, %v3208_v25 }
 0x4ca   :  { %v3295_v4 = vrot.slane %v3293_v63, 1  ;;  %v3378_v62 = vunpack.i.h.s16 %v3290_v23  ;;  %v3299_v11 = vrot.slane %v3297_v41, 2 }
 0x4cc   :  { %v3380_v43 = vunpack.i.h.s16 %v3295_v4  ;;  %v5234_v32 = vpack.i.b16 %v3295_v4, %v3378_v62  ;;  %v2881_v3 = vpop.permute.xlu0 %2880  ;;  %v3140_v62 = vsel %vm1215_vm7, %v8205_v0, %v2979_v51 }
 0x4cd   :  { %v3060_v10 = vsel %vm1215_vm7, %v8071_v45, %v2881_v3 }
 0x4ce   :  { %v5235_v17 = vpack.i.b16 %v3299_v11, %v3380_v43  ;;  %3504 = vst [vmem:[#allocation1 + $0x5] ss:$9 sm:$0xff] %v5234_v32  ;;  %v2941_v15 = vpop.permute.xlu1 %2940 }
 0x4d0   :  { %3506 = vst [vmem:[#allocation1 + $0x6] ss:$9 sm:$0xff] %v5235_v17  ;;  %v8452_v58 = vpop.permute.xlu2 %2980 }
 0x4d4   :  { %v2911_v50 = vpop.permute.xlu0 %2910 }
 0x4d5   :  { %v3085_v1 = vsel %vm9601_vm9, %v3060_v10, %v2911_v50  ;;  %vm9605_vm9 = vmmov %vm9600_vm8 }
 0x4d6   :  { %v3106_v39 = vsel %vm3096_vm11, %v3085_v1, %v2937_v31  ;;  %v2887_v18 = vpop.permute.xlu1 %2886 }
 0x4d7   :  { %v3275_v33 = vsel %vm3217_vm14, %v3106_v39, %v3205_v60  ;;  %v3279_v59 = vsel %vm3223_vm15, %v3106_v39, %v3205_v60  ;;  %v3283_v7 = vsel %vm3229_vm5, %v3106_v39, %v3205_v60  ;;  %v3069_v3 = vsel %vm1215_vm7, %v8149_v36, %v2887_v18 }
 0x4d8   :  { %v3277_v13 = vsel %vm9602_vm10, %v3275_v33, %v3206_v40  ;;  %v3280_v54 = vsel %vm3225_vm1, %v3279_v59, %v3206_v40  ;;  %v3284_v45 = vsel %vm3231_vm2, %v3283_v7, %v3206_v40  ;;  %v2917_v9 = vpop.permute.xlu2 %2916  ;;  %vm9606_vm10 = vmmov %vm9599_vm4 }
 0x4d9   :  { %v3282_v27 = vrot.slane %v3280_v54, 1  ;;  %v3286_v53 = vrot.slane %v3284_v45, 2  ;;  %3498 = vst [vmem:[#allocation1 + $0x2] ss:$9 sm:$0xff] %v3277_v13  ;;  %v3091_v46 = vsel %vm9605_vm9, %v3069_v3, %v2917_v9 }
 0x4db   :  { %v5233_v24 = vpack.i.b16 %v3290_v23, %v3286_v53  ;;  %3500 = vst [vmem:[#allocation1 + $0x3] ss:$9 sm:$0xff] %v3282_v27 }
 0x4dc   :  { %v3003_v48 = vpop.permute.xlu0 %3002 }
 0x4dd   :  { %3502 = vst [vmem:[#allocation1 + $0x4] ss:$9 sm:$0xff] %v5233_v24  ;;  %v3160_v8 = vsel %vm9603_vm12, %v3137_v61, %v3003_v48  ;;  %v3045_v61 = vrot.slane %v8265_v22, 1  ;;  %vm9607_vm12 = vmmov %vm9600_vm8 }
 0x4de   :  { %v3180_v31 = vsel %vm3096_vm11, %v3160_v8, %v3037_v5  ;;  %v3039_v25 = vpop.permute.xlu1 %3038 }
 0x4df   :  { %v3209_v2 = vrot.slane %v3180_v31, 7 }
 0x4e0   :  { %v2889_v11 = vpop.permute.xlu2 %2888 }
 0x4e4   :  { %v2915_v16 = vpop.permute.xlu0 %2914 }
 0x4e5   :  { %v3089_v37 = vsel %vm9604_vm13, %v3066_v49, %v2915_v16  ;;  %vm9608_vm13 = vmmov %vm9600_vm8  ;;  %v3143_v16 = vsel %vm1215_vm7, %v8218_v19, %v8452_v58  ;;  %v3072_v58 = vsel %vm1215_vm7, %v8178_v56, %v2889_v11 }
 0x4e6   :  { %v3110_v6 = vsel %vm3096_vm11, %v3089_v37, %v2941_v15 }
 0x4e7   :  { %v3301_v21 = vsel %vm3217_vm14, %v3110_v6, %v3209_v2  ;;  %v3305_v12 = vsel %vm3223_vm15, %v3110_v6, %v3209_v2  ;;  %v3309_v43 = vsel %vm3229_vm5, %v3110_v6, %v3209_v2 }
 0x4e8   :  { %v3303_v30 = vsel %vm9599_vm4, %v3301_v21, %v3210_v38  ;;  %v3306_v28 = vsel %vm3225_vm1, %v3305_v12, %v3210_v38  ;;  %v3310_v17 = vsel %vm3231_vm2, %v3309_v43, %v3210_v38  ;;  %v3041_v7 = vpop.permute.xlu2 %3040  ;;  %vm9609_vm4 = vmmov %vm9600_vm8  ;;  %v3216_v38 = vrot.slane %v3045_v61, 6 }
 0x4e9   :  { %3508 = vst [vmem:[#allocation1 + $0x7] ss:$9 sm:$0xff] %v3303_v30  ;;  %v3308_v34 = vrot.slane %v3306_v28, 1  ;;  %v3312_v10 = vrot.slane %v3310_v17, 2  ;;  %vm9611_vm9 = vmmov %vm9609_vm4 }
 0x4ec   :  { %v3005_v44 = vpop.permute.xlu0 %3004 }
 0x4ed   :  { %v3162_v32 = vsel %vm9600_vm8, %v3140_v62, %v3005_v44  ;;  %vm9610_vm8 = vmmov %vm9606_vm10 }
 0x4ee   :  { %v3182_v26 = vsel %vm3096_vm11, %v3162_v32, %v3039_v25 }
 0x4ef   :  { %v3211_v5 = vrot.slane %v3182_v26, 7 }
 0x4f0   :  { %v3509_v23 = vld [vmem:[#allocation1] sm:$0xff]  ;;  %v3510_v63 = vld [vmem:[#allocation1 + $0x9] sm:$0xff]  ;;  %v3511_v41 = vld [vmem:[#allocation1 + $0x12] sm:$0xff]  ;;  %v2921_v48 = vpop.permute.xlu2 %2920 }
 0x4f1   :  { %3513 = vst [vmem:[#allocation1] ss:$9 sm:$0xff] %v3308_v34  ;;  %3673 = vmatmul.bf16.gmra.mxu1 %v3509_v23  ;;  %3701 = vmatmul.bf16.gmra.mxu2 %v3510_v63  ;;  %v3214_v23 = vrot.slane %v2963_v57, 6 }
 0x4f2   :  { %5315 = vmatmul.msk.bf16.gmra.mxu3 %vm1215_vm7, %v3511_v41 }
 0x4f4   :  { %v2983_v35 = vpop.permute.xlu0 %2982  ;;  %v3009_v4 = vpop.permute.xlu1 %3008 }
 0x4f5   :  { %v3146_v24 = vsel %vm1215_vm7, %v8309_v55, %v2983_v35 }
 0x4f6   :  { %v3166_v8 = vsel %vm9607_vm12, %v3146_v24, %v3009_v4 }
 0x4fc   :  { %v3007_v29 = vpop.permute.xlu0 %3006  ;;  %v2943_v52 = vpop.permute.xlu1 %2942 }
 0x4fd   :  { %v3112_v0 = vsel %vm3096_vm11, %v3091_v46, %v2943_v52  ;;  %v3164_v37 = vsel %vm9609_vm4, %v3143_v16, %v3007_v29 }
 0x4fe   :  { %v3314_v50 = vsel %vm3217_vm14, %v3112_v0, %v3211_v5  ;;  %v3318_v60 = vsel %vm3223_vm15, %v3112_v0, %v3211_v5  ;;  %v3322_v36 = vsel %vm3229_vm5, %v3112_v0, %v3211_v5  ;;  %v3184_v21 = vsel %vm3096_vm11, %v3164_v37, %v3041_v7  ;;  %v8517_v0 = vld [vmem:[%s9061_s6] ss:$0 sm:$0xff]  ;;  %s9640_s6 = sld [smem:[#allocation91_spill]] }
 0x4ff   :  { %v3316_v1 = vsel %vm9606_vm10, %v3314_v50, %v3212_v20  ;;  %v3319_v40 = vsel %vm3225_vm1, %v3318_v60, %v3212_v20  ;;  %v3323_v39 = vsel %vm3231_vm2, %v3322_v36, %v3212_v20  ;;  %v3213_v28 = vrot.slane %v3184_v21, 7  ;;  %vm9612_vm10 = vmmov %vm9610_vm8 }
 0x500   :  { %v3321_v15 = vrot.slane %v3319_v40, 1  ;;  %v3388_v33 = vunpack.i.h.s16 %v3316_v1  ;;  %v5236_v59 = vpack.i.b16 %v3316_v1, %v3312_v10  ;;  %v3325_v14 = vrot.slane %v3323_v39, 2 }
 0x502   :  { %v3390_v13 = vunpack.i.h.s16 %v3321_v15  ;;  %v5237_v54 = vpack.i.b16 %v3321_v15, %v3388_v33  ;;  %3515 = vst [vmem:[#allocation1 + $0x1] ss:$9 sm:$0xff] %v5236_v59 }
 0x504   :  { %v5238_v45 = vpack.i.b16 %v3325_v14, %v3390_v13  ;;  %3517 = vst [vmem:[#allocation1 + $0x2] ss:$9 sm:$0xff] %v5237_v54  ;;  %v2891_v51 = vpop.permute.xlu0 %2890  ;;  %v2919_v27 = vpop.permute.xlu1 %2918 }
 0x505   :  { %v3075_v53 = vsel %vm1215_vm7, %v8197_v47, %v2891_v51  ;;  %v3093_v44 = vsel %vm9611_vm9, %v3072_v58, %v2919_v27 }
 0x506   :  { %3519 = vst [vmem:[#allocation1 + $0x3] ss:$9 sm:$0xff] %v5238_v45  ;;  %v3095_v31 = vsel %vm9608_vm13, %v3075_v53, %v2921_v48 }
 0x50c   :  { %v3043_v18 = vpop.permute.xlu0 %3042  ;;  %v2947_v49 = vpop.permute.xlu1 %2946 }
 0x50d   :  { %v3186_v2 = vsel %vm3096_vm11, %v3166_v8, %v3043_v18  ;;  %v3116_v47 = vsel %vm3096_vm11, %v3095_v31, %v2947_v49 }
 0x50e   :  { %v3215_v55 = vrot.slane %v3186_v2, 7 }
 0x510   :  { %v3340_v22 = vsel %vm3217_vm14, %v3116_v47, %v3215_v55  ;;  %v3344_v6 = vsel %vm3223_vm15, %v3116_v47, %v3215_v55  ;;  %v3348_v42 = vsel %vm3229_vm5, %v3116_v47, %v3215_v55 }
 0x511   :  { %v3342_v30 = vsel %vm9610_vm8, %v3340_v22, %v3216_v38  ;;  %v3345_v12 = vsel %vm3225_vm1, %v3344_v6, %v3216_v38  ;;  %v3349_v3 = vsel %vm3231_vm2, %v3348_v42, %v3216_v38 }
 0x512   :  { %v3347_v25 = vrot.slane %v3345_v12, 1  ;;  %v3398_v19 = vunpack.i.h.s16 %v3342_v30  ;;  %v3351_v17 = vrot.slane %v3349_v3, 2 }
 0x514   :  { %v5240_v9 = vpack.i.b16 %v3347_v25, %v3398_v19  ;;  %v2945_v34 = vpop.permute.xlu0 %2944  ;;  %v3400_v26 = vunpack.i.h.s16 %v3347_v25 }
 0x515   :  { %v3114_v63 = vsel %vm3096_vm11, %v3093_v44, %v2945_v34 }
 0x516   :  { %3527 = vst [vmem:[#allocation1 + $0x7] ss:$9 sm:$0xff] %v5240_v9  ;;  %v3327_v41 = vsel %vm3217_vm14, %v3114_v63, %v3213_v28  ;;  %v3331_v35 = vsel %vm3223_vm15, %v3114_v63, %v3213_v28  ;;  %v3335_v4 = vsel %vm3229_vm5, %v3114_v63, %v3213_v28  ;;  %v5241_v5 = vpack.i.b16 %v3351_v17, %v3400_v26 }
 0x517   :  { %v3329_v62 = vsel %vm9612_vm10, %v3327_v41, %v3214_v23  ;;  %v3332_v56 = vsel %vm3225_vm1, %v3331_v35, %v3214_v23  ;;  %v3336_v11 = vsel %vm3231_vm2, %v3335_v4, %v3214_v23  ;;  %vm9613_vm10 = vmmov %vm9611_vm9 }
 0x518   :  { %v3334_v43 = vrot.slane %v3332_v56, 1  ;;  %v3338_v32 = vrot.slane %v3336_v11, 2  ;;  %3521 = vst [vmem:[#allocation1 + $0x4] ss:$9 sm:$0xff] %v3329_v62 }
 0x51a   :  { %v5239_v57 = vpack.i.b16 %v3342_v30, %v3338_v32  ;;  %3523 = vst [vmem:[#allocation1 + $0x5] ss:$9 sm:$0xff] %v3334_v43 }
 0x51c   :  { %3525 = vst [vmem:[#allocation1 + $0x6] ss:$9 sm:$0xff] %v5239_v57 }
 0x523   :  { %v3528_v29 = vld [vmem:[#allocation1] sm:$0xff]  ;;  %v3529_v46 = vld [vmem:[#allocation1 + $0x9] sm:$0xff]  ;;  %v3530_v52 = vld [vmem:[#allocation1 + $0x12] sm:$0xff] }
 0x524   :  { %3532 = vst [vmem:[#allocation1] ss:$9 sm:$0xff] %v5241_v5  ;;  %3678 = vmatmul.bf16.gmra.mxu1 %v3528_v29  ;;  %3706 = vmatmul.bf16.gmra.mxu2 %v3529_v46 }
 0x525   :  { %5316 = vmatmul.msk.bf16.gmra.mxu3 %vm1215_vm7, %v3530_v52 }
 0x52b   :  { %v3533_v60 = vld [vmem:[#allocation1] sm:$0xff]  ;;  %v3534_v36 = vld [vmem:[#allocation1 + $0x9] sm:$0xff]  ;;  %v3535_v39 = vld [vmem:[#allocation1 + $0x12] sm:$0xff] }
 0x52c   :  { %v3669_v20 = vpop.f32.mrf.mxu1 }
 0x52d   :  { %v3670_v10 = vadd.f32 %v8517_v0, %v3669_v20 }
 0x532   :  { %v3697_v50 = vpop.f32.mrf.mxu2 }
 0x533   :  { %v3698_v1 = vadd.f32 %v3697_v50, %v3670_v10  ;;  %v3725_v40 = vpop.f32.mrf.mxu3 }
 0x534   :  { %3683 = vmatmul.bf16.gmra.mxu1 %v3533_v60  ;;  %3711 = vmatmul.bf16.gmra.mxu2 %v3534_v36  ;;  %v3671_v33 = vpop.f32.mrf.mxu1 }
 0x535   :  { %5317 = vmatmul.msk.bf16.gmra.mxu3 %vm1215_vm7, %v3535_v39  ;;  %v3726_v15 = vadd.f32 %v3725_v40, %v3698_v1  ;;  %v3672_v14 = vadd.f32 %v8517_v0, %v3671_v33 }
 0x537   :  { %vm3744_vm11 = vcmp.ge.f32.partialorder %v3726_v15, 0.0  ;;  %v3751_v59 = vmul.f32 0.01, %v3726_v15 }
 0x539   :  { %v3758_v7 = vsel %vm3744_vm11, %v3726_v15, %v3751_v59  ;;  %vm9614_vm11 = vmmov %vm9611_vm9 }
 0x53a   :  { %v3772_v13 = vrot.slane %v3758_v7, 1  ;;  %v3773_v54 = vrot.slane %v3758_v7, 2  ;;  %v3774_v45 = vrot.slane %v3758_v7, 3  ;;  %3815 = vst [vmem:[#allocation1] ss:$9 sm:$0xff] %v3758_v7  ;;  %v3699_v51 = vpop.f32.mrf.mxu2  ;;  %v3775_v27 = vrot.slane %v3758_v7, 4 }
 0x53b   :  { %v3700_v53 = vadd.f32 %v3699_v51, %v3672_v14  ;;  %v3727_v24 = vpop.f32.mrf.mxu3  ;;  %v3776_v18 = vrot.slane %v3758_v7, 5  ;;  %v3777_v31 = vrot.slane %v3758_v7, 6  ;;  %v3778_v16 = vrot.slane %v3758_v7, 7 }
 0x53c   :  { %3817 = vst [vmem:[#allocation1 + $0x1] ss:$9 sm:$0xff] %v3772_v13 }
 0x53d   :  { %3819 = vst [vmem:[#allocation1 + $0x2] ss:$9 sm:$0xff] %v3773_v54  ;;  %v3728_v48 = vadd.f32 %v3727_v24, %v3700_v53 }
 0x53e   :  { %3821 = vst [vmem:[#allocation1 + $0x3] ss:$9 sm:$0xff] %v3774_v45 }
 0x53f   :  { %3823 = vst [vmem:[#allocation1 + $0x4] ss:$9 sm:$0xff] %v3775_v27  ;;  %v3752_v61 = vmul.f32 0.01, %v3728_v48  ;;  %vm3745_vm5 = vcmp.ge.f32.partialorder %v3728_v48, 0.0 }
 0x541   :  { %v3759_v8 = vsel %vm3745_vm5, %v3728_v48, %v3752_v61  ;;  %vm4165_vm5 = vcmask 1043459  }
 0x542   :  { %v3779_v2 = vrot.slane %v3759_v8, 1  ;;  %v3780_v47 = vrot.slane %v3759_v8, 2  ;;  %v3781_v37 = vrot.slane %v3759_v8, 3  ;;  %v3782_v38 = vrot.slane %v3759_v8, 4 }
 0x543   :  { %v3783_v6 = vrot.slane %v3759_v8, 5  ;;  %v3784_v21 = vrot.slane %v3759_v8, 6  ;;  %v3785_v25 = vrot.slane %v3759_v8, 7 }
 0x546   :  { %v8522_v49 = vld [vmem:[#allocation1] sm:$0xff] }
 0x547   :  { %3825 = vst [vmem:[#allocation1] ss:$9 sm:$0xff] %v3776_v18 }
 0x548   :  { %3826 = vst [vmem:[#allocation1 + $0x1] ss:$9 sm:$0xff] %v3777_v31 }
 0x549   :  { %3827 = vst [vmem:[#allocation1 + $0x2] ss:$9 sm:$0xff] %v3778_v16 }
 0x54a   :  { %3828 = vst [vmem:[#allocation1 + $0x3] ss:$9 sm:$0xff] %v3759_v8 }
 0x54b   :  { %3829 = vst [vmem:[#allocation1 + $0x4] ss:$9 sm:$0xff] %v3779_v2 }
 0x552   :  { %v3830_v55 = vld [vmem:[#allocation1] sm:$0xff] }
 0x553   :  { %3831 = vst [vmem:[#allocation1] ss:$9 sm:$0xff] %v3780_v47  ;;  %v8524_v22 = vpack.c.bf16 %v3830_v55, %v3830_v55 }
 0x554   :  { %3832 = vst [vmem:[#allocation1 + $0x1] ss:$9 sm:$0xff] %v3781_v37 }
 0x555   :  { %3833 = vst [vmem:[#allocation1 + $0x2] ss:$9 sm:$0xff] %v3782_v38  ;;  %v3906_v30 = vunpack.c.l.b16 %v8524_v22 }
 0x556   :  { %3834 = vst [vmem:[#allocation1 + $0x3] ss:$9 sm:$0xff] %v3783_v6 }
 0x557   :  { %3835 = vst [vmem:[#allocation1 + $0x4] ss:$9 sm:$0xff] %v3784_v21  ;;  %v8527_v12 = vpack.c.b16 %v3906_v30, %v3906_v30 }
 0x559   :  { %3983 = vrot.lane.b32.xlu2 %v8527_v12, %s9439_s28 }
 0x55e   :  { %v3836_v19 = vld [vmem:[#allocation1] sm:$0xff] }
 0x55f   :  { %3837 = vst [vmem:[#allocation1] ss:$9 sm:$0xff] %v3785_v25  ;;  %v8531_v58 = vpack.c.bf16 %v3836_v19, %v3836_v19 }
 0x561   :  { %v3907_v28 = vunpack.c.l.b16 %v8531_v58 }
 0x563   :  { %v3913_v44 = vpack.c.b16 %v3907_v28, %v3907_v28 }
 0x565   :  { %3985 = vrot.lane.b32.xlu0 %v3913_v44, %s9439_s28  ;;  %v3934_v40 = vshll.u32 %v3913_v44, 16  ;;  %v3932_v33 = vshrl.u32 %v3913_v44, 16  ;;  %v8550_v51 = vrot.slane %v3913_v44, 1 }
 0x567   :  { %v3936_v39 = vrot.slane %v3934_v40, 1 }
 0x569   :  { %v8546_v13 = vor.u32 %v3936_v39, %v3932_v33 }
 0x56e   :  { %v3674_v9 = vpop.f32.mrf.mxu1 }
 0x56f   :  { %v3675_v34 = vadd.f32 %v8517_v0, %v3674_v9 }
 0x574   :  { %v3702_v23 = vpop.f32.mrf.mxu2 }
 0x575   :  { %v3703_v63 = vadd.f32 %v3702_v23, %v3675_v34  ;;  %v3730_v41 = vpop.f32.mrf.mxu3 }
 0x576   :  { %v3676_v62 = vpop.f32.mrf.mxu1 }
 0x577   :  { %v3731_v35 = vadd.f32 %v3730_v41, %v3703_v63  ;;  %v3677_v57 = vadd.f32 %v8517_v0, %v3676_v62 }
 0x579   :  { %vm3746_vm2 = vcmp.ge.f32.partialorder %v3731_v35, 0.0  ;;  %v3753_v4 = vmul.f32 0.01, %v3731_v35 }
 0x57b   :  { %v3760_v56 = vsel %vm3746_vm2, %v3731_v35, %v3753_v4  ;;  %vm9615_vm2 = vmmov %vm9611_vm9 }
 0x57c   :  { %v3786_v11 = vrot.slane %v3760_v56, 1  ;;  %v3787_v43 = vrot.slane %v3760_v56, 2  ;;  %v3788_v32 = vrot.slane %v3760_v56, 3  ;;  %3838 = vst [vmem:[#allocation1 + $0x1] ss:$9 sm:$0xff] %v3760_v56  ;;  %v3704_v42 = vpop.f32.mrf.mxu2  ;;  %v3789_v5 = vrot.slane %v3760_v56, 4 }
 0x57d   :  { %v3705_v3 = vadd.f32 %v3704_v42, %v3677_v57  ;;  %v3732_v26 = vpop.f32.mrf.mxu3  ;;  %v3790_v29 = vrot.slane %v3760_v56, 5  ;;  %v3791_v20 = vrot.slane %v3760_v56, 6  ;;  %v3792_v50 = vrot.slane %v3760_v56, 7 }
 0x57e   :  { %3839 = vst [vmem:[#allocation1 + $0x2] ss:$9 sm:$0xff] %v3786_v11 }
 0x57f   :  { %3840 = vst [vmem:[#allocation1 + $0x3] ss:$9 sm:$0xff] %v3787_v43  ;;  %v3733_v17 = vadd.f32 %v3732_v26, %v3705_v3 }
 0x580   :  { %3841 = vst [vmem:[#allocation1 + $0x4] ss:$9 sm:$0xff] %v3788_v32 }
 0x581   :  { %v3754_v52 = vmul.f32 0.01, %v3733_v17  ;;  %vm3747_vm12 = vcmp.ge.f32.partialorder %v3733_v17, 0.0 }
 0x583   :  { %v3761_v36 = vsel %vm3747_vm12, %v3733_v17, %v3754_v52  ;;  %vm4169_vm12 = vcmask 1042432  }
 0x584   :  { %v3793_v15 = vrot.slane %v3761_v36, 1  ;;  %v3794_v59 = vrot.slane %v3761_v36, 2  ;;  %v3795_v14 = vrot.slane %v3761_v36, 3  ;;  %v3796_v54 = vrot.slane %v3761_v36, 4 }
 0x585   :  { %v3797_v45 = vrot.slane %v3761_v36, 5  ;;  %v3798_v27 = vrot.slane %v3761_v36, 6  ;;  %v3799_v53 = vrot.slane %v3761_v36, 7 }
 0x587   :  { %v3842_v46 = vld [vmem:[#allocation1] sm:$0xff] }
 0x588   :  { %3843 = vst [vmem:[#allocation1] ss:$9 sm:$0xff] %v3789_v5  ;;  %v8537_v10 = vpack.c.bf16 %v3842_v46, %v3842_v46 }
 0x589   :  { %3844 = vst [vmem:[#allocation1 + $0x1] ss:$9 sm:$0xff] %v3790_v29 }
 0x58a   :  { %3845 = vst [vmem:[#allocation1 + $0x2] ss:$9 sm:$0xff] %v3791_v20  ;;  %v3979_v60 = vunpack.c.l.b16 %v8537_v10 }
 0x58b   :  { %3846 = vst [vmem:[#allocation1 + $0x3] ss:$9 sm:$0xff] %v3792_v50 }
 0x58c   :  { %3847 = vst [vmem:[#allocation1 + $0x4] ss:$9 sm:$0xff] %v3761_v36  ;;  %v8540_v1 = vpack.c.b16 %v3979_v60, %v3979_v60 }
 0x58e   :  { %3987 = vrot.lane.b32.xlu1 %v8540_v1, %s9439_s28 }
 0x593   :  { %v8544_v7 = vld [vmem:[#allocation1] sm:$0xff] }
 0x594   :  { %3849 = vst [vmem:[#allocation1] ss:$9 sm:$0xff] %v3793_v15 }
 0x595   :  { %3850 = vst [vmem:[#allocation1 + $0x1] ss:$9 sm:$0xff] %v3794_v59 }
 0x596   :  { %3851 = vst [vmem:[#allocation1 + $0x2] ss:$9 sm:$0xff] %v3795_v14  ;;  %3963 = vrot.lane.b32.xlu1 %v8546_v13, %s9439_s28  ;;  %v8576_v14 = vpack.c.bf16 %v8544_v7, %v8544_v7 }
 0x597   :  { %3852 = vst [vmem:[#allocation1 + $0x3] ss:$9 sm:$0xff] %v3796_v54 }
 0x598   :  { %3853 = vst [vmem:[#allocation1 + $0x4] ss:$9 sm:$0xff] %v3797_v45  ;;  %v4025_v7 = vunpack.c.l.b16 %v8576_v14 }
 0x59e   :  { %4013 = vrot.lane.b32.xlu1 %v8550_v51, %s9439_s28 }
 0x59f   :  { %v8554_v24 = vld [vmem:[#allocation1] sm:$0xff] }
 0x5a0   :  { %3855 = vst [vmem:[#allocation1] ss:$9 sm:$0xff] %v3798_v27  ;;  %v8582_v27 = vpack.c.bf16 %v8554_v24, %v8554_v24 }
 0x5a1   :  { %3856 = vst [vmem:[#allocation1 + $0x1] ss:$9 sm:$0xff] %v3799_v53  ;;  %v3679_v48 = vpop.f32.mrf.mxu1 }
 0x5a2   :  { %v3680_v61 = vadd.f32 %v8517_v0, %v3679_v48 }
 0x5a7   :  { %v3707_v8 = vpop.f32.mrf.mxu2 }
 0x5a8   :  { %v3708_v18 = vadd.f32 %v3707_v8, %v3680_v61  ;;  %v3735_v31 = vpop.f32.mrf.mxu3 }
 0x5a9   :  { %v3681_v16 = vpop.f32.mrf.mxu1 }
 0x5aa   :  { %v3736_v2 = vadd.f32 %v3735_v31, %v3708_v18  ;;  %v3682_v25 = vadd.f32 %v8517_v0, %v3681_v16  ;;  %v3972_v18 = vrot.slane %v8527_v12, 1  ;;  %v8592_v16 = vpack.c.bf16 %v8522_v49, %v8522_v49 }
 0x5ac   :  { %vm3748_vm13 = vcmp.ge.f32.partialorder %v3736_v2, 0.0  ;;  %v3755_v47 = vmul.f32 0.01, %v3736_v2  ;;  %v3905_v49 = vunpack.c.l.b16 %v8592_v16 }
 0x5ae   :  { %v3762_v37 = vsel %vm3748_vm13, %v3736_v2, %v3755_v47  ;;  %v3908_v47 = vunpack.c.l.b16 %v8582_v27  ;;  %vm9616_vm13 = vmmov %vm9615_vm2 }
 0x5af   :  { %v3800_v55 = vrot.slane %v3762_v37, 1  ;;  %v3801_v38 = vrot.slane %v3762_v37, 2  ;;  %3857 = vst [vmem:[#allocation1 + $0x2] ss:$9 sm:$0xff] %v3762_v37  ;;  %v3709_v6 = vpop.f32.mrf.mxu2  ;;  %v3802_v44 = vrot.slane %v3762_v37, 3  ;;  %v3803_v34 = vrot.slane %v3762_v37, 4 }
 0x5b0   :  { %v3737_v21 = vpop.f32.mrf.mxu3  ;;  %v3710_v19 = vadd.f32 %v3709_v6, %v3682_v25  ;;  %v3804_v41 = vrot.slane %v3762_v37, 5  ;;  %v3805_v62 = vrot.slane %v3762_v37, 6  ;;  %v3806_v56 = vrot.slane %v3762_v37, 7 }
 0x5b1   :  { %3858 = vst [vmem:[#allocation1 + $0x3] ss:$9 sm:$0xff] %v3800_v55  ;;  %v3684_v30 = vpop.f32.mrf.mxu1  ;;  %v8601_v55 = vpack.c.b16 %v4025_v7, %v4025_v7 }
 0x5b2   :  { %3859 = vst [vmem:[#allocation1 + $0x4] ss:$9 sm:$0xff] %v3801_v38  ;;  %v3738_v35 = vadd.f32 %v3737_v21, %v3710_v19  ;;  %v3685_v26 = vadd.f32 %v8517_v0, %v3684_v30  ;;  %v4009_v38 = vrot.slane %v8540_v1, 1  ;;  %v3998_v21 = vshll.u32 %v8540_v1, 16 }
 0x5b3   :  { %v8607_v30 = vpack.c.b16 %v3908_v47, %v3908_v47  ;;  %v5569_v47 = vld [vmem:[%s9062_s7 + $0x30] sm:$0xff] }
 0x5b4   :  { %v3756_v43 = vmul.f32 0.01, %v3738_v35  ;;  %vm3749_vm4 = vcmp.ge.f32.partialorder %v3738_v35, 0.0 }
 0x5b6   :  { %v3763_v3 = vsel %vm3749_vm4, %v3738_v35, %v3756_v43  ;;  %vm9617_vm4 = vcmask 1041408  }
 0x5b7   :  { %v3712_v28 = vpop.f32.mrf.mxu2  ;;  %v3807_v17 = vrot.slane %v3763_v3, 1  ;;  %v3808_v46 = vrot.slane %v3763_v3, 2  ;;  %v3809_v20 = vrot.slane %v3763_v3, 3  ;;  %v3810_v50 = vrot.slane %v3763_v3, 4 }
 0x5b8   :  { %v3740_v9 = vpop.f32.mrf.mxu3  ;;  %v3713_v5 = vadd.f32 %v3712_v28, %v3685_v26  ;;  %v3811_v54 = vrot.slane %v3763_v3, 5  ;;  %v3812_v53 = vrot.slane %v3763_v3, 6  ;;  %v3813_v8 = vrot.slane %v3763_v3, 7 }
 0x5b9   :  { %v3860_v23 = vld [vmem:[#allocation1] sm:$0xff]  ;;  %v3686_v63 = vpop.f32.mrf.mxu1  ;;  %v3927_v26 = vshll.u32 %v8527_v12, 16 }
 0x5ba   :  { %3861 = vst [vmem:[#allocation1] ss:$9 sm:$0xff] %v3802_v44  ;;  %v8558_v4 = vpack.c.bf16 %v3860_v23, %v3860_v23  ;;  %v3741_v36 = vadd.f32 %v3740_v9, %v3713_v5  ;;  %v4032_v44 = vshll.u32 %v8601_v55, 16  ;;  %v8615_v9 = vpack.c.b16 %v3905_v49, %v3905_v49  ;;  %v5578_v49 = vld [vmem:[%s9062_s7 + $0x78] sm:$0xff] }
 0x5bb   :  { %3862 = vst [vmem:[#allocation1 + $0x1] ss:$9 sm:$0xff] %v3803_v34  ;;  %v4000_v23 = vrot.slane %v3998_v21, 1  ;;  %v3941_v63 = vshll.u32 %v8607_v30, 16  ;;  %4639 = vmatpush.bf16.msrb.mxu1 %v5578_v49  ;;  %v5583_v49 = vld [vmem:[%s9062_s7 + $0xa0] sm:$0xff] }
 0x5bc   :  { %3863 = vst [vmem:[#allocation1 + $0x2] ss:$9 sm:$0xff] %v3804_v41  ;;  %v3909_v11 = vunpack.c.l.b16 %v8558_v4  ;;  %v3757_v15 = vmul.f32 0.01, %v3741_v36  ;;  %vm3750_vm8 = vcmp.ge.f32.partialorder %v3741_v36, 0.0  ;;  %v3996_v41 = vshrl.u32 %v8540_v1, 16 }
 0x5bd   :  { %3864 = vst [vmem:[#allocation1 + $0x3] ss:$9 sm:$0xff] %v3805_v62  ;;  %v4034_v35 = vrot.slane %v4032_v44, 1  ;;  %v3920_v43 = vshll.u32 %v8615_v9, 16  ;;  %v5577_v44 = vld [vmem:[%s9062_s7 + $0x70] sm:$0xff] }
 0x5be   :  { %3865 = vst [vmem:[#allocation1 + $0x4] ss:$9 sm:$0xff] %v3806_v56  ;;  %v8561_v32 = vpack.c.b16 %v3909_v11, %v3909_v11  ;;  %v3764_v48 = vsel %vm3750_vm8, %v3741_v36, %v3757_v15  ;;  %v8626_v62 = vor.u32 %v4000_v23, %v3996_v41  ;;  %v3943_v56 = vrot.slane %v3941_v63, 1  ;;  %vm9618_vm8 = vmmov %vm9615_vm2 }
 0x5bf   :  { %v3714_v42 = vpop.f32.mrf.mxu2  ;;  %v3814_v24 = vrot.slane %v3764_v48, 1  ;;  %v4030_v11 = vshrl.u32 %v8601_v55, 16  ;;  %v3922_v5 = vrot.slane %v3920_v43, 1  ;;  %4640 = vmatpush.bf16.msrb.mxu1 %v5577_v44 }
 0x5c0   :  { %v3742_v57 = vpop.f32.mrf.mxu3  ;;  %3989 = vrot.lane.b32.xlu2 %v8561_v32, %s9439_s28  ;;  %v3975_v28 = vrot.slane %v8561_v32, 1  ;;  %v3948_v36 = vshll.u32 %v8561_v32, 16 }
 0x5c1   :  { %v3939_v57 = vshrl.u32 %v8607_v30, 16 }
 0x5c5   :  { %v3866_v29 = vld [vmem:[#allocation1] sm:$0xff] }
 0x5c6   :  { %v8566_v52 = vpack.c.bf16 %v3866_v29, %v3866_v29  ;;  %3867 = vst [vmem:[#allocation1] ss:$9 sm:$0xff] %v3763_v3  ;;  %v4035_v3 = vor.u32 %v4034_v35, %v4030_v11  ;;  %v5567_v35 = vld [vmem:[%s9062_s7 + $0x20] sm:$0xff] }
 0x5c7   :  { %3868 = vst [vmem:[#allocation1 + $0x1] ss:$9 sm:$0xff] %v3807_v17  ;;  %v3944_v17 = vor.u32 %v3943_v56, %v3939_v57  ;;  %v5576_v56 = vld [vmem:[%s9062_s7 + $0x68] sm:$0xff]  ;;  %v5586_v57 = vld [vmem:[%s9062_s7 + $0xb8] sm:$0xff] }
 0x5c8   :  { %v3910_v60 = vunpack.c.l.b16 %v8566_v52  ;;  %3869 = vst [vmem:[#allocation1 + $0x2] ss:$9 sm:$0xff] %v3808_v46  ;;  %v3918_v46 = vshrl.u32 %v8615_v9, 16  ;;  %4641 = vmatpush.bf16.msrb.mxu1 %v5576_v56  ;;  %4657 = vmatpush.bf16.msrb.mxu2 %v5586_v57  ;;  %v5564_v56 = vld [vmem:[%s9062_s7 + $0x8] sm:$0xff] }
 0x5c9   :  { %3870 = vst [vmem:[#allocation1 + $0x3] ss:$9 sm:$0xff] %v3809_v20  ;;  %v3929_v20 = vrot.slane %v3927_v26, 1  ;;  %v5575_v26 = vld [vmem:[%s9062_s7 + $0x60] sm:$0xff] }
 0x5ca   :  { %v3916_v40 = vpack.c.b16 %v3910_v60, %v3910_v60  ;;  %3871 = vst [vmem:[#allocation1 + $0x4] ss:$9 sm:$0xff] %v3810_v50  ;;  %v3923_v50 = vor.u32 %v3922_v5, %v3918_v46  ;;  %v3925_v60 = vshrl.u32 %v8527_v12, 16  ;;  %v5585_v46 = vld [vmem:[%s9062_s7 + $0xb0] sm:$0xff] }
 0x5cc   :  { %3991 = vrot.lane.b32.xlu0 %v3916_v40, %s9439_s28  ;;  %v8570_v0 = vrot.slane %v3916_v40, 1  ;;  %v3955_v39 = vshll.u32 %v3916_v40, 16  ;;  %v3953_v33 = vshrl.u32 %v3916_v40, 16  ;;  %4642 = vmatpush.bf16.msrb.mxu1 %v5575_v26 }
 0x5cd   :  { %4658 = vmatpush.bf16.msrb.mxu2 %v5585_v46  ;;  %v3974_v46 = vrot.slane %v8607_v30, 1 }
 0x5ce   :  { %4019 = vrot.lane.b32.xlu1 %v8570_v0, %s9439_s28  ;;  %v3957_v59 = vrot.slane %v3955_v39, 1  ;;  %v3930_v39 = vor.u32 %v3929_v20, %v3925_v60 }
 0x5d0   :  { %v8578_v45 = vor.u32 %v3957_v59, %v3953_v33  ;;  %v3950_v33 = vrot.slane %v3948_v36, 1 }
 0x5d1   :  { %v3872_v61 = vld [vmem:[#allocation1] sm:$0xff] }
 0x5d2   :  { %3969 = vrot.lane.b32.xlu2 %v8578_v45, %s9439_s28  ;;  %v8587_v31 = vpack.c.bf16 %v3872_v61, %v3872_v61  ;;  %3873 = vst [vmem:[#allocation1] ss:$9 sm:$0xff] %v3811_v54  ;;  %v3946_v54 = vshrl.u32 %v8561_v32, 16 }
 0x5d3   :  { %3874 = vst [vmem:[#allocation1 + $0x1] ss:$9 sm:$0xff] %v3812_v53 }
 0x5d4   :  { %4011 = vrot.lane.b32.xlu0 %v3972_v18, %s9439_s28  ;;  %v3980_v2 = vunpack.c.l.b16 %v8587_v31  ;;  %3875 = vst [vmem:[#allocation1 + $0x2] ss:$9 sm:$0xff] %v3813_v8  ;;  %v8651_v53 = vor.u32 %v3950_v33, %v3946_v54  ;;  %v5565_v33 = vld [vmem:[%s9062_s7 + $0x10] sm:$0xff]  ;;  %v5574_v54 = vld [vmem:[%s9062_s7 + $0x58] sm:$0xff] }
 0x5d5   :  { %3876 = vst [vmem:[#allocation1 + $0x3] ss:$9 sm:$0xff] %v3764_v48  ;;  %4643 = vmatpush.bf16.msrb.mxu1 %v5574_v54 }
 0x5d6   :  { %v8599_v37 = vpack.c.b16 %v3980_v2, %v3980_v2  ;;  %3877 = vst [vmem:[#allocation1 + $0x4] ss:$9 sm:$0xff] %v3814_v24  ;;  %v5570_v24 = vld [vmem:[%s9062_s7 + $0x38] sm:$0xff]  ;;  %v3984_v2 = vpop.permute.xlu2 %3983 }
 0x5d7   :  { %4621 = vmatpush.bf16.msrb.mxu3 %v5570_v24  ;;  %v8677_v63 = vpop.permute.xlu0 %3985 }
 0x5d8   :  { %v4005_v6 = vshll.u32 %v8599_v37, 16  ;;  %v4003_v25 = vshrl.u32 %v8599_v37, 16  ;;  %v4010_v15 = vrot.slane %v8599_v37, 1 }
 0x5da   :  { %4015 = vrot.lane.b32.xlu2 %v4009_v38, %s9439_s28  ;;  %v4007_v19 = vrot.slane %v4005_v6, 1 }
 0x5db   :  { %4622 = vmatpush.bf16.msrb.mxu3 %v5569_v47 }
 0x5dc   :  { %v8617_v34 = vor.u32 %v4007_v19, %v4003_v25  ;;  %4017 = vrot.lane.b32.xlu0 %v3975_v28, %s9439_s28  ;;  %v5568_v19 = vld [vmem:[%s9062_s7 + $0x28] sm:$0xff] }
 0x5dd   :  { %v3878_v42 = vld [vmem:[#allocation1] sm:$0xff] }
 0x5de   :  { %4047 = vrot.lane.b32.xlu1 %v8617_v34, %s9439_s28  ;;  %v8635_v29 = vpack.c.bf16 %v3878_v42, %v3878_v42 }
 0x5df   :  { %4623 = vmatpush.bf16.msrb.mxu3 %v5568_v19 }
 0x5e0   :  { %v4026_v40 = vunpack.c.l.b16 %v8635_v29 }
 0x5e2   :  { %4043 = vrot.lane.b32.xlu2 %v8626_v62, %s9439_s28  ;;  %v8645_v59 = vpack.c.b16 %v4026_v40, %v4026_v40 }
 0x5e3   :  { %4624 = vmatpush.bf16.msrb.mxu3 %v5567_v35 }
 0x5e4   :  { %4045 = vrot.lane.b32.xlu0 %v4035_v3, %s9439_s28  ;;  %v4039_v48 = vshll.u32 %v8645_v59, 16  ;;  %v4037_v8 = vshrl.u32 %v8645_v59, 16  ;;  %v5566_v3 = vld [vmem:[%s9062_s7 + $0x18] sm:$0xff] }
 0x5e6   :  { %3965 = vrot.lane.b32.xlu1 %v3944_v17, %s9439_s28  ;;  %v4041_v61 = vrot.slane %v4039_v48, 1  ;;  %v3971_v17 = vrot.slane %v8615_v9, 1  ;;  %v4140_v48 = vrot.slane %v8550_v51, 4 }
 0x5e7   :  { %4625 = vmatpush.bf16.msrb.mxu3 %v5566_v3 }
 0x5e8   :  { %v4042_v7 = vor.u32 %v4041_v61, %v4037_v8  ;;  %v8707_v20 = vsel %vm9613_vm10, %v3971_v17, %v3984_v2  ;;  %vm9620_vm10 = vmmov %vm9615_vm2  ;;  %v4051_v17 = vrot.slane %v8601_v55, 1  ;;  %v8795_v55 = vrot.slane %v4010_v15, 4 }
 0x5ea   :  { %3959 = vrot.lane.b32.xlu2 %v3923_v50, %s9439_s28 }
 0x5eb   :  { %4626 = vmatpush.bf16.msrb.mxu3 %v5565_v33  ;;  %v5581_v33 = vld [vmem:[%s9062_s7 + $0x90] sm:$0xff] }
 0x5ec   :  { %3961 = vrot.lane.b32.xlu0 %v3930_v39, %s9439_s28 }
 0x5ee   :  { %4021 = vrot.lane.b32.xlu1 %v4010_v15, %s9439_s28 }
 0x5ef   :  { %4627 = vmatpush.bf16.msrb.mxu3 %v5564_v56 }
 0x5f2   :  { %3967 = vrot.lane.b32.xlu2 %v8651_v53, %s9439_s28 }
 0x5f4   :  { %3993 = vrot.lane.b32.xlu0 %v8599_v37, %s9439_s28  ;;  %v4152_v37 = vrot.slane %v8570_v0, 4 }
 0x5fa   :  { %4049 = vrot.lane.b32.xlu2 %v4042_v7, %s9439_s28  ;;  %s9650_s28 = sld [smem:[#allocation99_spill]] }
 0x600   :  { %v3988_v21 = vpop.permute.xlu1 %3987 }
 0x608   :  { %v3964_v41 = vpop.permute.xlu1 %3963 }
 0x609   :  { %v8701_v5 = vsel %vm9611_vm9, %v8531_v58, %v3964_v41  ;;  %v4137_v58 = vrot.slane %v8707_v20, 7  ;;  %vm9619_vm9 = vmmov %vm9615_vm2 }
 0x60a   :  { %v4139_v60 = vrot.slane %v8701_v5, 5 }
 0x60c   :  { %v4168_v7 = vsel %vm4165_vm5, %v4139_v60, %v4140_v48 }
 0x610   :  { %v8687_v42 = vpop.permute.xlu1 %4013 }
 0x61a   :  { %v8669_v6 = vpop.permute.xlu2 %3989 }
 0x62c   :  { %v3970_v25 = vpop.permute.xlu2 %3969 }
 0x634   :  { %v4016_v23 = vpop.permute.xlu2 %4015 }
 0x63c   :  { %v8685_v11 = vpop.permute.xlu2 %4043 }
 0x63e   :  { %v3992_v43 = vpop.permute.xlu0 %3991 }
 0x63f   :  { %v8741_v24 = vsel %vm9616_vm13, %v3975_v28, %v3992_v43  ;;  %v4079_v43 = vsel %vm9620_vm10, %v8550_v51, %v3988_v21  ;;  %vm9622_vm13 = vmmov %vm9615_vm2  ;;  %v5572_v21 = vld [vmem:[%s9062_s7 + $0x48] sm:$0xff]  ;;  %vm4174_vm10 = vcmask 1044484  }
 0x640   :  { %v4020_v61 = vpop.permute.xlu1 %4019  ;;  %v4153_v44 = vrot.slane %v8741_v24, 7  ;;  %v5592_v51 = vld [vmem:[%s9062_s7 + $0xe8] sm:$0xff] }
 0x641   :  { %v8753_v32 = vsel %vm9618_vm8, %v8578_v45, %v4020_v61  ;;  %v5573_v45 = vld [vmem:[%s9062_s7 + $0x50] sm:$0xff]  ;;  %vm9623_vm8 = vmmov %vm9615_vm2 }
 0x642   :  { %v4154_v3 = vrot.slane %v8753_v32, 6  ;;  %4644 = vmatpush.bf16.msrb.mxu1 %v5573_v45 }
 0x644   :  { %v3960_v50 = vpop.permute.xlu2 %3959 }
 0x645   :  { %v8712_v9 = vsel %vm9614_vm11, %v8592_v16, %v3960_v50  ;;  %v5584_v16 = vld [vmem:[%s9062_s7 + $0xa8] sm:$0xff]  ;;  %vm9621_vm11 = vmmov %vm9615_vm2  ;;  %v4097_v50 = vsel %vm9615_vm2, %v8626_v62, %v4016_v23  ;;  %v4145_v62 = vrot.slane %v4079_v43, 7 }
 0x646   :  { %v4012_v36 = vpop.permute.xlu0 %4011  ;;  %v4162_v8 = vsel %vm3217_vm14, %v8712_v9, %v4137_v58  ;;  %4659 = vmatpush.bf16.msrb.mxu2 %v5584_v16  ;;  %v8776_v57 = vsel %vm9621_vm11, %v8566_v52, %v3970_v25  ;;  %v5563_v52 = vld [vmem:[%s9062_s7] sm:$0xff]  ;;  %v4082_v25 = vsel %vm9623_vm8, %v3974_v46, %v8669_v6  ;;  %v4146_v15 = vrot.slane %v4097_v50, 6  ;;  %4645 = vmatpush.bf16.msrb.mxu1 %v5572_v21  ;;  %vm9625_vm11 = vmmov %vm9615_vm2 }
 0x647   :  { %v8716_v40 = vsel %vm9615_vm2, %v3930_v39, %v4012_v36  ;;  %v4151_v23 = vrot.slane %v8776_v57, 5  ;;  %v4148_v16 = vrot.slane %v4051_v17, 4  ;;  %v4196_v61 = vsel %vm3217_vm14, %v8701_v5, %v4145_v62  ;;  %4628 = vmatpush.bf16.msrb.mxu3 %v5563_v52  ;;  %v5579_v52 = vld [vmem:[%s9062_s7 + $0x80] sm:$0xff] }
 0x648   :  { %v4138_v39 = vrot.slane %v8716_v40, 6  ;;  %v8829_v12 = vsel %vm9625_vm11, %v8546_v13, %v8687_v42  ;;  %v5580_v13 = vld [vmem:[%s9062_s7 + $0x88] sm:$0xff]  ;;  %vm9627_vm8 = vcmask 1041408   ;;  %vm9629_vm11 = vmmov %vm9615_vm2 }
 0x649   :  { %v4198_v42 = vsel %vm9627_vm8, %v4196_v61, %v4146_v15 }
 0x64a   :  { %v4164_v2 = vsel %vm9617_vm4, %v4162_v8, %v4138_v39  ;;  %4660 = vmatpush.bf16.msrb.mxu2 %v5583_v49  ;;  %v4216_v49 = vsel %vm4165_vm5, %v4151_v23, %v4152_v37 }
 0x64b   :  { %v4170_v47 = vsel %vm4169_vm12, %v4164_v2, %v4168_v7  ;;  %v5571_v7 = vld [vmem:[%s9062_s7 + $0x40] sm:$0xff]  ;;  %v4204_v2 = vsel %vm3223_vm15, %v8701_v5, %v4145_v62  ;;  %v4142_v5 = vrot.slane %v8829_v12, 6 }
 0x64c   :  { %4359 = vst [vmem:[#allocation1] ss:$9 sm:$0xff] %v4170_v47  ;;  %v3968_v19 = vpop.permute.xlu2 %3967  ;;  %v4205_v56 = vsel %vm3225_vm1, %v4204_v2, %v4146_v15  ;;  %4646 = vmatpush.bf16.msrb.mxu1 %v5571_v7  ;;  %v4144_v15 = vrot.slane %v4009_v38, 4 }
 0x64d   :  { %v8757_v28 = vsel %vm9619_vm9, %v8558_v4, %v3968_v19  ;;  %v5582_v4 = vld [vmem:[%s9062_s7 + $0x98] sm:$0xff]  ;;  %vm9624_vm9 = vmmov %vm9615_vm2  ;;  %v4221_v19 = vsel %vm4174_vm10, %v4151_v23, %v4152_v37  ;;  %v4175_v23 = vsel %vm4174_vm10, %v4139_v60, %v4140_v48 }
 0x64e   :  { %v4018_v41 = vpop.permute.xlu0 %4017  ;;  %v4226_v35 = vsel %vm3217_vm14, %v8757_v28, %v4153_v44  ;;  %4661 = vmatpush.bf16.msrb.mxu2 %v5582_v4  ;;  %v8816_v6 = vsel %vm9624_vm9, %v3972_v18, %v8677_v63  ;;  %v4149_v18 = vrot.slane %v4082_v25, 7  ;;  %vm9628_vm9 = vmmov %vm9615_vm2 }
 0x64f   :  { %v4228_v30 = vsel %vm9617_vm4, %v4226_v35, %v4154_v3  ;;  %v4100_v63 = vsel %vm9615_vm2, %v8651_v53, %v4018_v41  ;;  %vm9626_vm4 = vmmov %vm9615_vm2  ;;  %v4172_v53 = vsel %vm3223_vm15, %v8712_v9, %v4137_v58  ;;  %v4109_v4 = vsel %vm9628_vm9, %v8537_v10, %v8685_v11  ;;  %v5598_v9 = vld [vmem:[%s9062_s7 + $0x118] sm:$0xff]  ;;  %v5593_v11 = vld [vmem:[%s9062_s7 + $0xf0] sm:$0xff] }
 0x650   :  { %v4048_v26 = vpop.permute.xlu1 %4047  ;;  %v4173_v43 = vsel %vm3225_vm1, %v4172_v53, %v4138_v39  ;;  %vm9630_vm2 = vmmov %vm9627_vm8  ;;  %v4143_v21 = vrot.slane %v4109_v4, 5  ;;  %4697 = vmatpush.bf16.msra.mxu1 %v5598_v9 }
 0x651   :  { %v8785_v36 = vsel %vm9622_vm13, %v8587_v31, %v4048_v26  ;;  %vm4176_vm13 = vcmask 1043457   ;;  %v4150_v26 = vrot.slane %v4100_v63, 6  ;;  %vm9631_vm8 = vmmov %vm9630_vm2 }
 0x652   :  { %v4155_v31 = vrot.slane %v8785_v36, 5  ;;  %4662 = vmatpush.bf16.msrb.mxu2 %v5581_v33  ;;  %v4186_v1 = vsel %vm4165_vm5, %v4143_v21, %v4144_v15  ;;  %vm9632_vm9 = vmmov %vm9626_vm4  ;;  %v5590_v36 = vld [vmem:[%s9062_s7 + $0xd8] sm:$0xff] }
 0x654   :  { %v4231_v54 = vsel %vm4165_vm5, %v4155_v31, %v8795_v55 }
 0x655   :  { %v4232_v8 = vsel %vm4169_vm12, %v4228_v30, %v4231_v54  ;;  %v4141_v54 = vrot.slane %v8816_v6, 7  ;;  %v4191_v6 = vsel %vm4174_vm10, %v4143_v21, %v4144_v15 }
 0x656   :  { %4377 = vst [vmem:[#allocation1 + $0x6] ss:$9 sm:$0xff] %v4232_v8  ;;  %v4046_v47 = vpop.permute.xlu0 %4045  ;;  %4663 = vmatpush.bf16.msrb.mxu2 %v5580_v13 }
 0x657   :  { %v4112_v35 = vsel %vm9626_vm4, %v8576_v14, %v4046_v47  ;;  %v5594_v14 = vld [vmem:[%s9062_s7 + $0xf8] sm:$0xff] }
 0x658   :  { %v3966_v41 = vpop.permute.xlu1 %3965  ;;  %v4147_v45 = vrot.slane %v4112_v35, 5  ;;  %4675 = vmatpush.bf16.msra.mxu3 %v5594_v14 }
 0x659   :  { %v4064_v20 = vsel %vm9629_vm11, %v8582_v27, %v3966_v41  ;;  %vm9633_vm11 = vmmov %vm9626_vm4 }
 0x65a   :  { %v4211_v58 = vsel %vm3217_vm14, %v4064_v20, %v4149_v18  ;;  %v4219_v17 = vsel %vm3223_vm15, %v4064_v20, %v4149_v18  ;;  %v4201_v46 = vsel %vm4165_vm5, %v4147_v45, %v4148_v16  ;;  %v4206_v10 = vsel %vm4174_vm10, %v4147_v45, %v4148_v16  ;;  %4664 = vmatpush.bf16.msrb.mxu2 %v5579_v52  ;;  %v4050_v18 = vpop.permute.xlu2 %4049  ;;  %v5587_v52 = vld [vmem:[%s9062_s7 + $0xc0] sm:$0xff] }
 0x65b   :  { %v4213_v27 = vsel %vm9630_vm2, %v4211_v58, %v4150_v26  ;;  %v4220_v40 = vsel %vm3225_vm1, %v4219_v17, %v4150_v26  ;;  %v4202_v39 = vsel %vm4169_vm12, %v4198_v42, %v4201_v46  ;;  %v4207_v50 = vsel %vm4176_vm13, %v4205_v56, %v4206_v10  ;;  %vm9634_vm2 = vmmov %vm9626_vm4  ;;  %v5596_v26 = vld [vmem:[%s9062_s7 + $0x108] sm:$0xff] }
 0x65c   :  { %v4217_v30 = vsel %vm4169_vm12, %v4213_v27, %v4216_v49  ;;  %v4222_v62 = vsel %vm4176_vm13, %v4220_v40, %v4221_v19  ;;  %v4209_v25 = vrot.slane %v4207_v50, 1  ;;  %4368 = vst [vmem:[#allocation1 + $0x3] ss:$9 sm:$0xff] %v4202_v39  ;;  %v4177_v16 = vsel %vm4176_vm13, %v4173_v43, %v4175_v23  ;;  %4676 = vmatpush.bf16.msra.mxu3 %v5593_v11  ;;  %v5591_v19 = vld [vmem:[%s9062_s7 + $0xe0] sm:$0xff]  ;;  %v5588_v11 = vld [vmem:[%s9062_s7 + $0xc8] sm:$0xff] }
 0x65d   :  { %v4224_v33 = vrot.slane %v4222_v62, 1  ;;  %v4265_v37 = vunpack.i.h.s16 %v4217_v30  ;;  %v4179_v2 = vrot.slane %v4177_v16, 1  ;;  %v4118_v53 = vsel %vm9632_vm9, %v8635_v29, %v4050_v18  ;;  %v5595_v27 = vld [vmem:[%s9062_s7 + $0x100] sm:$0xff] }
 0x65e   :  { %v5320_v61 = vpack.i.b16 %v4217_v30, %v4209_v25  ;;  %v3962_v8 = vpop.permute.xlu0 %3961  ;;  %v4159_v4 = vrot.slane %v4118_v53, 5 }
 0x65f   :  { %v5321_v7 = vpack.i.b16 %v4224_v33, %v4265_v37  ;;  %v4058_v60 = vsel %vm9626_vm4, %v8524_v22, %v3962_v8  ;;  %v4234_v22 = vsel %vm3223_vm15, %v8757_v28, %v4153_v44  ;;  %v4236_v44 = vsel %vm4174_vm10, %v4155_v31, %v8795_v55  ;;  %vm9635_vm4 = vmmov %vm9631_vm8 }
 0x660   :  { %4371 = vst [vmem:[#allocation1 + $0x4] ss:$9 sm:$0xff] %v5320_v61  ;;  %v4181_v38 = vsel %vm3217_vm14, %v4058_v60, %v4141_v54  ;;  %v4189_v48 = vsel %vm3223_vm15, %v4058_v60, %v4141_v54  ;;  %4677 = vmatpush.bf16.msra.mxu3 %v5592_v51  ;;  %v4022_v35 = vpop.permute.xlu1 %4021  ;;  %v4235_v24 = vsel %vm3225_vm1, %v4234_v22, %v4154_v3  ;;  %v4052_v28 = vrot.slane %v8645_v59, 1  ;;  %v5597_v59 = vld [vmem:[%s9062_s7 + $0x110] sm:$0xff]  ;;  %v5602_v22 = vld [vmem:[%s9064_s9 + $0x18] sm:$0xff]  ;;  %vm9641_vm9 = vmmov %vm9635_vm4 }
 0x661   :  { %4374 = vst [vmem:[#allocation1 + $0x5] ss:$9 sm:$0xff] %v5321_v7  ;;  %v4183_v63 = vsel %vm9631_vm8, %v4181_v38, %v4142_v5  ;;  %v4190_v12 = vsel %vm3225_vm1, %v4189_v48, %v4142_v5  ;;  %v4106_v45 = vsel %vm9633_vm11, %v8617_v34, %v4022_v35  ;;  %v4237_v32 = vsel %vm4176_vm13, %v4235_v24, %v4236_v44  ;;  %v5599_v44 = vld [vmem:[%s9064_s9] sm:$0xff]  ;;  %vm9642_vm11 = vmmov %vm9635_vm4 }
 0x662   :  { %v4187_v47 = vsel %vm4169_vm12, %v4183_v63, %v4186_v1  ;;  %v4192_v49 = vsel %vm4176_vm13, %v4190_v12, %v4191_v6  ;;  %v4160_v55 = vrot.slane %v4052_v28, 4  ;;  %v4158_v34 = vrot.slane %v4106_v45, 6  ;;  %4698 = vmatpush.bf16.msra.mxu1 %v5597_v59  ;;  %4850 = vmatpush.bf16.msra.mxu2 %v5602_v22 }
 0x663   :  { %v4194_v13 = vrot.slane %v4192_v49, 1  ;;  %v4259_v42 = vunpack.i.h.s16 %v4187_v47  ;;  %v5318_v56 = vpack.i.b16 %v4187_v47, %v4179_v2  ;;  %v4239_v20 = vrot.slane %v4237_v32, 1  ;;  %v5635_v2 = vld [vmem:[%s9063_s8] ss:$0 sm:$0xff]  ;;  %v5601_v49 = vld [vmem:[%s9064_s9 + $0x10] sm:$0xff] }
 0x664   :  { %4678 = vmatpush.bf16.msra.mxu3 %v5591_v19  ;;  %v4246_v9 = vsel %vm4165_vm5, %v4159_v4, %v4160_v55  ;;  %v4251_v10 = vsel %vm4174_vm10, %v4159_v4, %v4160_v55  ;;  %vm4772_vm10 = vcmask 516096  }
 0x665   :  { %v5319_v41 = vpack.i.b16 %v4194_v13, %v4259_v42  ;;  %4362 = vst [vmem:[#allocation1 + $0x1] ss:$9 sm:$0xff] %v5318_v56  ;;  %v5600_v13 = vld [vmem:[%s9064_s9 + $0x8] sm:$0xff] }
 0x666   :  { %v3994_v14 = vpop.permute.xlu0 %3993  ;;  %4699 = vmatpush.bf16.msra.mxu1 %v5596_v26  ;;  %4851 = vmatpush.bf16.msra.mxu2 %v5601_v49 }
 0x667   :  { %4365 = vst [vmem:[#allocation1 + $0x2] ss:$9 sm:$0xff] %v5319_v41  ;;  %v4088_v29 = vsel %vm9634_vm2, %v8570_v0, %v3994_v14  ;;  %v5589_v0 = vld [vmem:[%s9062_s7 + $0xd0] sm:$0xff] }
 0x668   :  { %v4157_v3 = vrot.slane %v4088_v29, 7  ;;  %4679 = vmatpush.bf16.msra.mxu3 %v5590_v36 }
 0x66a   :  { %v4241_v31 = vsel %vm3217_vm14, %v8776_v57, %v4157_v3  ;;  %v4249_v43 = vsel %vm3223_vm15, %v8776_v57, %v4157_v3  ;;  %4700 = vmatpush.bf16.msra.mxu1 %v5595_v27  ;;  %vm9636_vm14 = vmmov %vm9634_vm2  ;;  %4852 = vmatpush.bf16.msra.mxu2 %v5600_v13 }
 0x66b   :  { %v4243_v58 = vsel %vm9635_vm4, %v4241_v31, %v4158_v34  ;;  %v4250_v46 = vsel %vm3225_vm1, %v4249_v43, %v4158_v34  ;;  %vm9637_vm1 = vmmov %vm9634_vm2 }
 0x66c   :  { %v4247_v17 = vsel %vm4169_vm12, %v4243_v58, %v4246_v9  ;;  %4680 = vmatpush.bf16.msra.mxu3 %v5589_v0  ;;  %v4252_v40 = vsel %vm4176_vm13, %v4250_v46, %v4251_v10  ;;  %vm9638_vm8 = vmmov %vm9637_vm1 }
 0x66d   :  { %v5322_v57 = vpack.i.b16 %v4247_v17, %v4239_v20  ;;  %v4254_v39 = vrot.slane %v4252_v40, 1  ;;  %v4271_v50 = vunpack.i.h.s16 %v4247_v17  ;;  %vm9643_vm2 = vmmov %vm9637_vm1 }
 0x66e   :  { %4853 = vmatpush.bf16.msra.mxu2 %v5599_v44 }
 0x66f   :  { %4380 = vst [vmem:[#allocation1 + $0x7] ss:$9 sm:$0xff] %v5322_v57  ;;  %v5323_v21 = vpack.i.b16 %v4254_v39, %v4271_v50 }
 0x670   :  { %4681 = vmatpush.bf16.msra.mxu3 %v5588_v11 }
 0x674   :  { %4682 = vmatpush.bf16.msra.mxu3 %v5587_v52 }
 0x676   :  { %v4381_v30 = vld [vmem:[#allocation1] sm:$0xff]  ;;  %v4382_v23 = vld [vmem:[#allocation1 + $0x9] sm:$0xff]  ;;  %v4383_v33 = vld [vmem:[#allocation1 + $0x12] sm:$0xff] }
 0x677   :  { %v4384_v62 = vld [vmem:[#allocation1 + $0x1b] sm:$0xff]  ;;  %v4385_v25 = vld [vmem:[#allocation1 + $0x24] sm:$0xff]  ;;  %4629 = vmatmul.bf16.vlgmr.msrb.gmra.mxu3 %v4381_v30  ;;  %4647 = vmatmul.bf16.vlgmr.msrb.gmra.mxu1 %v4382_v23 }
 0x678   :  { %4665 = vmatmul.bf16.vlgmr.msrb.gmra.mxu2 %v4383_v33  ;;  %4387 = vst [vmem:[#allocation1] ss:$9 sm:$0xff] %v5323_v21 }
 0x67f   :  { %v4388_v37 = vld [vmem:[#allocation1] sm:$0xff]  ;;  %v4389_v15 = vld [vmem:[#allocation1 + $0x9] sm:$0xff]  ;;  %v4390_v54 = vld [vmem:[#allocation1 + $0x12] sm:$0xff] }
 0x680   :  { %v4391_v16 = vld [vmem:[#allocation1 + $0x1b] sm:$0xff]  ;;  %v4392_v61 = vld [vmem:[#allocation1 + $0x24] sm:$0xff] }
 0x687   :  { %4634 = vmatmul.bf16.gmra.mxu3 %v4388_v37  ;;  %4652 = vmatmul.bf16.gmra.mxu1 %v4389_v15 }
 0x688   :  { %4670 = vmatmul.bf16.gmra.mxu2 %v4390_v54 }
 0x697   :  { %4683 = vmatmul.bf16.vlgmr.msra.gmra.mxu3 %v4384_v62  ;;  %5468 = vmatmul.msk.bf16.vlgmr.msra.gmra.mxu1 %vm9636_vm14, %v4385_v25 }
 0x6a7   :  { %4688 = vmatmul.bf16.gmra.mxu3 %v4391_v16  ;;  %5469 = vmatmul.msk.bf16.gmra.mxu1 %vm9637_vm1, %v4392_v61 }
 0x6f4   :  { %v4648_v8 = vpop.f32.mrf.mxu1 }
 0x6fa   :  { %v4630_v51 = vpop.f32.mrf.mxu3 }
 0x6fb   :  { %v4666_v5 = vpop.f32.mrf.mxu2  ;;  %v4631_v63 = vadd.f32 %v5635_v2, %v4630_v51  ;;  %v5691_v51 = vmov 9.0  }
 0x6fc   :  { %v4650_v7 = vpop.f32.mrf.mxu1  ;;  %5642 = vrcp.f32 %v5691_v51 }
 0x6fd   :  { %v4649_v19 = vadd.f32 %v4648_v8, %v4631_v63  ;;  %v4863_v63 = vld [vmem:[%s9640_s6] sm:$0x3] }
 0x6ff   :  { %v4667_v42 = vadd.f32 %v4666_v5, %v4649_v19 }
 0x702   :  { %v4632_v60 = vpop.f32.mrf.mxu3 }
 0x703   :  { %v4668_v1 = vpop.f32.mrf.mxu2  ;;  %v4633_v53 = vadd.f32 %v5635_v2, %v4632_v60 }
 0x704   :  { %v4653_v38 = vpop.f32.mrf.mxu1 }
 0x705   :  { %v4651_v45 = vadd.f32 %v4650_v7, %v4633_v53  ;;  %v5643_v7 = vpop.eup %5642 }
 0x706   :  { %vm4795_vm4 = vweird.f32 %v5643_v7 }
 0x707   :  { %v4669_v59 = vadd.f32 %v4668_v1, %v4651_v45 }
 0x70a   :  { %v4635_v48 = vpop.f32.mrf.mxu3 }
 0x70b   :  { %v4671_v6 = vpop.f32.mrf.mxu2  ;;  %v4636_v9 = vadd.f32 %v5635_v2, %v4635_v48  ;;  %v4791_v48 = vmul.f32 9.0, %v5643_v7  ;;  %v4877_v2 = vld [vmem:[%s9066_s11 + $0x10] sm:$0x3] }
 0x70c   :  { %v4655_v18 = vpop.f32.mrf.mxu1  ;;  %v4883_v22 = vsel %vm9641_vm9, %v4877_v2, 0 }
 0x70d   :  { %v4654_v57 = vadd.f32 %v4653_v38, %v4636_v9  ;;  %v4862_v18 = vld [vmem:[%s9639_s24] sm:$0x3]  ;;  %4892 = vmatpush.bf16.msrb.mxu3 %v4883_v22  ;;  %v4792_v19 = vsub.f32 1.0, %v4791_v48 }
 0x70f   :  { %v4672_v27 = vadd.f32 %v4671_v6, %v4654_v57  ;;  %v5604_v6 = vld [vmem:[%s9066_s11 + $0x8] sm:$0xff]  ;;  %v4793_v44 = vmul.f32 %v5643_v7, %v4792_v19 }
 0x710   :  { %4919 = vmatpush.bf16.msrb.mxu0 %v5604_v6 }
 0x712   :  { %v4637_v12 = vpop.f32.mrf.mxu3 }
 0x713   :  { %v4673_v47 = vpop.f32.mrf.mxu2  ;;  %v5603_v12 = vld [vmem:[%s9066_s11] sm:$0xff] }
 0x714   :  { %v4702_v35 = vpop.f32.mrf.mxu1  ;;  %v4865_v47 = vrot.slane %v4863_v63, 6  ;;  %4920 = vmatpush.bf16.msrb.mxu0 %v5603_v12 }
 0x71a   :  { %v4684_v56 = vpop.f32.mrf.mxu3 }
 0x71b   :  { %v4685_v24 = vadd.f32 %v4684_v56, %v4667_v42 }
 0x71c   :  { %v4704_v41 = vpop.f32.mrf.mxu1 }
 0x71d   :  { %v4703_v28 = vadd.f32 %v4702_v35, %v4685_v24  ;;  %v4867_v35 = vsel %vm9642_vm11, %v4862_v18, %v4865_v47  ;;  %v5638_v18 = vld [vmem:[%s9069_s14] ss:$0 sm:$0xff] }
 0x71e   :  { %v4878_v13 = vpack.c.bf16 %v4867_v35, %v4867_v35 }
 0x71f   :  { %vm4711_vm5 = vcmp.ge.f32.partialorder %v4703_v28, 0.0  ;;  %v4714_v14 = vmul.f32 0.01, %v4703_v28 }
 0x720   :  { %5487 = vmatmul.msk.bf16.vlgmr.msrb.gmra.mxu3 %vm998_vm0, %v4878_v13  ;;  %vm9644_vm0 = vmmov %vm9637_vm1  ;;  %v5612_v13 = vld [vmem:[%s9646_s1 + $0x8] sm:$0xff] }
 0x721   :  { %v4717_v4 = vsel %vm4711_vm5, %v4703_v28, %v4714_v14  ;;  %v4794_v14 = vadd.f32 %v5643_v7, %v4793_v44  ;;  %vm9645_vm1 = vmmov %vm9641_vm9 }
 0x722   :  { %v4723_v29 = vrot.slane %v4717_v4, 1  ;;  %v4724_v32 = vrot.slane %v4717_v4, 2  ;;  %v4725_v3 = vrot.slane %v4717_v4, 3  ;;  %4738 = vst [vmem:[#allocation1] ss:$9 sm:$0xff] %v4717_v4  ;;  %v4686_v36 = vpop.f32.mrf.mxu3  ;;  %v4726_v55 = vrot.slane %v4717_v4, 4 }
 0x723   :  { %v4727_v34 = vrot.slane %v4717_v4, 5  ;;  %v4728_v31 = vrot.slane %v4717_v4, 6  ;;  %v4687_v43 = vadd.f32 %v4686_v36, %v4669_v59  ;;  %v4729_v26 = vrot.slane %v4717_v4, 7 }
 0x724   :  { %4740 = vst [vmem:[#allocation1 + $0x1] ss:$9 sm:$0xff] %v4723_v29  ;;  %v4707_v0 = vpop.f32.mrf.mxu1 }
 0x725   :  { %4742 = vst [vmem:[#allocation1 + $0x2] ss:$9 sm:$0xff] %v4724_v32  ;;  %v4705_v20 = vadd.f32 %v4704_v41, %v4687_v43 }
 0x726   :  { %4744 = vst [vmem:[#allocation1 + $0x3] ss:$9 sm:$0xff] %v4725_v3  ;;  %v4796_v3 = vsel %vm4795_vm4, %v5643_v7, %v4794_v14 }
 0x727   :  { %4746 = vst [vmem:[#allocation1 + $0x4] ss:$9 sm:$0xff] %v4726_v55  ;;  %v4715_v17 = vmul.f32 0.01, %v4705_v20  ;;  %vm4712_vm12 = vcmp.ge.f32.partialorder %v4705_v20, 0.0 }
 0x728   :  { %4748 = vst [vmem:[#allocation1 + $0x5] ss:$9 sm:$0xff] %v4727_v34 }
 0x729   :  { %4750 = vst [vmem:[#allocation1 + $0x6] ss:$9 sm:$0xff] %v4728_v31  ;;  %v4718_v10 = vsel %vm4712_vm12, %v4705_v20, %v4715_v17  ;;  %v5608_v17 = vld [vmem:[%s9070_s15 + $0x8] sm:$0xff] }
 0x72a   :  { %4752 = vst [vmem:[#allocation1 + $0x7] ss:$9 sm:$0xff] %v4729_v26  ;;  %v4689_v58 = vpop.f32.mrf.mxu3  ;;  %v4730_v50 = vrot.slane %v4718_v10, 1  ;;  %v4731_v21 = vrot.slane %v4718_v10, 2  ;;  %v4732_v62 = vrot.slane %v4718_v10, 3  ;;  %v4733_v25 = vrot.slane %v4718_v10, 4  ;;  %5028 = vmatpush.bf16.msra.mxu0 %v5608_v17 }
 0x72b   :  { %v4690_v39 = vadd.f32 %v4689_v58, %v4672_v27  ;;  %v4734_v23 = vrot.slane %v4718_v10, 5  ;;  %v4735_v37 = vrot.slane %v4718_v10, 6  ;;  %v4736_v54 = vrot.slane %v4718_v10, 7 }
 0x72c   :  { %v4709_v46 = vpop.f32.mrf.mxu1 }
 0x72d   :  { %v4708_v52 = vadd.f32 %v4707_v0, %v4690_v39  ;;  %v5607_v46 = vld [vmem:[%s9070_s15] sm:$0xff] }
 0x72e   :  { %5029 = vmatpush.bf16.msra.mxu0 %v5607_v46 }
 0x72f   :  { %v4716_v33 = vmul.f32 0.01, %v4708_v52  ;;  %vm4713_vm13 = vcmp.ge.f32.partialorder %v4708_v52, 0.0 }
 0x731   :  { %v4753_v11 = vld [vmem:[#allocation1] sm:$0xff]  ;;  %v4719_v61 = vsel %vm4713_vm13, %v4708_v52, %v4716_v33  ;;  %vm5139_vm13 = vcmask 58368  }
 0x732   :  { %v4691_v40 = vpop.f32.mrf.mxu3  ;;  %4754 = vst [vmem:[#allocation1] ss:$9 sm:$0xff] %v4718_v10  ;;  %v4771_v16 = vsel %vm9638_vm8, %v4753_v11, 0.0  ;;  %v4737_v60 = vrot.slane %v4719_v61, 1  ;;  %v5503_v10 = vld [vmem:[%s9068_s13 + $0x8] sm:$0xf] }
 0x733   :  { %v5606_v11 = vld [vmem:[%s9068_s13 + $0x8] sm:$0x30]  ;;  %v5636_v40 = vld [vmem:[%s9065_s10] ss:$0 sm:$0xff]  ;;  %s5159_s10 = sshll.u32 %s9651_s16, 4  ;;  %s5160_s10 = int_to_ptr.hbm [resolvable:$true] %s5159_s10 }
 0x734   :  { %v5504_v27 = vor.u32 %v5606_v11, %v5503_v10 }
 0x739   :  { %v4755_v30 = vld [vmem:[#allocation1] sm:$0xff] }
 0x73a   :  { %4756 = vst [vmem:[#allocation1] ss:$9 sm:$0xff] %v4730_v50  ;;  %v4773_v15 = vsel %vm4772_vm10, %v4755_v30, 0.0 }
 0x73b   :  { %4757 = vst [vmem:[#allocation1 + $0x1] ss:$9 sm:$0xff] %v4731_v21  ;;  %v4774_v8 = vadd.f32 %v4773_v15, %v4771_v16  ;;  %v5610_v16 = vld [vmem:[%s9070_s15 + $0x18] sm:$0xff] }
 0x73c   :  { %4758 = vst [vmem:[#allocation1 + $0x2] ss:$9 sm:$0xff] %v4732_v62  ;;  %5055 = vmatpush.bf16.msrb.mxu1 %v5610_v16 }
 0x73d   :  { %4759 = vst [vmem:[#allocation1 + $0x3] ss:$9 sm:$0xff] %v4733_v25  ;;  %v4775_v5 = vrot.slane %v4774_v8, 4 }
 0x73e   :  { %4760 = vst [vmem:[#allocation1 + $0x4] ss:$9 sm:$0xff] %v4734_v23 }
 0x73f   :  { %4761 = vst [vmem:[#allocation1 + $0x5] ss:$9 sm:$0xff] %v4735_v37  ;;  %v4776_v38 = vadd.f32 %v4775_v5, %v4774_v8  ;;  %v5637_v8 = vld [vmem:[%s9067_s12] ss:$0 sm:$0xff] }
 0x740   :  { %4762 = vst [vmem:[#allocation1 + $0x6] ss:$9 sm:$0xff] %v4736_v54  ;;  %v5605_v54 = vld [vmem:[%s9068_s13] sm:$0xff] }
 0x741   :  { %4763 = vst [vmem:[#allocation1 + $0x7] ss:$9 sm:$0xff] %v4719_v61  ;;  %v4777_v49 = vrot.slane %v4776_v38, 2  ;;  %v5609_v61 = vld [vmem:[%s9070_s15 + $0x10] sm:$0xff] }
 0x742   :  { %5001 = vmatpush.bf16.msra.mxu3 %v5609_v61 }
 0x743   :  { %v4778_v56 = vadd.f32 %v4777_v49, %v4776_v38 }
 0x745   :  { %v4779_v41 = vrot.slane %v4778_v56, 1 }
 0x747   :  { %v4780_v29 = vadd.f32 %v4779_v41, %v4778_v56  ;;  %v5613_v56 = vld [vmem:[%s9647_s25] sm:$0xff] }
 0x748   :  { %v4764_v1 = vld [vmem:[#allocation1] sm:$0xff]  ;;  %5133 = vmatpush.bf16.msrb.mxu3 %v5613_v56 }
 0x749   :  { %4765 = vst [vmem:[#allocation1] ss:$9 sm:$0xff] %v4737_v60  ;;  %v4781_v53 = vsel %vm9643_vm2, %v4764_v1, 0.0  ;;  %v4797_v55 = vmul.f32 %v4796_v3, %v4780_v29 }
 0x74b   :  { %v4807_v43 = vpack.c.bf16 %v4797_v55, %v4797_v55 }
 0x74d   :  { %v4815_v26 = vunpack.c.l.b16 %v4807_v43 }
 0x750   :  { %v4766_v42 = vld [vmem:[#allocation1] sm:$0xff] }
 0x751   :  { %v4782_v24 = vsel %vm4772_vm10, %v4766_v42, 0.0  ;;  %v5611_v42 = vld [vmem:[%s9646_s1] sm:$0xff] }
 0x752   :  { %v4783_v28 = vadd.f32 %v4782_v24, %v4781_v53 }
 0x754   :  { %v4784_v45 = vrot.slane %v4783_v28, 4 }
 0x756   :  { %v4785_v4 = vadd.f32 %v4784_v45, %v4783_v28  ;;  %v5639_v28 = vld [vmem:[%s9648_s22] ss:$0 sm:$0xff] }
 0x758   :  { %v4786_v32 = vrot.slane %v4785_v4, 2 }
 0x75a   :  { %v4787_v36 = vadd.f32 %v4786_v32, %v4785_v4 }
 0x75c   :  { %v4788_v59 = vrot.slane %v4787_v36, 1 }
 0x75e   :  { %v4789_v34 = vadd.f32 %v4788_v59, %v4787_v36  ;;  %v5640_v36 = vld [vmem:[%s9649_s2] ss:$0 sm:$0xff] }
 0x760   :  { %v4798_v31 = vmul.f32 %v4796_v3, %v4789_v34 }
 0x762   :  { %v4808_v0 = vpack.c.bf16 %v4798_v31, %v4798_v31 }
 0x764   :  { %v4816_v20 = vunpack.c.l.b16 %v4808_v0 }
 0x766   :  { %v4817_v9 = vsel %vm3223_vm15, %v4816_v20, %v4815_v26  ;;  %vm4957_vm15 = vcmask 1045504   ;;  %v5641_v26 = vld [vmem:[%s9650_s28] ss:$0 sm:$0xff] }
 0x767   :  { %v4818_v58 = vpack.c.b16 %v4817_v9, %v4817_v9  ;;  %v4959_v39 = vsel %vm4957_vm15, %v5504_v27, 0 }
 0x768   :  { %4967 = vmatpush.bf16.msrb.mxu2 %v4959_v39 }
 0x769   :  { %5486 = vmatmul.msk.bf16.vlgmr.msra.gmra.mxu2 %vm9644_vm0, %v4818_v58 }
 0x76c   :  { %4968 = vmatpush.bf16.msrb.mxu2 %v5605_v54 }
 0x770   :  { %5100 = vmatpush.bf16.msra.mxu2 %v5612_v13 }
 0x774   :  { %5101 = vmatpush.bf16.msra.mxu2 %v5611_v42 }
 0x7a3   :  { %v4894_v57 = vpop.f32.mrf.mxu3 }
 0x7ab   :  { %v4896_v30 = vpop.f32.mrf.mxu3 }
 0x7ec   :  { %v4855_v50 = vpop.f32.mrf.mxu2 }
 0x7ed   :  { %v4856_v52 = vadd.f32 %v5636_v40, %v4855_v50 }
 0x7ef   :  { %vm4859_vm14 = vcmp.ge.f32.partialorder %v4856_v52, 0.0  ;;  %v4860_v21 = vmul.f32 0.01, %v4856_v52 }
 0x7f1   :  { %v4861_v62 = vsel %vm4859_vm14, %v4856_v52, %v4860_v21 }
 0x7f2   :  { %v4869_v25 = vrot.slane %v4861_v62, 6  ;;  %v4981_v15 = vpack.c.bf16 %v4861_v62, %v4861_v62 }
 0x7f4   :  { %v4871_v23 = vsel %vm9645_vm1, %v4861_v62, %v4869_v25  ;;  %v4857_v33 = vpop.f32.mrf.mxu2 }
 0x7f5   :  { %v4876_v37 = vpack.c.bf16 %v4871_v23, %v4871_v23 }
 0x7f7   :  { %5496 = vmatmul.msk.bf16.vlgmr.msrb.gmra.mxu0 %vm1215_vm7, %v4876_v37 }
 0x807   :  { %5519 = vmatmul.msk.bf16.vlgmr.msra.gmra.mxu0 %vm1215_vm7, %v4981_v15 }
 0x874   :  { %v4922_v51 = vpop.f32.mrf.mxu0 }
 0x875   :  { %v4923_v5 = vadd.f32 %v4922_v51, %v4894_v57 }
 0x877   :  { %v4930_v7 = vadd.f32 %v5637_v8, %v4923_v5 }
 0x879   :  { %vm4931_vm5 = vcmp.ge.f32.partialorder %v4930_v7, 0.0  ;;  %v4932_v60 = vmul.f32 0.01, %v4930_v7 }
 0x87b   :  { %v4933_v1 = vsel %vm4931_vm5, %v4930_v7, %v4932_v60 }
 0x87c   :  { %v4938_v38 = vpack.c.bf16 %v4933_v1, %v4933_v1  ;;  %v4924_v48 = vpop.f32.mrf.mxu0 }
 0x87e   :  { %5505 = vmatmul.msk.bf16.vlgmr.msrb.gmra.mxu2 %vm1186_vm6, %v4938_v38 }
 0x884   :  { %v5031_v6 = vpop.f32.mrf.mxu0 }
 0x88c   :  { %v5033_v2 = vpop.f32.mrf.mxu0 }
 0x901   :  { %v4970_v63 = vpop.f32.mrf.mxu2 }
 0x902   :  { %v4971_v12 = vadd.f32 %v5638_v18, %v4970_v63 }
 0x904   :  { %vm4974_vm12 = vcmp.ge.f32.partialorder %v4971_v12, 0.0  ;;  %v4975_v22 = vmul.f32 0.01, %v4971_v12 }
 0x906   :  { %v4976_v47 = vsel %vm4974_vm12, %v4971_v12, %v4975_v22 }
 0x907   :  { %v4984_v49 = vpack.c.bf16 %v4976_v47, %v4976_v47 }
 0x909   :  { %v5038_v19 = vrot.slane %v4984_v49, 1  ;;  %v4972_v35 = vpop.f32.mrf.mxu2  ;;  %5510 = vmatmul.msk.bf16.vlgmr.msra.gmra.mxu3 %vm1099_vm3, %v4984_v49 }
 0x90b   :  { %5524 = vmatmul.msk.bf16.vlgmr.msrb.gmra.mxu1 %vm1099_vm3, %v5038_v19 }
 0x988   :  { %v5057_v53 = vpop.f32.mrf.mxu1 }
 0x98c   :  { %v5003_v24 = vpop.f32.mrf.mxu3 }
 0x98d   :  { %v5032_v44 = vadd.f32 %v5031_v6, %v5003_v24 }
 0x98f   :  { %v5061_v41 = vadd.f32 %v5057_v53, %v5032_v44 }
 0x990   :  { %v5059_v45 = vpop.f32.mrf.mxu1 }
 0x991   :  { %v5066_v14 = vadd.f32 %v5639_v28, %v5061_v41 }
 0x993   :  { %vm5067_vm6 = vcmp.ge.f32.partialorder %v5066_v14, 0.0  ;;  %v5068_v4 = vmul.f32 0.01, %v5066_v14 }
 0x994   :  { %v5005_v29 = vpop.f32.mrf.mxu3 }
 0x995   :  { %v5069_v32 = vsel %vm5067_vm6, %v5066_v14, %v5068_v4 }
 0x996   :  { %v5074_v3 = vpack.c.bf16 %v5069_v32, %v5069_v32 }
 0x998   :  { %5533 = vmatmul.msk.bf16.vlgmr.msra.gmra.mxu2 %vm1215_vm7, %v5074_v3 }
 0xa1b   :  { %v5103_v59 = vpop.f32.mrf.mxu2 }
 0xa1c   :  { %v5104_v55 = vadd.f32 %v5640_v36, %v5103_v59 }
 0xa1e   :  { %vm5107_vm10 = vcmp.ge.f32.partialorder %v5104_v55, 0.0  ;;  %v5108_v34 = vmul.f32 0.01, %v5104_v55 }
 0xa20   :  { %v5109_v31 = vsel %vm5107_vm10, %v5104_v55, %v5108_v34 }
 0xa21   :  { %v5112_v43 = vpack.c.bf16 %v5109_v31, %v5109_v31 }
 0xa23   :  { %v5105_v0 = vpop.f32.mrf.mxu2  ;;  %5538 = vmatmul.msk.bf16.vlgmr.msrb.gmra.mxu3 %vm1099_vm3, %v5112_v43 }
 0xaa6   :  { %v5135_v20 = vpop.f32.mrf.mxu3 }
 0xaa7   :  { %v5136_v9 = vadd.f32 %v5641_v26, %v5135_v20 }
 0xaa9   :  { %v5140_v58 = vsel %vm5139_vm13, %v5136_v9, -inf }
 0xaaa   :  { %5141 = vmax.xlane.f32.xlu0 %v5140_v58 }
 0xaae   :  { %v5137_v17 = vpop.f32.mrf.mxu3 }
 0xb1d   :  { %v5142_v46 = vpop.xlane.xlu0 %5141 }
 0xb1e   :  { %v5143_v57 = vsub.f32 %v5136_v9, %v5142_v46 }
 0xb20   :  { %v5144_v10 = vmul.f32 1.442695, %v5143_v57 }
 0xb22   :  { %5644 = vpow2.f32 %v5144_v10 }
 0xb28   :  { %v5645_v11 = vpop.eup %5644 }
 0xb29   :  { %v5146_v27 = vsel %vm5139_vm13, %v5645_v11, 0.0 }
 0xb2a   :  { %5147 = vadd.xlane.f32.xlu1 %v5146_v27 }
 0xb9d   :  { %v5148_v40 = vpop.xlane.xlu1 %5147 }
 0xb9e   :  { %5646 = vrcp.f32 %v5148_v40 }
 0xba4   :  { %v5647_v39 = vpop.eup %5646 }
 0xba5   :  { %v5150_v50 = vmul.f32 %v5647_v39, %v5645_v11 }
 0xba7   :  { %5151 = vst.msk [vmem:[#allocation2] sm:$0x3] %vm5139_vm13, %v5150_v50 }
 0xba8   :  { %5162 = dma.vmem_to_hbm [thread:$0]  %s5158_s23, 32, %s5160_s10, [#allocation3]  }
 0xba9   :  { %5672 = dma.done.wait [#allocation3], 32  }
 0xbaa   :  { %5673 = vsyncadd [#allocation3], 4294967264 }
 0xbab   :  { %5167 = vsyncpa [#allocation3], 1 }

</bundles_post_ra>
